<compile_context>
chip_gen: v5e
topology: v5e:2x2
jax: 0.10.0
libtpu: 0.0.40
codegen_flags: <defaults>
</compile_context>

<pallas_src>
import math
import jax
import jax.numpy as jnp
from jax.experimental import pallas as pl
from jax.experimental.pallas import tpu as pltpu

# Small synthetic "KoBERT" config, sized so every HBM-facing tensor is
# lane-dense (last dim a multiple of 128) or a full-array block.
B, S, H, NH, FFN, LAYERS, VOCAB, NCLS = 2, 8, 128, 2, 256, 2, 100, 2
DH = H // NH
NCLS_PAD = 128            # classifier output padded to a full 128-lane store
LN_EPS = 1e-12
DR_RATE = 0.5             # nn.Dropout(p=dr_rate) -> identity at inference (eval mode)
NEG_INF = -1e9


def _layer_norm(y, g, b):
    mu = jnp.mean(y, axis=-1, keepdims=True)
    var = jnp.mean(jnp.square(y - mu), axis=-1, keepdims=True)
    return (y - mu) * jax.lax.rsqrt(var + LN_EPS) * g + b


def _erf(x):
    # Abramowitz & Stegun 7.1.26 (|err| < 1.5e-7): exact-erf GELU semantics using
    # only elementwise VPU/EUP ops (mul/add/abs/exp/div), safe for Mosaic lowering.
    p = 0.3275911
    a1, a2, a3, a4, a5 = 0.254829592, -0.284496736, 1.421413741, -1.453152027, 1.061405429
    sgn = jnp.where(x >= 0.0, 1.0, -1.0)
    ax = jnp.abs(x)
    t = 1.0 / (1.0 + p * ax)
    poly = ((((a5 * t + a4) * t + a3) * t + a2) * t + a1) * t
    return sgn * (1.0 - poly * jnp.exp(-ax * ax))


def _gelu_erf(x):
    return 0.5 * x * (1.0 + _erf(x * (1.0 / math.sqrt(2.0))))


# ---------------------------------------------------------------------------
# Single fused Pallas kernel: emb-LN -> LAYERS x encoder layer -> pooler -> cls
# ---------------------------------------------------------------------------
def bert_kernel(vl_ref,                                   # scalar prefetch (SMEM): valid_length (B,)
                emb_ref, embg_ref, embb_ref,
                wq_ref, bq_ref, wk_ref, bk_ref, wv_ref, bv_ref,
                wo_ref, bo_ref, ln1g_ref, ln1b_ref,
                w1_ref, b1_ref, w2_ref, b2_ref, ln2g_ref, ln2b_ref,
                wp_ref, bp_ref, wc_ref, bc_ref, o_ref):
    f32, bf16 = jnp.float32, jnp.bfloat16

    # ---- embedding LayerNorm (fused; no separate launch) --------------------
    x = _layer_norm(emb_ref[...], embg_ref[...], embb_ref[...])          # (B*S, H) f32

    # ---- gen_attention_mask equivalent, built in-kernel from SMEM scalars ---
    key_pos = jax.lax.broadcasted_iota(jnp.int32, (S, S), 1)
    mask_bias = [jnp.where(key_pos < vl_ref[b], 0.0, NEG_INF).astype(f32)
                 for b in range(B)]                                      # per-batch (S, S)

    scale = 1.0 / math.sqrt(DH)

    # ---- encoder layers (statically unrolled; all weights VMEM-resident) ----
    for l in range(LAYERS):
        xb = x.astype(bf16)                                              # (B*S, H) MXU operand
        attn = jnp.zeros((B * S, H), f32)
        for h in range(NH):
            # Per-head projections on the full batch slab. Weights are pre-split
            # per head host-side, so no non-128-aligned lane slices are needed.
            qh = jnp.dot(xb, wq_ref[l, h], preferred_element_type=f32) + bq_ref[l, h]
            kh = jnp.dot(xb, wk_ref[l, h], preferred_element_type=f32) + bk_ref[l, h]
            vh = (jnp.dot(xb, wv_ref[l, h], preferred_element_type=f32)
                  + bv_ref[l, h]).astype(bf16)                           # (B*S, DH)
            outs = []
            for b in range(B):                                           # sublane-aligned row windows
                qb = qh[b * S:(b + 1) * S, :].astype(bf16)
                kb = kh[b * S:(b + 1) * S, :].astype(bf16)
                vb = vh[b * S:(b + 1) * S, :]
                s = jnp.einsum("qd,kd->qk", qb, kb,
                               preferred_element_type=f32) * scale + mask_bias[b]
                m = jnp.max(s, axis=-1, keepdims=True)
                p = jnp.exp(s - m)
                p = p * pl.reciprocal(jnp.sum(p, axis=-1, keepdims=True), approx=True)
                outs.append(jnp.dot(p.astype(bf16), vb, preferred_element_type=f32))
            head = jnp.concatenate(outs, axis=0).astype(bf16)            # (B*S, DH) row concat
            # Head merge via summed per-head output projections (no lane concat).
            attn = attn + jnp.dot(head, wo_ref[l, h], preferred_element_type=f32)
        attn = attn + bo_ref[l]
        y = _layer_norm(attn + x, ln1g_ref[l], ln1b_ref[l])              # add & norm 1

        hmid = jnp.dot(y.astype(bf16), w1_ref[l], preferred_element_type=f32) + b1_ref[l]
        hmid = _gelu_erf(hmid)                                           # exact erf GELU
        f = jnp.dot(hmid.astype(bf16), w2_ref[l], preferred_element_type=f32) + b2_ref[l]
        x = _layer_norm(f + y, ln2g_ref[l], ln2b_ref[l])                 # add & norm 2

    # ---- pooler tanh(W_p h_[CLS] + b_p) -> dropout(identity) -> classifier --
    # TODO(synk): dropout(p=DR_RATE) omitted - identity at inference (eval mode).
    h0 = jnp.concatenate([x[b * S:b * S + 1, :] for b in range(B)], axis=0)   # (B, H) CLS rows
    pooled = jnp.tanh(jnp.dot(h0.astype(bf16), wp_ref[...],
                              preferred_element_type=f32) + bp_ref[...])
    o_ref[...] = (jnp.dot(pooled.astype(bf16), wc_ref[...],
                          preferred_element_type=f32) + bc_ref[...])     # (B, NCLS_PAD) lane-dense


# ---------------------------------------------------------------------------
# pallas_call wrapper (one launch for the whole model)
# ---------------------------------------------------------------------------
_WEIGHT_KEYS = ("emb_ln_g", "emb_ln_b",
                "wq", "bq", "wk", "bk", "wv", "bv", "wo", "bo",
                "ln1_g", "ln1_b", "w1", "b1", "w2", "b2", "ln2_g", "ln2_b",
                "wp", "bp", "wc_pad", "bc_pad")


def _full_spec(a):
    # Full-array block, constant index map (VMEM-resident across the single step).
    return pl.BlockSpec(a.shape, lambda i, vl, _nd=a.ndim: (0,) * _nd)


def bert_classifier_forward(params, token_ids, valid_length, segment_ids):
    # TODO(synk): embedding-table gathers (word/pos/segment) stay as JAX glue.
    emb = (params["word_emb"][token_ids]
           + params["seg_emb"][segment_ids]
           + params["pos_emb"][None, :, :]).astype(jnp.float32).reshape(B * S, H)
    ws = [params[k] for k in _WEIGHT_KEYS]

    logits_pad = pl.pallas_call(
        bert_kernel,
        out_shape=jax.ShapeDtypeStruct((B, NCLS_PAD), jnp.float32),
        grid_spec=pltpu.PrefetchScalarGridSpec(
            num_scalar_prefetch=1,                 # valid_length -> SMEM
            grid=(1,),                             # single fused grid step
            in_specs=[_full_spec(emb)] + [_full_spec(w) for w in ws],
            out_specs=pl.BlockSpec((B, NCLS_PAD), lambda i, vl: (0, 0)),
        ),
        compiler_params=pltpu.CompilerParams(dimension_semantics=("arbitrary",)),
    )(valid_length.astype(jnp.int32), emb, *ws)
    return logits_pad[:, :NCLS]


# ---------------------------------------------------------------------------
# Deterministic parameter init (synthetic weights, BERT-style shapes)
# ---------------------------------------------------------------------------
def init_params(key):
    keys = iter(jax.random.split(key, 16))

    def nrm(shape, dtype=jnp.float32):
        return (0.02 * jax.random.normal(next(keys), shape, jnp.float32)).astype(dtype)

    zeros = lambda shape: jnp.zeros(shape, jnp.float32)
    ones = lambda shape: jnp.ones(shape, jnp.float32)

    wc = nrm((H, NCLS))                                    # nn.Linear(hidden, num_classes)
    wc_pad = jnp.zeros((H, NCLS_PAD), jnp.float32).at[:, :NCLS].set(wc).astype(jnp.bfloat16)

    return dict(
        word_emb=nrm((VOCAB, H)),
        pos_emb=nrm((S, H)),
        seg_emb=nrm((2, H)),
        emb_ln_g=ones((1, H)), emb_ln_b=zeros((1, H)),
        # Q/K/V/O weights pre-split per head and stacked over (layer, head) so the
        # kernel never slices the lane dim at non-128-aligned offsets.
        wq=nrm((LAYERS, NH, H, DH), jnp.bfloat16), bq=zeros((LAYERS, NH, 1, DH)),
        wk=nrm((LAYERS, NH, H, DH), jnp.bfloat16), bk=zeros((LAYERS, NH, 1, DH)),
        wv=nrm((LAYERS, NH, H, DH), jnp.bfloat16), bv=zeros((LAYERS, NH, 1, DH)),
        wo=nrm((LAYERS, NH, DH, H), jnp.bfloat16), bo=zeros((LAYERS, 1, H)),
        ln1_g=ones((LAYERS, 1, H)), ln1_b=zeros((LAYERS, 1, H)),
        w1=nrm((LAYERS, H, FFN), jnp.bfloat16), b1=zeros((LAYERS, 1, FFN)),
        w2=nrm((LAYERS, FFN, H), jnp.bfloat16), b2=zeros((LAYERS, 1, H)),
        ln2_g=ones((LAYERS, 1, H)), ln2_b=zeros((LAYERS, 1, H)),
        wp=nrm((H, H), jnp.bfloat16), bp=zeros((1, H)),    # BERT pooler
        wc_pad=wc_pad, bc_pad=zeros((1, NCLS_PAD)),        # classifier (lane-padded)
    )


if __name__ == "__main__":
    key = jax.random.PRNGKey(0)
    kp, kt = jax.random.split(key, 2)
    params = init_params(kp)

    token_ids = jax.random.randint(kt, (B, S), 0, VOCAB, dtype=jnp.int32)
    segment_ids = jnp.zeros((B, S), jnp.int32)
    valid_length = jnp.array([S, 5], jnp.int32)

    logits = bert_classifier_forward(params, token_ids, valid_length, segment_ids)
    logits = jax.block_until_ready(logits)
    assert logits.shape == (B, NCLS) and logits.dtype == jnp.float32
    print("KERNEL_OK")
</pallas_src>

<mosaic_0001>
module attributes {stable_mosaic.version = 11 : i64} {
  func.func @bert_kernel(%arg0: i32, %arg1: memref<2xi32, #tpu.memory_space<smem>>, %arg2: memref<16x128xf32, #tpu.memory_space<vmem>>, %arg3: memref<1x128xf32, #tpu.memory_space<vmem>>, %arg4: memref<1x128xf32, #tpu.memory_space<vmem>>, %arg5: memref<2x2x128x64xbf16, #tpu.memory_space<vmem>>, %arg6: memref<2x2x1x64xf32, #tpu.memory_space<vmem>>, %arg7: memref<2x2x128x64xbf16, #tpu.memory_space<vmem>>, %arg8: memref<2x2x1x64xf32, #tpu.memory_space<vmem>>, %arg9: memref<2x2x128x64xbf16, #tpu.memory_space<vmem>>, %arg10: memref<2x2x1x64xf32, #tpu.memory_space<vmem>>, %arg11: memref<2x2x64x128xbf16, #tpu.memory_space<vmem>>, %arg12: memref<2x1x128xf32, #tpu.memory_space<vmem>>, %arg13: memref<2x1x128xf32, #tpu.memory_space<vmem>>, %arg14: memref<2x1x128xf32, #tpu.memory_space<vmem>>, %arg15: memref<2x128x256xbf16, #tpu.memory_space<vmem>>, %arg16: memref<2x1x256xf32, #tpu.memory_space<vmem>>, %arg17: memref<2x256x128xbf16, #tpu.memory_space<vmem>>, %arg18: memref<2x1x128xf32, #tpu.memory_space<vmem>>, %arg19: memref<2x1x128xf32, #tpu.memory_space<vmem>>, %arg20: memref<2x1x128xf32, #tpu.memory_space<vmem>>, %arg21: memref<128x128xbf16, #tpu.memory_space<vmem>>, %arg22: memref<1x128xf32, #tpu.memory_space<vmem>>, %arg23: memref<128x128xbf16, #tpu.memory_space<vmem>>, %arg24: memref<1x128xf32, #tpu.memory_space<vmem>>, %arg25: memref<2x128xf32, #tpu.memory_space<vmem>>) attributes {dimension_semantics = [#tpu.dimension_semantics<arbitrary>], iteration_bounds = array<i64: 1>, scalar_prefetch = 1 : i64, scratch_operands = 0 : i64, tpu.core_type = #tpu.core_type<tc>, window_params = [{pipeline_mode = #tpu.pipeline_mode<synchronous>, transform_indices = @transform_0, window_bounds = array<i64: 16, 128>}, {pipeline_mode = #tpu.pipeline_mode<synchronous>, transform_indices = @transform_1, window_bounds = array<i64: 1, 128>}, {pipeline_mode = #tpu.pipeline_mode<synchronous>, transform_indices = @transform_2, window_bounds = array<i64: 1, 128>}, {pipeline_mode = #tpu.pipeline_mode<synchronous>, transform_indices = @transform_3, window_bounds = array<i64: 2, 2, 128, 64>}, {pipeline_mode = #tpu.pipeline_mode<synchronous>, transform_indices = @transform_4, window_bounds = array<i64: 2, 2, 1, 64>}, {pipeline_mode = #tpu.pipeline_mode<synchronous>, transform_indices = @transform_5, window_bounds = array<i64: 2, 2, 128, 64>}, {pipeline_mode = #tpu.pipeline_mode<synchronous>, transform_indices = @transform_6, window_bounds = array<i64: 2, 2, 1, 64>}, {pipeline_mode = #tpu.pipeline_mode<synchronous>, transform_indices = @transform_7, window_bounds = array<i64: 2, 2, 128, 64>}, {pipeline_mode = #tpu.pipeline_mode<synchronous>, transform_indices = @transform_8, window_bounds = array<i64: 2, 2, 1, 64>}, {pipeline_mode = #tpu.pipeline_mode<synchronous>, transform_indices = @transform_9, window_bounds = array<i64: 2, 2, 64, 128>}, {pipeline_mode = #tpu.pipeline_mode<synchronous>, transform_indices = @transform_10, window_bounds = array<i64: 2, 1, 128>}, {pipeline_mode = #tpu.pipeline_mode<synchronous>, transform_indices = @transform_11, window_bounds = array<i64: 2, 1, 128>}, {pipeline_mode = #tpu.pipeline_mode<synchronous>, transform_indices = @transform_12, window_bounds = array<i64: 2, 1, 128>}, {pipeline_mode = #tpu.pipeline_mode<synchronous>, transform_indices = @transform_13, window_bounds = array<i64: 2, 128, 256>}, {pipeline_mode = #tpu.pipeline_mode<synchronous>, transform_indices = @transform_14, window_bounds = array<i64: 2, 1, 256>}, {pipeline_mode = #tpu.pipeline_mode<synchronous>, transform_indices = @transform_15, window_bounds = array<i64: 2, 256, 128>}, {pipeline_mode = #tpu.pipeline_mode<synchronous>, transform_indices = @transform_16, window_bounds = array<i64: 2, 1, 128>}, {pipeline_mode = #tpu.pipeline_mode<synchronous>, transform_indices = @transform_17, window_bounds = array<i64: 2, 1, 128>}, {pipeline_mode = #tpu.pipeline_mode<synchronous>, transform_indices = @transform_18, window_bounds = array<i64: 2, 1, 128>}, {pipeline_mode = #tpu.pipeline_mode<synchronous>, transform_indices = @transform_19, window_bounds = array<i64: 128, 128>}, {pipeline_mode = #tpu.pipeline_mode<synchronous>, transform_indices = @transform_20, window_bounds = array<i64: 1, 128>}, {pipeline_mode = #tpu.pipeline_mode<synchronous>, transform_indices = @transform_21, window_bounds = array<i64: 128, 128>}, {pipeline_mode = #tpu.pipeline_mode<synchronous>, transform_indices = @transform_22, window_bounds = array<i64: 1, 128>}, {pipeline_mode = #tpu.pipeline_mode<synchronous>, transform_indices = @transform_23, window_bounds = array<i64: 2, 128>}]} {
    %c0 = arith.constant 0 : index
    %c0_0 = arith.constant 0 : index
    %0 = vector.load %arg2[%c0, %c0_0] : memref<16x128xf32, #tpu.memory_space<vmem>>, vector<16x128xf32>
    %c0_1 = arith.constant 0 : index
    %c0_2 = arith.constant 0 : index
    %1 = vector.load %arg3[%c0_1, %c0_2] : memref<1x128xf32, #tpu.memory_space<vmem>>, vector<1x128xf32>
    %c0_3 = arith.constant 0 : index
    %c0_4 = arith.constant 0 : index
    %2 = vector.load %arg4[%c0_3, %c0_4] : memref<1x128xf32, #tpu.memory_space<vmem>>, vector<1x128xf32>
    %cst = arith.constant dense<0.000000e+00> : vector<16xf32>
    %3 = vector.multi_reduction <add>, %0, %cst [1] : vector<16x128xf32> to vector<16xf32>
    %4 = vector.shape_cast %3 : vector<16xf32> to vector<16x1xf32>
    %cst_5 = arith.constant 1.280000e+02 : f32
    %5 = vector.broadcast %cst_5 : f32 to vector<16x1xf32>
    %6 = arith.divf %4, %5 : vector<16x1xf32>
    %7 = vector.broadcast %6 : vector<16x1xf32> to vector<16x128xf32>
    %8 = arith.subf %0, %7 : vector<16x128xf32>
    %9 = arith.mulf %8, %8 : vector<16x128xf32>
    %cst_6 = arith.constant dense<0.000000e+00> : vector<16xf32>
    %10 = vector.multi_reduction <add>, %9, %cst_6 [1] : vector<16x128xf32> to vector<16xf32>
    %11 = vector.shape_cast %10 : vector<16xf32> to vector<16x1xf32>
    %cst_7 = arith.constant 1.280000e+02 : f32
    %12 = vector.broadcast %cst_7 : f32 to vector<16x1xf32>
    %13 = arith.divf %11, %12 : vector<16x1xf32>
    %14 = vector.broadcast %6 : vector<16x1xf32> to vector<16x128xf32>
    %15 = arith.subf %0, %14 : vector<16x128xf32>
    %cst_8 = arith.constant 9.99999996E-13 : f32
    %16 = vector.broadcast %cst_8 : f32 to vector<16x1xf32>
    %17 = arith.addf %13, %16 : vector<16x1xf32>
    %18 = math.rsqrt %17 : vector<16x1xf32>
    %19 = vector.broadcast %18 : vector<16x1xf32> to vector<16x128xf32>
    %20 = arith.mulf %15, %19 : vector<16x128xf32>
    %21 = vector.broadcast %1 : vector<1x128xf32> to vector<16x128xf32>
    %22 = arith.mulf %20, %21 : vector<16x128xf32>
    %23 = vector.broadcast %2 : vector<1x128xf32> to vector<16x128xf32>
    %24 = arith.addf %22, %23 : vector<16x128xf32>
    %25 = tpu.iota {dimensions = array<i32: 1>} : vector<8x8xi32>
    %c0_9 = arith.constant 0 : index
    %26 = memref.load %arg1[%c0_9] : memref<2xi32, #tpu.memory_space<smem>>
    %27 = vector.broadcast %26 : i32 to vector<8x8xi32>
    %28 = arith.cmpi slt, %25, %27 : vector<8x8xi32>
    %cst_10 = arith.constant 0.000000e+00 : f32
    %cst_11 = arith.constant -1.000000e+09 : f32
    %29 = vector.broadcast %cst_10 : f32 to vector<8x8xf32>
    %30 = vector.broadcast %cst_11 : f32 to vector<8x8xf32>
    %31 = arith.select %28, %29, %30 : vector<8x8xi1>, vector<8x8xf32>
    %c1 = arith.constant 1 : index
    %32 = memref.load %arg1[%c1] : memref<2xi32, #tpu.memory_space<smem>>
    %33 = vector.broadcast %32 : i32 to vector<8x8xi32>
    %34 = arith.cmpi slt, %25, %33 : vector<8x8xi32>
    %cst_12 = arith.constant 0.000000e+00 : f32
    %cst_13 = arith.constant -1.000000e+09 : f32
    %35 = vector.broadcast %cst_12 : f32 to vector<8x8xf32>
    %36 = vector.broadcast %cst_13 : f32 to vector<8x8xf32>
    %37 = arith.select %34, %35, %36 : vector<8x8xi1>, vector<8x8xf32>
    %38 = arith.truncf %24 : vector<16x128xf32> to vector<16x128xbf16>
    %cst_14 = arith.constant 0.000000e+00 : f32
    %39 = vector.broadcast %cst_14 : f32 to vector<16x128xf32>
    %c0_15 = arith.constant 0 : index
    %c0_16 = arith.constant 0 : index
    %c0_17 = arith.constant 0 : index
    %c0_18 = arith.constant 0 : index
    %40 = vector.load %arg5[%c0_15, %c0_16, %c0_17, %c0_18] : memref<2x2x128x64xbf16, #tpu.memory_space<vmem>>, vector<1x1x128x64xbf16>
    %41 = vector.shape_cast %40 : vector<1x1x128x64xbf16> to vector<128x64xbf16>
    %cst_19 = arith.constant dense<0.000000e+00> : vector<16x64xf32>
    %42 = tpu.matmul %38, %41, %cst_19 {dimension_numbers = #tpu.dot_dimension_numbers<[1], [0], [0], [1], [0, 0, 1, 1], [], []>} : vector<16x128xbf16>, vector<128x64xbf16>, vector<16x64xf32> -> vector<16x64xf32>
    %c0_20 = arith.constant 0 : index
    %c0_21 = arith.constant 0 : index
    %c0_22 = arith.constant 0 : index
    %c0_23 = arith.constant 0 : index
    %43 = vector.load %arg6[%c0_20, %c0_21, %c0_22, %c0_23] : memref<2x2x1x64xf32, #tpu.memory_space<vmem>>, vector<1x1x1x64xf32>
    %44 = vector.shape_cast %43 : vector<1x1x1x64xf32> to vector<1x64xf32>
    %45 = vector.broadcast %44 : vector<1x64xf32> to vector<16x64xf32>
    %46 = arith.addf %42, %45 : vector<16x64xf32>
    %c0_24 = arith.constant 0 : index
    %c0_25 = arith.constant 0 : index
    %c0_26 = arith.constant 0 : index
    %c0_27 = arith.constant 0 : index
    %47 = vector.load %arg7[%c0_24, %c0_25, %c0_26, %c0_27] : memref<2x2x128x64xbf16, #tpu.memory_space<vmem>>, vector<1x1x128x64xbf16>
    %48 = vector.shape_cast %47 : vector<1x1x128x64xbf16> to vector<128x64xbf16>
    %cst_28 = arith.constant dense<0.000000e+00> : vector<16x64xf32>
    %49 = tpu.matmul %38, %48, %cst_28 {dimension_numbers = #tpu.dot_dimension_numbers<[1], [0], [0], [1], [0, 0, 1, 1], [], []>} : vector<16x128xbf16>, vector<128x64xbf16>, vector<16x64xf32> -> vector<16x64xf32>
    %c0_29 = arith.constant 0 : index
    %c0_30 = arith.constant 0 : index
    %c0_31 = arith.constant 0 : index
    %c0_32 = arith.constant 0 : index
    %50 = vector.load %arg8[%c0_29, %c0_30, %c0_31, %c0_32] : memref<2x2x1x64xf32, #tpu.memory_space<vmem>>, vector<1x1x1x64xf32>
    %51 = vector.shape_cast %50 : vector<1x1x1x64xf32> to vector<1x64xf32>
    %52 = vector.broadcast %51 : vector<1x64xf32> to vector<16x64xf32>
    %53 = arith.addf %49, %52 : vector<16x64xf32>
    %c0_33 = arith.constant 0 : index
    %c0_34 = arith.constant 0 : index
    %c0_35 = arith.constant 0 : index
    %c0_36 = arith.constant 0 : index
    %54 = vector.load %arg9[%c0_33, %c0_34, %c0_35, %c0_36] : memref<2x2x128x64xbf16, #tpu.memory_space<vmem>>, vector<1x1x128x64xbf16>
    %55 = vector.shape_cast %54 : vector<1x1x128x64xbf16> to vector<128x64xbf16>
    %cst_37 = arith.constant dense<0.000000e+00> : vector<16x64xf32>
    %56 = tpu.matmul %38, %55, %cst_37 {dimension_numbers = #tpu.dot_dimension_numbers<[1], [0], [0], [1], [0, 0, 1, 1], [], []>} : vector<16x128xbf16>, vector<128x64xbf16>, vector<16x64xf32> -> vector<16x64xf32>
    %c0_38 = arith.constant 0 : index
    %c0_39 = arith.constant 0 : index
    %c0_40 = arith.constant 0 : index
    %c0_41 = arith.constant 0 : index
    %57 = vector.load %arg10[%c0_38, %c0_39, %c0_40, %c0_41] : memref<2x2x1x64xf32, #tpu.memory_space<vmem>>, vector<1x1x1x64xf32>
    %58 = vector.shape_cast %57 : vector<1x1x1x64xf32> to vector<1x64xf32>
    %59 = vector.broadcast %58 : vector<1x64xf32> to vector<16x64xf32>
    %60 = arith.addf %56, %59 : vector<16x64xf32>
    %61 = arith.truncf %60 : vector<16x64xf32> to vector<16x64xbf16>
    %62 = vector.extract_strided_slice %46 {offsets = [0, 0], sizes = [8, 64], strides = [1, 1]} : vector<16x64xf32> to vector<8x64xf32>
    %63 = arith.truncf %62 : vector<8x64xf32> to vector<8x64xbf16>
    %64 = vector.extract_strided_slice %53 {offsets = [0, 0], sizes = [8, 64], strides = [1, 1]} : vector<16x64xf32> to vector<8x64xf32>
    %65 = arith.truncf %64 : vector<8x64xf32> to vector<8x64xbf16>
    %66 = vector.extract_strided_slice %61 {offsets = [0, 0], sizes = [8, 64], strides = [1, 1]} : vector<16x64xbf16> to vector<8x64xbf16>
    "tpu.trace_start"() <{level = 10 : i32, message = "qd,kd->qk"}> : () -> ()
    %cst_42 = arith.constant dense<0.000000e+00> : vector<8x8xf32>
    %67 = tpu.matmul %63, %65, %cst_42 {dimension_numbers = #tpu.dot_dimension_numbers<[1], [1], [0], [0], [0, 0, 1, 0], [], []>} : vector<8x64xbf16>, vector<8x64xbf16>, vector<8x8xf32> -> vector<8x8xf32>
    "tpu.trace_stop"() : () -> ()
    %cst_43 = arith.constant 1.250000e-01 : f32
    %68 = vector.broadcast %cst_43 : f32 to vector<8x8xf32>
    %69 = arith.mulf %67, %68 : vector<8x8xf32>
    %70 = arith.addf %69, %31 : vector<8x8xf32>
    %cst_44 = arith.constant dense<0xFF800000> : vector<8xf32>
    %71 = vector.multi_reduction <maximumf>, %70, %cst_44 [1] : vector<8x8xf32> to vector<8xf32>
    %72 = vector.shape_cast %71 : vector<8xf32> to vector<8x1xf32>
    %73 = vector.broadcast %72 : vector<8x1xf32> to vector<8x8xf32>
    %74 = arith.subf %70, %73 : vector<8x8xf32>
    %75 = math.exp %74 : vector<8x8xf32>
    %cst_45 = arith.constant dense<0.000000e+00> : vector<8xf32>
    %76 = vector.multi_reduction <add>, %75, %cst_45 [1] : vector<8x8xf32> to vector<8xf32>
    %77 = vector.shape_cast %76 : vector<8xf32> to vector<8x1xf32>
    %78 = tpu.reciprocal %77 {approx = true} : vector<8x1xf32> -> vector<8x1xf32>
    %79 = vector.broadcast %78 : vector<8x1xf32> to vector<8x8xf32>
    %80 = arith.mulf %75, %79 : vector<8x8xf32>
    %81 = arith.truncf %80 : vector<8x8xf32> to vector<8x8xbf16>
    %cst_46 = arith.constant dense<0.000000e+00> : vector<8x64xf32>
    %82 = tpu.matmul %81, %66, %cst_46 {dimension_numbers = #tpu.dot_dimension_numbers<[1], [0], [0], [1], [0, 0, 1, 1], [], []>} : vector<8x8xbf16>, vector<8x64xbf16>, vector<8x64xf32> -> vector<8x64xf32>
    %83 = vector.extract_strided_slice %46 {offsets = [8, 0], sizes = [8, 64], strides = [1, 1]} : vector<16x64xf32> to vector<8x64xf32>
    %84 = arith.truncf %83 : vector<8x64xf32> to vector<8x64xbf16>
    %85 = vector.extract_strided_slice %53 {offsets = [8, 0], sizes = [8, 64], strides = [1, 1]} : vector<16x64xf32> to vector<8x64xf32>
    %86 = arith.truncf %85 : vector<8x64xf32> to vector<8x64xbf16>
    %87 = vector.extract_strided_slice %61 {offsets = [8, 0], sizes = [8, 64], strides = [1, 1]} : vector<16x64xbf16> to vector<8x64xbf16>
    "tpu.trace_start"() <{level = 10 : i32, message = "qd,kd->qk"}> : () -> ()
    %cst_47 = arith.constant dense<0.000000e+00> : vector<8x8xf32>
    %88 = tpu.matmul %84, %86, %cst_47 {dimension_numbers = #tpu.dot_dimension_numbers<[1], [1], [0], [0], [0, 0, 1, 0], [], []>} : vector<8x64xbf16>, vector<8x64xbf16>, vector<8x8xf32> -> vector<8x8xf32>
    "tpu.trace_stop"() : () -> ()
    %cst_48 = arith.constant 1.250000e-01 : f32
    %89 = vector.broadcast %cst_48 : f32 to vector<8x8xf32>
    %90 = arith.mulf %88, %89 : vector<8x8xf32>
    %91 = arith.addf %90, %37 : vector<8x8xf32>
    %cst_49 = arith.constant dense<0xFF800000> : vector<8xf32>
    %92 = vector.multi_reduction <maximumf>, %91, %cst_49 [1] : vector<8x8xf32> to vector<8xf32>
    %93 = vector.shape_cast %92 : vector<8xf32> to vector<8x1xf32>
    %94 = vector.broadcast %93 : vector<8x1xf32> to vector<8x8xf32>
    %95 = arith.subf %91, %94 : vector<8x8xf32>
    %96 = math.exp %95 : vector<8x8xf32>
    %cst_50 = arith.constant dense<0.000000e+00> : vector<8xf32>
    %97 = vector.multi_reduction <add>, %96, %cst_50 [1] : vector<8x8xf32> to vector<8xf32>
    %98 = vector.shape_cast %97 : vector<8xf32> to vector<8x1xf32>
    %99 = tpu.reciprocal %98 {approx = true} : vector<8x1xf32> -> vector<8x1xf32>
    %100 = vector.broadcast %99 : vector<8x1xf32> to vector<8x8xf32>
    %101 = arith.mulf %96, %100 : vector<8x8xf32>
    %102 = arith.truncf %101 : vector<8x8xf32> to vector<8x8xbf16>
    %cst_51 = arith.constant dense<0.000000e+00> : vector<8x64xf32>
    %103 = tpu.matmul %102, %87, %cst_51 {dimension_numbers = #tpu.dot_dimension_numbers<[1], [0], [0], [1], [0, 0, 1, 1], [], []>} : vector<8x8xbf16>, vector<8x64xbf16>, vector<8x64xf32> -> vector<8x64xf32>
    %104 = tpu.concatenate %82, %103 in 0 : vector<8x64xf32>, vector<8x64xf32> -> vector<16x64xf32>
    %105 = arith.truncf %104 : vector<16x64xf32> to vector<16x64xbf16>
    %c0_52 = arith.constant 0 : index
    %c0_53 = arith.constant 0 : index
    %c0_54 = arith.constant 0 : index
    %c0_55 = arith.constant 0 : index
    %106 = vector.load %arg11[%c0_52, %c0_53, %c0_54, %c0_55] : memref<2x2x64x128xbf16, #tpu.memory_space<vmem>>, vector<1x1x64x128xbf16>
    %107 = vector.shape_cast %106 : vector<1x1x64x128xbf16> to vector<64x128xbf16>
    %cst_56 = arith.constant dense<0.000000e+00> : vector<16x128xf32>
    %108 = tpu.matmul %105, %107, %cst_56 {dimension_numbers = #tpu.dot_dimension_numbers<[1], [0], [0], [1], [0, 0, 1, 1], [], []>} : vector<16x64xbf16>, vector<64x128xbf16>, vector<16x128xf32> -> vector<16x128xf32>
    %109 = arith.addf %39, %108 : vector<16x128xf32>
    %c0_57 = arith.constant 0 : index
    %c1_58 = arith.constant 1 : index
    %c0_59 = arith.constant 0 : index
    %c0_60 = arith.constant 0 : index
    %110 = vector.load %arg5[%c0_57, %c1_58, %c0_59, %c0_60] : memref<2x2x128x64xbf16, #tpu.memory_space<vmem>>, vector<1x1x128x64xbf16>
    %111 = vector.shape_cast %110 : vector<1x1x128x64xbf16> to vector<128x64xbf16>
    %cst_61 = arith.constant dense<0.000000e+00> : vector<16x64xf32>
    %112 = tpu.matmul %38, %111, %cst_61 {dimension_numbers = #tpu.dot_dimension_numbers<[1], [0], [0], [1], [0, 0, 1, 1], [], []>} : vector<16x128xbf16>, vector<128x64xbf16>, vector<16x64xf32> -> vector<16x64xf32>
    %c0_62 = arith.constant 0 : index
    %c1_63 = arith.constant 1 : index
    %c0_64 = arith.constant 0 : index
    %c0_65 = arith.constant 0 : index
    %113 = vector.load %arg6[%c0_62, %c1_63, %c0_64, %c0_65] : memref<2x2x1x64xf32, #tpu.memory_space<vmem>>, vector<1x1x1x64xf32>
    %114 = vector.shape_cast %113 : vector<1x1x1x64xf32> to vector<1x64xf32>
    %115 = vector.broadcast %114 : vector<1x64xf32> to vector<16x64xf32>
    %116 = arith.addf %112, %115 : vector<16x64xf32>
    %c0_66 = arith.constant 0 : index
    %c1_67 = arith.constant 1 : index
    %c0_68 = arith.constant 0 : index
    %c0_69 = arith.constant 0 : index
    %117 = vector.load %arg7[%c0_66, %c1_67, %c0_68, %c0_69] : memref<2x2x128x64xbf16, #tpu.memory_space<vmem>>, vector<1x1x128x64xbf16>
    %118 = vector.shape_cast %117 : vector<1x1x128x64xbf16> to vector<128x64xbf16>
    %cst_70 = arith.constant dense<0.000000e+00> : vector<16x64xf32>
    %119 = tpu.matmul %38, %118, %cst_70 {dimension_numbers = #tpu.dot_dimension_numbers<[1], [0], [0], [1], [0, 0, 1, 1], [], []>} : vector<16x128xbf16>, vector<128x64xbf16>, vector<16x64xf32> -> vector<16x64xf32>
    %c0_71 = arith.constant 0 : index
    %c1_72 = arith.constant 1 : index
    %c0_73 = arith.constant 0 : index
    %c0_74 = arith.constant 0 : index
    %120 = vector.load %arg8[%c0_71, %c1_72, %c0_73, %c0_74] : memref<2x2x1x64xf32, #tpu.memory_space<vmem>>, vector<1x1x1x64xf32>
    %121 = vector.shape_cast %120 : vector<1x1x1x64xf32> to vector<1x64xf32>
    %122 = vector.broadcast %121 : vector<1x64xf32> to vector<16x64xf32>
    %123 = arith.addf %119, %122 : vector<16x64xf32>
    %c0_75 = arith.constant 0 : index
    %c1_76 = arith.constant 1 : index
    %c0_77 = arith.constant 0 : index
    %c0_78 = arith.constant 0 : index
    %124 = vector.load %arg9[%c0_75, %c1_76, %c0_77, %c0_78] : memref<2x2x128x64xbf16, #tpu.memory_space<vmem>>, vector<1x1x128x64xbf16>
    %125 = vector.shape_cast %124 : vector<1x1x128x64xbf16> to vector<128x64xbf16>
    %cst_79 = arith.constant dense<0.000000e+00> : vector<16x64xf32>
    %126 = tpu.matmul %38, %125, %cst_79 {dimension_numbers = #tpu.dot_dimension_numbers<[1], [0], [0], [1], [0, 0, 1, 1], [], []>} : vector<16x128xbf16>, vector<128x64xbf16>, vector<16x64xf32> -> vector<16x64xf32>
    %c0_80 = arith.constant 0 : index
    %c1_81 = arith.constant 1 : index
    %c0_82 = arith.constant 0 : index
    %c0_83 = arith.constant 0 : index
    %127 = vector.load %arg10[%c0_80, %c1_81, %c0_82, %c0_83] : memref<2x2x1x64xf32, #tpu.memory_space<vmem>>, vector<1x1x1x64xf32>
    %128 = vector.shape_cast %127 : vector<1x1x1x64xf32> to vector<1x64xf32>
    %129 = vector.broadcast %128 : vector<1x64xf32> to vector<16x64xf32>
    %130 = arith.addf %126, %129 : vector<16x64xf32>
    %131 = arith.truncf %130 : vector<16x64xf32> to vector<16x64xbf16>
    %132 = vector.extract_strided_slice %116 {offsets = [0, 0], sizes = [8, 64], strides = [1, 1]} : vector<16x64xf32> to vector<8x64xf32>
    %133 = arith.truncf %132 : vector<8x64xf32> to vector<8x64xbf16>
    %134 = vector.extract_strided_slice %123 {offsets = [0, 0], sizes = [8, 64], strides = [1, 1]} : vector<16x64xf32> to vector<8x64xf32>
    %135 = arith.truncf %134 : vector<8x64xf32> to vector<8x64xbf16>
    %136 = vector.extract_strided_slice %131 {offsets = [0, 0], sizes = [8, 64], strides = [1, 1]} : vector<16x64xbf16> to vector<8x64xbf16>
    "tpu.trace_start"() <{level = 10 : i32, message = "qd,kd->qk"}> : () -> ()
    %cst_84 = arith.constant dense<0.000000e+00> : vector<8x8xf32>
    %137 = tpu.matmul %133, %135, %cst_84 {dimension_numbers = #tpu.dot_dimension_numbers<[1], [1], [0], [0], [0, 0, 1, 0], [], []>} : vector<8x64xbf16>, vector<8x64xbf16>, vector<8x8xf32> -> vector<8x8xf32>
    "tpu.trace_stop"() : () -> ()
    %cst_85 = arith.constant 1.250000e-01 : f32
    %138 = vector.broadcast %cst_85 : f32 to vector<8x8xf32>
    %139 = arith.mulf %137, %138 : vector<8x8xf32>
    %140 = arith.addf %139, %31 : vector<8x8xf32>
    %cst_86 = arith.constant dense<0xFF800000> : vector<8xf32>
    %141 = vector.multi_reduction <maximumf>, %140, %cst_86 [1] : vector<8x8xf32> to vector<8xf32>
    %142 = vector.shape_cast %141 : vector<8xf32> to vector<8x1xf32>
    %143 = vector.broadcast %142 : vector<8x1xf32> to vector<8x8xf32>
    %144 = arith.subf %140, %143 : vector<8x8xf32>
    %145 = math.exp %144 : vector<8x8xf32>
    %cst_87 = arith.constant dense<0.000000e+00> : vector<8xf32>
    %146 = vector.multi_reduction <add>, %145, %cst_87 [1] : vector<8x8xf32> to vector<8xf32>
    %147 = vector.shape_cast %146 : vector<8xf32> to vector<8x1xf32>
    %148 = tpu.reciprocal %147 {approx = true} : vector<8x1xf32> -> vector<8x1xf32>
    %149 = vector.broadcast %148 : vector<8x1xf32> to vector<8x8xf32>
    %150 = arith.mulf %145, %149 : vector<8x8xf32>
    %151 = arith.truncf %150 : vector<8x8xf32> to vector<8x8xbf16>
    %cst_88 = arith.constant dense<0.000000e+00> : vector<8x64xf32>
    %152 = tpu.matmul %151, %136, %cst_88 {dimension_numbers = #tpu.dot_dimension_numbers<[1], [0], [0], [1], [0, 0, 1, 1], [], []>} : vector<8x8xbf16>, vector<8x64xbf16>, vector<8x64xf32> -> vector<8x64xf32>
    %153 = vector.extract_strided_slice %116 {offsets = [8, 0], sizes = [8, 64], strides = [1, 1]} : vector<16x64xf32> to vector<8x64xf32>
    %154 = arith.truncf %153 : vector<8x64xf32> to vector<8x64xbf16>
    %155 = vector.extract_strided_slice %123 {offsets = [8, 0], sizes = [8, 64], strides = [1, 1]} : vector<16x64xf32> to vector<8x64xf32>
    %156 = arith.truncf %155 : vector<8x64xf32> to vector<8x64xbf16>
    %157 = vector.extract_strided_slice %131 {offsets = [8, 0], sizes = [8, 64], strides = [1, 1]} : vector<16x64xbf16> to vector<8x64xbf16>
    "tpu.trace_start"() <{level = 10 : i32, message = "qd,kd->qk"}> : () -> ()
    %cst_89 = arith.constant dense<0.000000e+00> : vector<8x8xf32>
    %158 = tpu.matmul %154, %156, %cst_89 {dimension_numbers = #tpu.dot_dimension_numbers<[1], [1], [0], [0], [0, 0, 1, 0], [], []>} : vector<8x64xbf16>, vector<8x64xbf16>, vector<8x8xf32> -> vector<8x8xf32>
    "tpu.trace_stop"() : () -> ()
    %cst_90 = arith.constant 1.250000e-01 : f32
    %159 = vector.broadcast %cst_90 : f32 to vector<8x8xf32>
    %160 = arith.mulf %158, %159 : vector<8x8xf32>
    %161 = arith.addf %160, %37 : vector<8x8xf32>
    %cst_91 = arith.constant dense<0xFF800000> : vector<8xf32>
    %162 = vector.multi_reduction <maximumf>, %161, %cst_91 [1] : vector<8x8xf32> to vector<8xf32>
    %163 = vector.shape_cast %162 : vector<8xf32> to vector<8x1xf32>
    %164 = vector.broadcast %163 : vector<8x1xf32> to vector<8x8xf32>
    %165 = arith.subf %161, %164 : vector<8x8xf32>
    %166 = math.exp %165 : vector<8x8xf32>
    %cst_92 = arith.constant dense<0.000000e+00> : vector<8xf32>
    %167 = vector.multi_reduction <add>, %166, %cst_92 [1] : vector<8x8xf32> to vector<8xf32>
    %168 = vector.shape_cast %167 : vector<8xf32> to vector<8x1xf32>
    %169 = tpu.reciprocal %168 {approx = true} : vector<8x1xf32> -> vector<8x1xf32>
    %170 = vector.broadcast %169 : vector<8x1xf32> to vector<8x8xf32>
    %171 = arith.mulf %166, %170 : vector<8x8xf32>
    %172 = arith.truncf %171 : vector<8x8xf32> to vector<8x8xbf16>
    %cst_93 = arith.constant dense<0.000000e+00> : vector<8x64xf32>
    %173 = tpu.matmul %172, %157, %cst_93 {dimension_numbers = #tpu.dot_dimension_numbers<[1], [0], [0], [1], [0, 0, 1, 1], [], []>} : vector<8x8xbf16>, vector<8x64xbf16>, vector<8x64xf32> -> vector<8x64xf32>
    %174 = tpu.concatenate %152, %173 in 0 : vector<8x64xf32>, vector<8x64xf32> -> vector<16x64xf32>
    %175 = arith.truncf %174 : vector<16x64xf32> to vector<16x64xbf16>
    %c0_94 = arith.constant 0 : index
    %c1_95 = arith.constant 1 : index
    %c0_96 = arith.constant 0 : index
    %c0_97 = arith.constant 0 : index
    %176 = vector.load %arg11[%c0_94, %c1_95, %c0_96, %c0_97] : memref<2x2x64x128xbf16, #tpu.memory_space<vmem>>, vector<1x1x64x128xbf16>
    %177 = vector.shape_cast %176 : vector<1x1x64x128xbf16> to vector<64x128xbf16>
    %cst_98 = arith.constant dense<0.000000e+00> : vector<16x128xf32>
    %178 = tpu.matmul %175, %177, %cst_98 {dimension_numbers = #tpu.dot_dimension_numbers<[1], [0], [0], [1], [0, 0, 1, 1], [], []>} : vector<16x64xbf16>, vector<64x128xbf16>, vector<16x128xf32> -> vector<16x128xf32>
    %179 = arith.addf %109, %178 : vector<16x128xf32>
    %c0_99 = arith.constant 0 : index
    %c0_100 = arith.constant 0 : index
    %c0_101 = arith.constant 0 : index
    %180 = vector.load %arg12[%c0_99, %c0_100, %c0_101] : memref<2x1x128xf32, #tpu.memory_space<vmem>>, vector<1x1x128xf32>
    %181 = vector.shape_cast %180 : vector<1x1x128xf32> to vector<1x128xf32>
    %182 = vector.broadcast %181 : vector<1x128xf32> to vector<16x128xf32>
    %183 = arith.addf %179, %182 : vector<16x128xf32>
    %184 = arith.addf %183, %24 : vector<16x128xf32>
    %c0_102 = arith.constant 0 : index
    %c0_103 = arith.constant 0 : index
    %c0_104 = arith.constant 0 : index
    %185 = vector.load %arg13[%c0_102, %c0_103, %c0_104] : memref<2x1x128xf32, #tpu.memory_space<vmem>>, vector<1x1x128xf32>
    %186 = vector.shape_cast %185 : vector<1x1x128xf32> to vector<1x128xf32>
    %c0_105 = arith.constant 0 : index
    %c0_106 = arith.constant 0 : index
    %c0_107 = arith.constant 0 : index
    %187 = vector.load %arg14[%c0_105, %c0_106, %c0_107] : memref<2x1x128xf32, #tpu.memory_space<vmem>>, vector<1x1x128xf32>
    %188 = vector.shape_cast %187 : vector<1x1x128xf32> to vector<1x128xf32>
    %cst_108 = arith.constant dense<0.000000e+00> : vector<16xf32>
    %189 = vector.multi_reduction <add>, %184, %cst_108 [1] : vector<16x128xf32> to vector<16xf32>
    %190 = vector.shape_cast %189 : vector<16xf32> to vector<16x1xf32>
    %cst_109 = arith.constant 1.280000e+02 : f32
    %191 = vector.broadcast %cst_109 : f32 to vector<16x1xf32>
    %192 = arith.divf %190, %191 : vector<16x1xf32>
    %193 = vector.broadcast %192 : vector<16x1xf32> to vector<16x128xf32>
    %194 = arith.subf %184, %193 : vector<16x128xf32>
    %195 = arith.mulf %194, %194 : vector<16x128xf32>
    %cst_110 = arith.constant dense<0.000000e+00> : vector<16xf32>
    %196 = vector.multi_reduction <add>, %195, %cst_110 [1] : vector<16x128xf32> to vector<16xf32>
    %197 = vector.shape_cast %196 : vector<16xf32> to vector<16x1xf32>
    %cst_111 = arith.constant 1.280000e+02 : f32
    %198 = vector.broadcast %cst_111 : f32 to vector<16x1xf32>
    %199 = arith.divf %197, %198 : vector<16x1xf32>
    %200 = vector.broadcast %192 : vector<16x1xf32> to vector<16x128xf32>
    %201 = arith.subf %184, %200 : vector<16x128xf32>
    %cst_112 = arith.constant 9.99999996E-13 : f32
    %202 = vector.broadcast %cst_112 : f32 to vector<16x1xf32>
    %203 = arith.addf %199, %202 : vector<16x1xf32>
    %204 = math.rsqrt %203 : vector<16x1xf32>
    %205 = vector.broadcast %204 : vector<16x1xf32> to vector<16x128xf32>
    %206 = arith.mulf %201, %205 : vector<16x128xf32>
    %207 = vector.broadcast %186 : vector<1x128xf32> to vector<16x128xf32>
    %208 = arith.mulf %206, %207 : vector<16x128xf32>
    %209 = vector.broadcast %188 : vector<1x128xf32> to vector<16x128xf32>
    %210 = arith.addf %208, %209 : vector<16x128xf32>
    %211 = arith.truncf %210 : vector<16x128xf32> to vector<16x128xbf16>
    %c0_113 = arith.constant 0 : index
    %c0_114 = arith.constant 0 : index
    %c0_115 = arith.constant 0 : index
    %212 = vector.load %arg15[%c0_113, %c0_114, %c0_115] : memref<2x128x256xbf16, #tpu.memory_space<vmem>>, vector<1x128x256xbf16>
    %213 = vector.shape_cast %212 : vector<1x128x256xbf16> to vector<128x256xbf16>
    %cst_116 = arith.constant dense<0.000000e+00> : vector<16x256xf32>
    %214 = tpu.matmul %211, %213, %cst_116 {dimension_numbers = #tpu.dot_dimension_numbers<[1], [0], [0], [1], [0, 0, 1, 1], [], []>} : vector<16x128xbf16>, vector<128x256xbf16>, vector<16x256xf32> -> vector<16x256xf32>
    %c0_117 = arith.constant 0 : index
    %c0_118 = arith.constant 0 : index
    %c0_119 = arith.constant 0 : index
    %215 = vector.load %arg16[%c0_117, %c0_118, %c0_119] : memref<2x1x256xf32, #tpu.memory_space<vmem>>, vector<1x1x256xf32>
    %216 = vector.shape_cast %215 : vector<1x1x256xf32> to vector<1x256xf32>
    %217 = vector.broadcast %216 : vector<1x256xf32> to vector<16x256xf32>
    %218 = arith.addf %214, %217 : vector<16x256xf32>
    %cst_120 = arith.constant 5.000000e-01 : f32
    %219 = vector.broadcast %cst_120 : f32 to vector<16x256xf32>
    %220 = arith.mulf %219, %218 : vector<16x256xf32>
    %cst_121 = arith.constant 0.707106769 : f32
    %221 = vector.broadcast %cst_121 : f32 to vector<16x256xf32>
    %222 = arith.mulf %218, %221 : vector<16x256xf32>
    %cst_122 = arith.constant 0.000000e+00 : f32
    %223 = vector.broadcast %cst_122 : f32 to vector<16x256xf32>
    %224 = arith.cmpf oge, %222, %223 : vector<16x256xf32>
    %cst_123 = arith.constant 1.000000e+00 : f32
    %cst_124 = arith.constant -1.000000e+00 : f32
    %225 = vector.broadcast %cst_123 : f32 to vector<16x256xf32>
    %226 = vector.broadcast %cst_124 : f32 to vector<16x256xf32>
    %227 = arith.select %224, %225, %226 : vector<16x256xi1>, vector<16x256xf32>
    %228 = math.absf %222 : vector<16x256xf32>
    %cst_125 = arith.constant 0.327591091 : f32
    %229 = vector.broadcast %cst_125 : f32 to vector<16x256xf32>
    %230 = arith.mulf %229, %228 : vector<16x256xf32>
    %cst_126 = arith.constant 1.000000e+00 : f32
    %231 = vector.broadcast %cst_126 : f32 to vector<16x256xf32>
    %232 = arith.addf %231, %230 : vector<16x256xf32>
    %cst_127 = arith.constant 1.000000e+00 : f32
    %233 = vector.broadcast %cst_127 : f32 to vector<16x256xf32>
    %234 = arith.divf %233, %232 : vector<16x256xf32>
    %cst_128 = arith.constant 1.06140542 : f32
    %235 = vector.broadcast %cst_128 : f32 to vector<16x256xf32>
    %236 = arith.mulf %235, %234 : vector<16x256xf32>
    %cst_129 = arith.constant -1.45315206 : f32
    %237 = vector.broadcast %cst_129 : f32 to vector<16x256xf32>
    %238 = arith.addf %236, %237 : vector<16x256xf32>
    %239 = arith.mulf %238, %234 : vector<16x256xf32>
    %cst_130 = arith.constant 1.42141378 : f32
    %240 = vector.broadcast %cst_130 : f32 to vector<16x256xf32>
    %241 = arith.addf %239, %240 : vector<16x256xf32>
    %242 = arith.mulf %241, %234 : vector<16x256xf32>
    %cst_131 = arith.constant -0.284496725 : f32
    %243 = vector.broadcast %cst_131 : f32 to vector<16x256xf32>
    %244 = arith.addf %242, %243 : vector<16x256xf32>
    %245 = arith.mulf %244, %234 : vector<16x256xf32>
    %cst_132 = arith.constant 0.254829586 : f32
    %246 = vector.broadcast %cst_132 : f32 to vector<16x256xf32>
    %247 = arith.addf %245, %246 : vector<16x256xf32>
    %248 = arith.mulf %247, %234 : vector<16x256xf32>
    %cst_133 = arith.constant 0.000000e+00 : f32
    %249 = vector.broadcast %cst_133 : f32 to vector<16x256xf32>
    %250 = arith.subf %249, %228 : vector<16x256xf32>
    %251 = arith.mulf %250, %228 : vector<16x256xf32>
    %252 = math.exp %251 : vector<16x256xf32>
    %253 = arith.mulf %248, %252 : vector<16x256xf32>
    %cst_134 = arith.constant 1.000000e+00 : f32
    %254 = vector.broadcast %cst_134 : f32 to vector<16x256xf32>
    %255 = arith.subf %254, %253 : vector<16x256xf32>
    %256 = arith.mulf %227, %255 : vector<16x256xf32>
    %cst_135 = arith.constant 1.000000e+00 : f32
    %257 = vector.broadcast %cst_135 : f32 to vector<16x256xf32>
    %258 = arith.addf %257, %256 : vector<16x256xf32>
    %259 = arith.mulf %220, %258 : vector<16x256xf32>
    %260 = arith.truncf %259 : vector<16x256xf32> to vector<16x256xbf16>
    %c0_136 = arith.constant 0 : index
    %c0_137 = arith.constant 0 : index
    %c0_138 = arith.constant 0 : index
    %261 = vector.load %arg17[%c0_136, %c0_137, %c0_138] : memref<2x256x128xbf16, #tpu.memory_space<vmem>>, vector<1x256x128xbf16>
    %262 = vector.shape_cast %261 : vector<1x256x128xbf16> to vector<256x128xbf16>
    %cst_139 = arith.constant dense<0.000000e+00> : vector<16x128xf32>
    %263 = tpu.matmul %260, %262, %cst_139 {dimension_numbers = #tpu.dot_dimension_numbers<[1], [0], [0], [1], [0, 0, 1, 1], [], []>} : vector<16x256xbf16>, vector<256x128xbf16>, vector<16x128xf32> -> vector<16x128xf32>
    %c0_140 = arith.constant 0 : index
    %c0_141 = arith.constant 0 : index
    %c0_142 = arith.constant 0 : index
    %264 = vector.load %arg18[%c0_140, %c0_141, %c0_142] : memref<2x1x128xf32, #tpu.memory_space<vmem>>, vector<1x1x128xf32>
    %265 = vector.shape_cast %264 : vector<1x1x128xf32> to vector<1x128xf32>
    %266 = vector.broadcast %265 : vector<1x128xf32> to vector<16x128xf32>
    %267 = arith.addf %263, %266 : vector<16x128xf32>
    %268 = arith.addf %267, %210 : vector<16x128xf32>
    %c0_143 = arith.constant 0 : index
    %c0_144 = arith.constant 0 : index
    %c0_145 = arith.constant 0 : index
    %269 = vector.load %arg19[%c0_143, %c0_144, %c0_145] : memref<2x1x128xf32, #tpu.memory_space<vmem>>, vector<1x1x128xf32>
    %270 = vector.shape_cast %269 : vector<1x1x128xf32> to vector<1x128xf32>
    %c0_146 = arith.constant 0 : index
    %c0_147 = arith.constant 0 : index
    %c0_148 = arith.constant 0 : index
    %271 = vector.load %arg20[%c0_146, %c0_147, %c0_148] : memref<2x1x128xf32, #tpu.memory_space<vmem>>, vector<1x1x128xf32>
    %272 = vector.shape_cast %271 : vector<1x1x128xf32> to vector<1x128xf32>
    %cst_149 = arith.constant dense<0.000000e+00> : vector<16xf32>
    %273 = vector.multi_reduction <add>, %268, %cst_149 [1] : vector<16x128xf32> to vector<16xf32>
    %274 = vector.shape_cast %273 : vector<16xf32> to vector<16x1xf32>
    %cst_150 = arith.constant 1.280000e+02 : f32
    %275 = vector.broadcast %cst_150 : f32 to vector<16x1xf32>
    %276 = arith.divf %274, %275 : vector<16x1xf32>
    %277 = vector.broadcast %276 : vector<16x1xf32> to vector<16x128xf32>
    %278 = arith.subf %268, %277 : vector<16x128xf32>
    %279 = arith.mulf %278, %278 : vector<16x128xf32>
    %cst_151 = arith.constant dense<0.000000e+00> : vector<16xf32>
    %280 = vector.multi_reduction <add>, %279, %cst_151 [1] : vector<16x128xf32> to vector<16xf32>
    %281 = vector.shape_cast %280 : vector<16xf32> to vector<16x1xf32>
    %cst_152 = arith.constant 1.280000e+02 : f32
    %282 = vector.broadcast %cst_152 : f32 to vector<16x1xf32>
    %283 = arith.divf %281, %282 : vector<16x1xf32>
    %284 = vector.broadcast %276 : vector<16x1xf32> to vector<16x128xf32>
    %285 = arith.subf %268, %284 : vector<16x128xf32>
    %cst_153 = arith.constant 9.99999996E-13 : f32
    %286 = vector.broadcast %cst_153 : f32 to vector<16x1xf32>
    %287 = arith.addf %283, %286 : vector<16x1xf32>
    %288 = math.rsqrt %287 : vector<16x1xf32>
    %289 = vector.broadcast %288 : vector<16x1xf32> to vector<16x128xf32>
    %290 = arith.mulf %285, %289 : vector<16x128xf32>
    %291 = vector.broadcast %270 : vector<1x128xf32> to vector<16x128xf32>
    %292 = arith.mulf %290, %291 : vector<16x128xf32>
    %293 = vector.broadcast %272 : vector<1x128xf32> to vector<16x128xf32>
    %294 = arith.addf %292, %293 : vector<16x128xf32>
    %295 = arith.truncf %294 : vector<16x128xf32> to vector<16x128xbf16>
    %cst_154 = arith.constant 0.000000e+00 : f32
    %296 = vector.broadcast %cst_154 : f32 to vector<16x128xf32>
    %c1_155 = arith.constant 1 : index
    %c0_156 = arith.constant 0 : index
    %c0_157 = arith.constant 0 : index
    %c0_158 = arith.constant 0 : index
    %297 = vector.load %arg5[%c1_155, %c0_156, %c0_157, %c0_158] : memref<2x2x128x64xbf16, #tpu.memory_space<vmem>>, vector<1x1x128x64xbf16>
    %298 = vector.shape_cast %297 : vector<1x1x128x64xbf16> to vector<128x64xbf16>
    %cst_159 = arith.constant dense<0.000000e+00> : vector<16x64xf32>
    %299 = tpu.matmul %295, %298, %cst_159 {dimension_numbers = #tpu.dot_dimension_numbers<[1], [0], [0], [1], [0, 0, 1, 1], [], []>} : vector<16x128xbf16>, vector<128x64xbf16>, vector<16x64xf32> -> vector<16x64xf32>
    %c1_160 = arith.constant 1 : index
    %c0_161 = arith.constant 0 : index
    %c0_162 = arith.constant 0 : index
    %c0_163 = arith.constant 0 : index
    %300 = vector.load %arg6[%c1_160, %c0_161, %c0_162, %c0_163] : memref<2x2x1x64xf32, #tpu.memory_space<vmem>>, vector<1x1x1x64xf32>
    %301 = vector.shape_cast %300 : vector<1x1x1x64xf32> to vector<1x64xf32>
    %302 = vector.broadcast %301 : vector<1x64xf32> to vector<16x64xf32>
    %303 = arith.addf %299, %302 : vector<16x64xf32>
    %c1_164 = arith.constant 1 : index
    %c0_165 = arith.constant 0 : index
    %c0_166 = arith.constant 0 : index
    %c0_167 = arith.constant 0 : index
    %304 = vector.load %arg7[%c1_164, %c0_165, %c0_166, %c0_167] : memref<2x2x128x64xbf16, #tpu.memory_space<vmem>>, vector<1x1x128x64xbf16>
    %305 = vector.shape_cast %304 : vector<1x1x128x64xbf16> to vector<128x64xbf16>
    %cst_168 = arith.constant dense<0.000000e+00> : vector<16x64xf32>
    %306 = tpu.matmul %295, %305, %cst_168 {dimension_numbers = #tpu.dot_dimension_numbers<[1], [0], [0], [1], [0, 0, 1, 1], [], []>} : vector<16x128xbf16>, vector<128x64xbf16>, vector<16x64xf32> -> vector<16x64xf32>
    %c1_169 = arith.constant 1 : index
    %c0_170 = arith.constant 0 : index
    %c0_171 = arith.constant 0 : index
    %c0_172 = arith.constant 0 : index
    %307 = vector.load %arg8[%c1_169, %c0_170, %c0_171, %c0_172] : memref<2x2x1x64xf32, #tpu.memory_space<vmem>>, vector<1x1x1x64xf32>
    %308 = vector.shape_cast %307 : vector<1x1x1x64xf32> to vector<1x64xf32>
    %309 = vector.broadcast %308 : vector<1x64xf32> to vector<16x64xf32>
    %310 = arith.addf %306, %309 : vector<16x64xf32>
    %c1_173 = arith.constant 1 : index
    %c0_174 = arith.constant 0 : index
    %c0_175 = arith.constant 0 : index
    %c0_176 = arith.constant 0 : index
    %311 = vector.load %arg9[%c1_173, %c0_174, %c0_175, %c0_176] : memref<2x2x128x64xbf16, #tpu.memory_space<vmem>>, vector<1x1x128x64xbf16>
    %312 = vector.shape_cast %311 : vector<1x1x128x64xbf16> to vector<128x64xbf16>
    %cst_177 = arith.constant dense<0.000000e+00> : vector<16x64xf32>
    %313 = tpu.matmul %295, %312, %cst_177 {dimension_numbers = #tpu.dot_dimension_numbers<[1], [0], [0], [1], [0, 0, 1, 1], [], []>} : vector<16x128xbf16>, vector<128x64xbf16>, vector<16x64xf32> -> vector<16x64xf32>
    %c1_178 = arith.constant 1 : index
    %c0_179 = arith.constant 0 : index
    %c0_180 = arith.constant 0 : index
    %c0_181 = arith.constant 0 : index
    %314 = vector.load %arg10[%c1_178, %c0_179, %c0_180, %c0_181] : memref<2x2x1x64xf32, #tpu.memory_space<vmem>>, vector<1x1x1x64xf32>
    %315 = vector.shape_cast %314 : vector<1x1x1x64xf32> to vector<1x64xf32>
    %316 = vector.broadcast %315 : vector<1x64xf32> to vector<16x64xf32>
    %317 = arith.addf %313, %316 : vector<16x64xf32>
    %318 = arith.truncf %317 : vector<16x64xf32> to vector<16x64xbf16>
    %319 = vector.extract_strided_slice %303 {offsets = [0, 0], sizes = [8, 64], strides = [1, 1]} : vector<16x64xf32> to vector<8x64xf32>
    %320 = arith.truncf %319 : vector<8x64xf32> to vector<8x64xbf16>
    %321 = vector.extract_strided_slice %310 {offsets = [0, 0], sizes = [8, 64], strides = [1, 1]} : vector<16x64xf32> to vector<8x64xf32>
    %322 = arith.truncf %321 : vector<8x64xf32> to vector<8x64xbf16>
    %323 = vector.extract_strided_slice %318 {offsets = [0, 0], sizes = [8, 64], strides = [1, 1]} : vector<16x64xbf16> to vector<8x64xbf16>
    "tpu.trace_start"() <{level = 10 : i32, message = "qd,kd->qk"}> : () -> ()
    %cst_182 = arith.constant dense<0.000000e+00> : vector<8x8xf32>
    %324 = tpu.matmul %320, %322, %cst_182 {dimension_numbers = #tpu.dot_dimension_numbers<[1], [1], [0], [0], [0, 0, 1, 0], [], []>} : vector<8x64xbf16>, vector<8x64xbf16>, vector<8x8xf32> -> vector<8x8xf32>
    "tpu.trace_stop"() : () -> ()
    %cst_183 = arith.constant 1.250000e-01 : f32
    %325 = vector.broadcast %cst_183 : f32 to vector<8x8xf32>
    %326 = arith.mulf %324, %325 : vector<8x8xf32>
    %327 = arith.addf %326, %31 : vector<8x8xf32>
    %cst_184 = arith.constant dense<0xFF800000> : vector<8xf32>
    %328 = vector.multi_reduction <maximumf>, %327, %cst_184 [1] : vector<8x8xf32> to vector<8xf32>
    %329 = vector.shape_cast %328 : vector<8xf32> to vector<8x1xf32>
    %330 = vector.broadcast %329 : vector<8x1xf32> to vector<8x8xf32>
    %331 = arith.subf %327, %330 : vector<8x8xf32>
    %332 = math.exp %331 : vector<8x8xf32>
    %cst_185 = arith.constant dense<0.000000e+00> : vector<8xf32>
    %333 = vector.multi_reduction <add>, %332, %cst_185 [1] : vector<8x8xf32> to vector<8xf32>
    %334 = vector.shape_cast %333 : vector<8xf32> to vector<8x1xf32>
    %335 = tpu.reciprocal %334 {approx = true} : vector<8x1xf32> -> vector<8x1xf32>
    %336 = vector.broadcast %335 : vector<8x1xf32> to vector<8x8xf32>
    %337 = arith.mulf %332, %336 : vector<8x8xf32>
    %338 = arith.truncf %337 : vector<8x8xf32> to vector<8x8xbf16>
    %cst_186 = arith.constant dense<0.000000e+00> : vector<8x64xf32>
    %339 = tpu.matmul %338, %323, %cst_186 {dimension_numbers = #tpu.dot_dimension_numbers<[1], [0], [0], [1], [0, 0, 1, 1], [], []>} : vector<8x8xbf16>, vector<8x64xbf16>, vector<8x64xf32> -> vector<8x64xf32>
    %340 = vector.extract_strided_slice %303 {offsets = [8, 0], sizes = [8, 64], strides = [1, 1]} : vector<16x64xf32> to vector<8x64xf32>
    %341 = arith.truncf %340 : vector<8x64xf32> to vector<8x64xbf16>
    %342 = vector.extract_strided_slice %310 {offsets = [8, 0], sizes = [8, 64], strides = [1, 1]} : vector<16x64xf32> to vector<8x64xf32>
    %343 = arith.truncf %342 : vector<8x64xf32> to vector<8x64xbf16>
    %344 = vector.extract_strided_slice %318 {offsets = [8, 0], sizes = [8, 64], strides = [1, 1]} : vector<16x64xbf16> to vector<8x64xbf16>
    "tpu.trace_start"() <{level = 10 : i32, message = "qd,kd->qk"}> : () -> ()
    %cst_187 = arith.constant dense<0.000000e+00> : vector<8x8xf32>
    %345 = tpu.matmul %341, %343, %cst_187 {dimension_numbers = #tpu.dot_dimension_numbers<[1], [1], [0], [0], [0, 0, 1, 0], [], []>} : vector<8x64xbf16>, vector<8x64xbf16>, vector<8x8xf32> -> vector<8x8xf32>
    "tpu.trace_stop"() : () -> ()
    %cst_188 = arith.constant 1.250000e-01 : f32
    %346 = vector.broadcast %cst_188 : f32 to vector<8x8xf32>
    %347 = arith.mulf %345, %346 : vector<8x8xf32>
    %348 = arith.addf %347, %37 : vector<8x8xf32>
    %cst_189 = arith.constant dense<0xFF800000> : vector<8xf32>
    %349 = vector.multi_reduction <maximumf>, %348, %cst_189 [1] : vector<8x8xf32> to vector<8xf32>
    %350 = vector.shape_cast %349 : vector<8xf32> to vector<8x1xf32>
    %351 = vector.broadcast %350 : vector<8x1xf32> to vector<8x8xf32>
    %352 = arith.subf %348, %351 : vector<8x8xf32>
    %353 = math.exp %352 : vector<8x8xf32>
    %cst_190 = arith.constant dense<0.000000e+00> : vector<8xf32>
    %354 = vector.multi_reduction <add>, %353, %cst_190 [1] : vector<8x8xf32> to vector<8xf32>
    %355 = vector.shape_cast %354 : vector<8xf32> to vector<8x1xf32>
    %356 = tpu.reciprocal %355 {approx = true} : vector<8x1xf32> -> vector<8x1xf32>
    %357 = vector.broadcast %356 : vector<8x1xf32> to vector<8x8xf32>
    %358 = arith.mulf %353, %357 : vector<8x8xf32>
    %359 = arith.truncf %358 : vector<8x8xf32> to vector<8x8xbf16>
    %cst_191 = arith.constant dense<0.000000e+00> : vector<8x64xf32>
    %360 = tpu.matmul %359, %344, %cst_191 {dimension_numbers = #tpu.dot_dimension_numbers<[1], [0], [0], [1], [0, 0, 1, 1], [], []>} : vector<8x8xbf16>, vector<8x64xbf16>, vector<8x64xf32> -> vector<8x64xf32>
    %361 = tpu.concatenate %339, %360 in 0 : vector<8x64xf32>, vector<8x64xf32> -> vector<16x64xf32>
    %362 = arith.truncf %361 : vector<16x64xf32> to vector<16x64xbf16>
    %c1_192 = arith.constant 1 : index
    %c0_193 = arith.constant 0 : index
    %c0_194 = arith.constant 0 : index
    %c0_195 = arith.constant 0 : index
    %363 = vector.load %arg11[%c1_192, %c0_193, %c0_194, %c0_195] : memref<2x2x64x128xbf16, #tpu.memory_space<vmem>>, vector<1x1x64x128xbf16>
    %364 = vector.shape_cast %363 : vector<1x1x64x128xbf16> to vector<64x128xbf16>
    %cst_196 = arith.constant dense<0.000000e+00> : vector<16x128xf32>
    %365 = tpu.matmul %362, %364, %cst_196 {dimension_numbers = #tpu.dot_dimension_numbers<[1], [0], [0], [1], [0, 0, 1, 1], [], []>} : vector<16x64xbf16>, vector<64x128xbf16>, vector<16x128xf32> -> vector<16x128xf32>
    %366 = arith.addf %296, %365 : vector<16x128xf32>
    %c1_197 = arith.constant 1 : index
    %c1_198 = arith.constant 1 : index
    %c0_199 = arith.constant 0 : index
    %c0_200 = arith.constant 0 : index
    %367 = vector.load %arg5[%c1_197, %c1_198, %c0_199, %c0_200] : memref<2x2x128x64xbf16, #tpu.memory_space<vmem>>, vector<1x1x128x64xbf16>
    %368 = vector.shape_cast %367 : vector<1x1x128x64xbf16> to vector<128x64xbf16>
    %cst_201 = arith.constant dense<0.000000e+00> : vector<16x64xf32>
    %369 = tpu.matmul %295, %368, %cst_201 {dimension_numbers = #tpu.dot_dimension_numbers<[1], [0], [0], [1], [0, 0, 1, 1], [], []>} : vector<16x128xbf16>, vector<128x64xbf16>, vector<16x64xf32> -> vector<16x64xf32>
    %c1_202 = arith.constant 1 : index
    %c1_203 = arith.constant 1 : index
    %c0_204 = arith.constant 0 : index
    %c0_205 = arith.constant 0 : index
    %370 = vector.load %arg6[%c1_202, %c1_203, %c0_204, %c0_205] : memref<2x2x1x64xf32, #tpu.memory_space<vmem>>, vector<1x1x1x64xf32>
    %371 = vector.shape_cast %370 : vector<1x1x1x64xf32> to vector<1x64xf32>
    %372 = vector.broadcast %371 : vector<1x64xf32> to vector<16x64xf32>
    %373 = arith.addf %369, %372 : vector<16x64xf32>
    %c1_206 = arith.constant 1 : index
    %c1_207 = arith.constant 1 : index
    %c0_208 = arith.constant 0 : index
    %c0_209 = arith.constant 0 : index
    %374 = vector.load %arg7[%c1_206, %c1_207, %c0_208, %c0_209] : memref<2x2x128x64xbf16, #tpu.memory_space<vmem>>, vector<1x1x128x64xbf16>
    %375 = vector.shape_cast %374 : vector<1x1x128x64xbf16> to vector<128x64xbf16>
    %cst_210 = arith.constant dense<0.000000e+00> : vector<16x64xf32>
    %376 = tpu.matmul %295, %375, %cst_210 {dimension_numbers = #tpu.dot_dimension_numbers<[1], [0], [0], [1], [0, 0, 1, 1], [], []>} : vector<16x128xbf16>, vector<128x64xbf16>, vector<16x64xf32> -> vector<16x64xf32>
    %c1_211 = arith.constant 1 : index
    %c1_212 = arith.constant 1 : index
    %c0_213 = arith.constant 0 : index
    %c0_214 = arith.constant 0 : index
    %377 = vector.load %arg8[%c1_211, %c1_212, %c0_213, %c0_214] : memref<2x2x1x64xf32, #tpu.memory_space<vmem>>, vector<1x1x1x64xf32>
    %378 = vector.shape_cast %377 : vector<1x1x1x64xf32> to vector<1x64xf32>
    %379 = vector.broadcast %378 : vector<1x64xf32> to vector<16x64xf32>
    %380 = arith.addf %376, %379 : vector<16x64xf32>
    %c1_215 = arith.constant 1 : index
    %c1_216 = arith.constant 1 : index
    %c0_217 = arith.constant 0 : index
    %c0_218 = arith.constant 0 : index
    %381 = vector.load %arg9[%c1_215, %c1_216, %c0_217, %c0_218] : memref<2x2x128x64xbf16, #tpu.memory_space<vmem>>, vector<1x1x128x64xbf16>
    %382 = vector.shape_cast %381 : vector<1x1x128x64xbf16> to vector<128x64xbf16>
    %cst_219 = arith.constant dense<0.000000e+00> : vector<16x64xf32>
    %383 = tpu.matmul %295, %382, %cst_219 {dimension_numbers = #tpu.dot_dimension_numbers<[1], [0], [0], [1], [0, 0, 1, 1], [], []>} : vector<16x128xbf16>, vector<128x64xbf16>, vector<16x64xf32> -> vector<16x64xf32>
    %c1_220 = arith.constant 1 : index
    %c1_221 = arith.constant 1 : index
    %c0_222 = arith.constant 0 : index
    %c0_223 = arith.constant 0 : index
    %384 = vector.load %arg10[%c1_220, %c1_221, %c0_222, %c0_223] : memref<2x2x1x64xf32, #tpu.memory_space<vmem>>, vector<1x1x1x64xf32>
    %385 = vector.shape_cast %384 : vector<1x1x1x64xf32> to vector<1x64xf32>
    %386 = vector.broadcast %385 : vector<1x64xf32> to vector<16x64xf32>
    %387 = arith.addf %383, %386 : vector<16x64xf32>
    %388 = arith.truncf %387 : vector<16x64xf32> to vector<16x64xbf16>
    %389 = vector.extract_strided_slice %373 {offsets = [0, 0], sizes = [8, 64], strides = [1, 1]} : vector<16x64xf32> to vector<8x64xf32>
    %390 = arith.truncf %389 : vector<8x64xf32> to vector<8x64xbf16>
    %391 = vector.extract_strided_slice %380 {offsets = [0, 0], sizes = [8, 64], strides = [1, 1]} : vector<16x64xf32> to vector<8x64xf32>
    %392 = arith.truncf %391 : vector<8x64xf32> to vector<8x64xbf16>
    %393 = vector.extract_strided_slice %388 {offsets = [0, 0], sizes = [8, 64], strides = [1, 1]} : vector<16x64xbf16> to vector<8x64xbf16>
    "tpu.trace_start"() <{level = 10 : i32, message = "qd,kd->qk"}> : () -> ()
    %cst_224 = arith.constant dense<0.000000e+00> : vector<8x8xf32>
    %394 = tpu.matmul %390, %392, %cst_224 {dimension_numbers = #tpu.dot_dimension_numbers<[1], [1], [0], [0], [0, 0, 1, 0], [], []>} : vector<8x64xbf16>, vector<8x64xbf16>, vector<8x8xf32> -> vector<8x8xf32>
    "tpu.trace_stop"() : () -> ()
    %cst_225 = arith.constant 1.250000e-01 : f32
    %395 = vector.broadcast %cst_225 : f32 to vector<8x8xf32>
    %396 = arith.mulf %394, %395 : vector<8x8xf32>
    %397 = arith.addf %396, %31 : vector<8x8xf32>
    %cst_226 = arith.constant dense<0xFF800000> : vector<8xf32>
    %398 = vector.multi_reduction <maximumf>, %397, %cst_226 [1] : vector<8x8xf32> to vector<8xf32>
    %399 = vector.shape_cast %398 : vector<8xf32> to vector<8x1xf32>
    %400 = vector.broadcast %399 : vector<8x1xf32> to vector<8x8xf32>
    %401 = arith.subf %397, %400 : vector<8x8xf32>
    %402 = math.exp %401 : vector<8x8xf32>
    %cst_227 = arith.constant dense<0.000000e+00> : vector<8xf32>
    %403 = vector.multi_reduction <add>, %402, %cst_227 [1] : vector<8x8xf32> to vector<8xf32>
    %404 = vector.shape_cast %403 : vector<8xf32> to vector<8x1xf32>
    %405 = tpu.reciprocal %404 {approx = true} : vector<8x1xf32> -> vector<8x1xf32>
    %406 = vector.broadcast %405 : vector<8x1xf32> to vector<8x8xf32>
    %407 = arith.mulf %402, %406 : vector<8x8xf32>
    %408 = arith.truncf %407 : vector<8x8xf32> to vector<8x8xbf16>
    %cst_228 = arith.constant dense<0.000000e+00> : vector<8x64xf32>
    %409 = tpu.matmul %408, %393, %cst_228 {dimension_numbers = #tpu.dot_dimension_numbers<[1], [0], [0], [1], [0, 0, 1, 1], [], []>} : vector<8x8xbf16>, vector<8x64xbf16>, vector<8x64xf32> -> vector<8x64xf32>
    %410 = vector.extract_strided_slice %373 {offsets = [8, 0], sizes = [8, 64], strides = [1, 1]} : vector<16x64xf32> to vector<8x64xf32>
    %411 = arith.truncf %410 : vector<8x64xf32> to vector<8x64xbf16>
    %412 = vector.extract_strided_slice %380 {offsets = [8, 0], sizes = [8, 64], strides = [1, 1]} : vector<16x64xf32> to vector<8x64xf32>
    %413 = arith.truncf %412 : vector<8x64xf32> to vector<8x64xbf16>
    %414 = vector.extract_strided_slice %388 {offsets = [8, 0], sizes = [8, 64], strides = [1, 1]} : vector<16x64xbf16> to vector<8x64xbf16>
    "tpu.trace_start"() <{level = 10 : i32, message = "qd,kd->qk"}> : () -> ()
    %cst_229 = arith.constant dense<0.000000e+00> : vector<8x8xf32>
    %415 = tpu.matmul %411, %413, %cst_229 {dimension_numbers = #tpu.dot_dimension_numbers<[1], [1], [0], [0], [0, 0, 1, 0], [], []>} : vector<8x64xbf16>, vector<8x64xbf16>, vector<8x8xf32> -> vector<8x8xf32>
    "tpu.trace_stop"() : () -> ()
    %cst_230 = arith.constant 1.250000e-01 : f32
    %416 = vector.broadcast %cst_230 : f32 to vector<8x8xf32>
    %417 = arith.mulf %415, %416 : vector<8x8xf32>
    %418 = arith.addf %417, %37 : vector<8x8xf32>
    %cst_231 = arith.constant dense<0xFF800000> : vector<8xf32>
    %419 = vector.multi_reduction <maximumf>, %418, %cst_231 [1] : vector<8x8xf32> to vector<8xf32>
    %420 = vector.shape_cast %419 : vector<8xf32> to vector<8x1xf32>
    %421 = vector.broadcast %420 : vector<8x1xf32> to vector<8x8xf32>
    %422 = arith.subf %418, %421 : vector<8x8xf32>
    %423 = math.exp %422 : vector<8x8xf32>
    %cst_232 = arith.constant dense<0.000000e+00> : vector<8xf32>
    %424 = vector.multi_reduction <add>, %423, %cst_232 [1] : vector<8x8xf32> to vector<8xf32>
    %425 = vector.shape_cast %424 : vector<8xf32> to vector<8x1xf32>
    %426 = tpu.reciprocal %425 {approx = true} : vector<8x1xf32> -> vector<8x1xf32>
    %427 = vector.broadcast %426 : vector<8x1xf32> to vector<8x8xf32>
    %428 = arith.mulf %423, %427 : vector<8x8xf32>
    %429 = arith.truncf %428 : vector<8x8xf32> to vector<8x8xbf16>
    %cst_233 = arith.constant dense<0.000000e+00> : vector<8x64xf32>
    %430 = tpu.matmul %429, %414, %cst_233 {dimension_numbers = #tpu.dot_dimension_numbers<[1], [0], [0], [1], [0, 0, 1, 1], [], []>} : vector<8x8xbf16>, vector<8x64xbf16>, vector<8x64xf32> -> vector<8x64xf32>
    %431 = tpu.concatenate %409, %430 in 0 : vector<8x64xf32>, vector<8x64xf32> -> vector<16x64xf32>
    %432 = arith.truncf %431 : vector<16x64xf32> to vector<16x64xbf16>
    %c1_234 = arith.constant 1 : index
    %c1_235 = arith.constant 1 : index
    %c0_236 = arith.constant 0 : index
    %c0_237 = arith.constant 0 : index
    %433 = vector.load %arg11[%c1_234, %c1_235, %c0_236, %c0_237] : memref<2x2x64x128xbf16, #tpu.memory_space<vmem>>, vector<1x1x64x128xbf16>
    %434 = vector.shape_cast %433 : vector<1x1x64x128xbf16> to vector<64x128xbf16>
    %cst_238 = arith.constant dense<0.000000e+00> : vector<16x128xf32>
    %435 = tpu.matmul %432, %434, %cst_238 {dimension_numbers = #tpu.dot_dimension_numbers<[1], [0], [0], [1], [0, 0, 1, 1], [], []>} : vector<16x64xbf16>, vector<64x128xbf16>, vector<16x128xf32> -> vector<16x128xf32>
    %436 = arith.addf %366, %435 : vector<16x128xf32>
    %c1_239 = arith.constant 1 : index
    %c0_240 = arith.constant 0 : index
    %c0_241 = arith.constant 0 : index
    %437 = vector.load %arg12[%c1_239, %c0_240, %c0_241] : memref<2x1x128xf32, #tpu.memory_space<vmem>>, vector<1x1x128xf32>
    %438 = vector.shape_cast %437 : vector<1x1x128xf32> to vector<1x128xf32>
    %439 = vector.broadcast %438 : vector<1x128xf32> to vector<16x128xf32>
    %440 = arith.addf %436, %439 : vector<16x128xf32>
    %441 = arith.addf %440, %294 : vector<16x128xf32>
    %c1_242 = arith.constant 1 : index
    %c0_243 = arith.constant 0 : index
    %c0_244 = arith.constant 0 : index
    %442 = vector.load %arg13[%c1_242, %c0_243, %c0_244] : memref<2x1x128xf32, #tpu.memory_space<vmem>>, vector<1x1x128xf32>
    %443 = vector.shape_cast %442 : vector<1x1x128xf32> to vector<1x128xf32>
    %c1_245 = arith.constant 1 : index
    %c0_246 = arith.constant 0 : index
    %c0_247 = arith.constant 0 : index
    %444 = vector.load %arg14[%c1_245, %c0_246, %c0_247] : memref<2x1x128xf32, #tpu.memory_space<vmem>>, vector<1x1x128xf32>
    %445 = vector.shape_cast %444 : vector<1x1x128xf32> to vector<1x128xf32>
    %cst_248 = arith.constant dense<0.000000e+00> : vector<16xf32>
    %446 = vector.multi_reduction <add>, %441, %cst_248 [1] : vector<16x128xf32> to vector<16xf32>
    %447 = vector.shape_cast %446 : vector<16xf32> to vector<16x1xf32>
    %cst_249 = arith.constant 1.280000e+02 : f32
    %448 = vector.broadcast %cst_249 : f32 to vector<16x1xf32>
    %449 = arith.divf %447, %448 : vector<16x1xf32>
    %450 = vector.broadcast %449 : vector<16x1xf32> to vector<16x128xf32>
    %451 = arith.subf %441, %450 : vector<16x128xf32>
    %452 = arith.mulf %451, %451 : vector<16x128xf32>
    %cst_250 = arith.constant dense<0.000000e+00> : vector<16xf32>
    %453 = vector.multi_reduction <add>, %452, %cst_250 [1] : vector<16x128xf32> to vector<16xf32>
    %454 = vector.shape_cast %453 : vector<16xf32> to vector<16x1xf32>
    %cst_251 = arith.constant 1.280000e+02 : f32
    %455 = vector.broadcast %cst_251 : f32 to vector<16x1xf32>
    %456 = arith.divf %454, %455 : vector<16x1xf32>
    %457 = vector.broadcast %449 : vector<16x1xf32> to vector<16x128xf32>
    %458 = arith.subf %441, %457 : vector<16x128xf32>
    %cst_252 = arith.constant 9.99999996E-13 : f32
    %459 = vector.broadcast %cst_252 : f32 to vector<16x1xf32>
    %460 = arith.addf %456, %459 : vector<16x1xf32>
    %461 = math.rsqrt %460 : vector<16x1xf32>
    %462 = vector.broadcast %461 : vector<16x1xf32> to vector<16x128xf32>
    %463 = arith.mulf %458, %462 : vector<16x128xf32>
    %464 = vector.broadcast %443 : vector<1x128xf32> to vector<16x128xf32>
    %465 = arith.mulf %463, %464 : vector<16x128xf32>
    %466 = vector.broadcast %445 : vector<1x128xf32> to vector<16x128xf32>
    %467 = arith.addf %465, %466 : vector<16x128xf32>
    %468 = arith.truncf %467 : vector<16x128xf32> to vector<16x128xbf16>
    %c1_253 = arith.constant 1 : index
    %c0_254 = arith.constant 0 : index
    %c0_255 = arith.constant 0 : index
    %469 = vector.load %arg15[%c1_253, %c0_254, %c0_255] : memref<2x128x256xbf16, #tpu.memory_space<vmem>>, vector<1x128x256xbf16>
    %470 = vector.shape_cast %469 : vector<1x128x256xbf16> to vector<128x256xbf16>
    %cst_256 = arith.constant dense<0.000000e+00> : vector<16x256xf32>
    %471 = tpu.matmul %468, %470, %cst_256 {dimension_numbers = #tpu.dot_dimension_numbers<[1], [0], [0], [1], [0, 0, 1, 1], [], []>} : vector<16x128xbf16>, vector<128x256xbf16>, vector<16x256xf32> -> vector<16x256xf32>
    %c1_257 = arith.constant 1 : index
    %c0_258 = arith.constant 0 : index
    %c0_259 = arith.constant 0 : index
    %472 = vector.load %arg16[%c1_257, %c0_258, %c0_259] : memref<2x1x256xf32, #tpu.memory_space<vmem>>, vector<1x1x256xf32>
    %473 = vector.shape_cast %472 : vector<1x1x256xf32> to vector<1x256xf32>
    %474 = vector.broadcast %473 : vector<1x256xf32> to vector<16x256xf32>
    %475 = arith.addf %471, %474 : vector<16x256xf32>
    %cst_260 = arith.constant 5.000000e-01 : f32
    %476 = vector.broadcast %cst_260 : f32 to vector<16x256xf32>
    %477 = arith.mulf %476, %475 : vector<16x256xf32>
    %cst_261 = arith.constant 0.707106769 : f32
    %478 = vector.broadcast %cst_261 : f32 to vector<16x256xf32>
    %479 = arith.mulf %475, %478 : vector<16x256xf32>
    %cst_262 = arith.constant 0.000000e+00 : f32
    %480 = vector.broadcast %cst_262 : f32 to vector<16x256xf32>
    %481 = arith.cmpf oge, %479, %480 : vector<16x256xf32>
    %cst_263 = arith.constant 1.000000e+00 : f32
    %cst_264 = arith.constant -1.000000e+00 : f32
    %482 = vector.broadcast %cst_263 : f32 to vector<16x256xf32>
    %483 = vector.broadcast %cst_264 : f32 to vector<16x256xf32>
    %484 = arith.select %481, %482, %483 : vector<16x256xi1>, vector<16x256xf32>
    %485 = math.absf %479 : vector<16x256xf32>
    %cst_265 = arith.constant 0.327591091 : f32
    %486 = vector.broadcast %cst_265 : f32 to vector<16x256xf32>
    %487 = arith.mulf %486, %485 : vector<16x256xf32>
    %cst_266 = arith.constant 1.000000e+00 : f32
    %488 = vector.broadcast %cst_266 : f32 to vector<16x256xf32>
    %489 = arith.addf %488, %487 : vector<16x256xf32>
    %cst_267 = arith.constant 1.000000e+00 : f32
    %490 = vector.broadcast %cst_267 : f32 to vector<16x256xf32>
    %491 = arith.divf %490, %489 : vector<16x256xf32>
    %cst_268 = arith.constant 1.06140542 : f32
    %492 = vector.broadcast %cst_268 : f32 to vector<16x256xf32>
    %493 = arith.mulf %492, %491 : vector<16x256xf32>
    %cst_269 = arith.constant -1.45315206 : f32
    %494 = vector.broadcast %cst_269 : f32 to vector<16x256xf32>
    %495 = arith.addf %493, %494 : vector<16x256xf32>
    %496 = arith.mulf %495, %491 : vector<16x256xf32>
    %cst_270 = arith.constant 1.42141378 : f32
    %497 = vector.broadcast %cst_270 : f32 to vector<16x256xf32>
    %498 = arith.addf %496, %497 : vector<16x256xf32>
    %499 = arith.mulf %498, %491 : vector<16x256xf32>
    %cst_271 = arith.constant -0.284496725 : f32
    %500 = vector.broadcast %cst_271 : f32 to vector<16x256xf32>
    %501 = arith.addf %499, %500 : vector<16x256xf32>
    %502 = arith.mulf %501, %491 : vector<16x256xf32>
    %cst_272 = arith.constant 0.254829586 : f32
    %503 = vector.broadcast %cst_272 : f32 to vector<16x256xf32>
    %504 = arith.addf %502, %503 : vector<16x256xf32>
    %505 = arith.mulf %504, %491 : vector<16x256xf32>
    %cst_273 = arith.constant 0.000000e+00 : f32
    %506 = vector.broadcast %cst_273 : f32 to vector<16x256xf32>
    %507 = arith.subf %506, %485 : vector<16x256xf32>
    %508 = arith.mulf %507, %485 : vector<16x256xf32>
    %509 = math.exp %508 : vector<16x256xf32>
    %510 = arith.mulf %505, %509 : vector<16x256xf32>
    %cst_274 = arith.constant 1.000000e+00 : f32
    %511 = vector.broadcast %cst_274 : f32 to vector<16x256xf32>
    %512 = arith.subf %511, %510 : vector<16x256xf32>
    %513 = arith.mulf %484, %512 : vector<16x256xf32>
    %cst_275 = arith.constant 1.000000e+00 : f32
    %514 = vector.broadcast %cst_275 : f32 to vector<16x256xf32>
    %515 = arith.addf %514, %513 : vector<16x256xf32>
    %516 = arith.mulf %477, %515 : vector<16x256xf32>
    %517 = arith.truncf %516 : vector<16x256xf32> to vector<16x256xbf16>
    %c1_276 = arith.constant 1 : index
    %c0_277 = arith.constant 0 : index
    %c0_278 = arith.constant 0 : index
    %518 = vector.load %arg17[%c1_276, %c0_277, %c0_278] : memref<2x256x128xbf16, #tpu.memory_space<vmem>>, vector<1x256x128xbf16>
    %519 = vector.shape_cast %518 : vector<1x256x128xbf16> to vector<256x128xbf16>
    %cst_279 = arith.constant dense<0.000000e+00> : vector<16x128xf32>
    %520 = tpu.matmul %517, %519, %cst_279 {dimension_numbers = #tpu.dot_dimension_numbers<[1], [0], [0], [1], [0, 0, 1, 1], [], []>} : vector<16x256xbf16>, vector<256x128xbf16>, vector<16x128xf32> -> vector<16x128xf32>
    %c1_280 = arith.constant 1 : index
    %c0_281 = arith.constant 0 : index
    %c0_282 = arith.constant 0 : index
    %521 = vector.load %arg18[%c1_280, %c0_281, %c0_282] : memref<2x1x128xf32, #tpu.memory_space<vmem>>, vector<1x1x128xf32>
    %522 = vector.shape_cast %521 : vector<1x1x128xf32> to vector<1x128xf32>
    %523 = vector.broadcast %522 : vector<1x128xf32> to vector<16x128xf32>
    %524 = arith.addf %520, %523 : vector<16x128xf32>
    %525 = arith.addf %524, %467 : vector<16x128xf32>
    %c1_283 = arith.constant 1 : index
    %c0_284 = arith.constant 0 : index
    %c0_285 = arith.constant 0 : index
    %526 = vector.load %arg19[%c1_283, %c0_284, %c0_285] : memref<2x1x128xf32, #tpu.memory_space<vmem>>, vector<1x1x128xf32>
    %527 = vector.shape_cast %526 : vector<1x1x128xf32> to vector<1x128xf32>
    %c1_286 = arith.constant 1 : index
    %c0_287 = arith.constant 0 : index
    %c0_288 = arith.constant 0 : index
    %528 = vector.load %arg20[%c1_286, %c0_287, %c0_288] : memref<2x1x128xf32, #tpu.memory_space<vmem>>, vector<1x1x128xf32>
    %529 = vector.shape_cast %528 : vector<1x1x128xf32> to vector<1x128xf32>
    %cst_289 = arith.constant dense<0.000000e+00> : vector<16xf32>
    %530 = vector.multi_reduction <add>, %525, %cst_289 [1] : vector<16x128xf32> to vector<16xf32>
    %531 = vector.shape_cast %530 : vector<16xf32> to vector<16x1xf32>
    %cst_290 = arith.constant 1.280000e+02 : f32
    %532 = vector.broadcast %cst_290 : f32 to vector<16x1xf32>
    %533 = arith.divf %531, %532 : vector<16x1xf32>
    %534 = vector.broadcast %533 : vector<16x1xf32> to vector<16x128xf32>
    %535 = arith.subf %525, %534 : vector<16x128xf32>
    %536 = arith.mulf %535, %535 : vector<16x128xf32>
    %cst_291 = arith.constant dense<0.000000e+00> : vector<16xf32>
    %537 = vector.multi_reduction <add>, %536, %cst_291 [1] : vector<16x128xf32> to vector<16xf32>
    %538 = vector.shape_cast %537 : vector<16xf32> to vector<16x1xf32>
    %cst_292 = arith.constant 1.280000e+02 : f32
    %539 = vector.broadcast %cst_292 : f32 to vector<16x1xf32>
    %540 = arith.divf %538, %539 : vector<16x1xf32>
    %541 = vector.broadcast %533 : vector<16x1xf32> to vector<16x128xf32>
    %542 = arith.subf %525, %541 : vector<16x128xf32>
    %cst_293 = arith.constant 9.99999996E-13 : f32
    %543 = vector.broadcast %cst_293 : f32 to vector<16x1xf32>
    %544 = arith.addf %540, %543 : vector<16x1xf32>
    %545 = math.rsqrt %544 : vector<16x1xf32>
    %546 = vector.broadcast %545 : vector<16x1xf32> to vector<16x128xf32>
    %547 = arith.mulf %542, %546 : vector<16x128xf32>
    %548 = vector.broadcast %527 : vector<1x128xf32> to vector<16x128xf32>
    %549 = arith.mulf %547, %548 : vector<16x128xf32>
    %550 = vector.broadcast %529 : vector<1x128xf32> to vector<16x128xf32>
    %551 = arith.addf %549, %550 : vector<16x128xf32>
    %552 = vector.extract_strided_slice %551 {offsets = [0, 0], sizes = [1, 128], strides = [1, 1]} : vector<16x128xf32> to vector<1x128xf32>
    %553 = vector.extract_strided_slice %551 {offsets = [8, 0], sizes = [1, 128], strides = [1, 1]} : vector<16x128xf32> to vector<1x128xf32>
    %554 = tpu.concatenate %552, %553 in 0 : vector<1x128xf32>, vector<1x128xf32> -> vector<2x128xf32>
    %555 = arith.truncf %554 : vector<2x128xf32> to vector<2x128xbf16>
    %c0_294 = arith.constant 0 : index
    %c0_295 = arith.constant 0 : index
    %556 = vector.load %arg21[%c0_294, %c0_295] : memref<128x128xbf16, #tpu.memory_space<vmem>>, vector<128x128xbf16>
    %cst_296 = arith.constant dense<0.000000e+00> : vector<2x128xf32>
    %557 = tpu.matmul %555, %556, %cst_296 {dimension_numbers = #tpu.dot_dimension_numbers<[1], [0], [0], [1], [0, 0, 1, 1], [], []>} : vector<2x128xbf16>, vector<128x128xbf16>, vector<2x128xf32> -> vector<2x128xf32>
    %c0_297 = arith.constant 0 : index
    %c0_298 = arith.constant 0 : index
    %558 = vector.load %arg22[%c0_297, %c0_298] : memref<1x128xf32, #tpu.memory_space<vmem>>, vector<1x128xf32>
    %559 = vector.broadcast %558 : vector<1x128xf32> to vector<2x128xf32>
    %560 = arith.addf %557, %559 : vector<2x128xf32>
    %561 = math.tanh %560 : vector<2x128xf32>
    %562 = arith.truncf %561 : vector<2x128xf32> to vector<2x128xbf16>
    %c0_299 = arith.constant 0 : index
    %c0_300 = arith.constant 0 : index
    %563 = vector.load %arg23[%c0_299, %c0_300] : memref<128x128xbf16, #tpu.memory_space<vmem>>, vector<128x128xbf16>
    %cst_301 = arith.constant dense<0.000000e+00> : vector<2x128xf32>
    %564 = tpu.matmul %562, %563, %cst_301 {dimension_numbers = #tpu.dot_dimension_numbers<[1], [0], [0], [1], [0, 0, 1, 1], [], []>} : vector<2x128xbf16>, vector<128x128xbf16>, vector<2x128xf32> -> vector<2x128xf32>
    %c0_302 = arith.constant 0 : index
    %c0_303 = arith.constant 0 : index
    %565 = vector.load %arg24[%c0_302, %c0_303] : memref<1x128xf32, #tpu.memory_space<vmem>>, vector<1x128xf32>
    %566 = vector.broadcast %565 : vector<1x128xf32> to vector<2x128xf32>
    %567 = arith.addf %564, %566 : vector<2x128xf32>
    %c0_304 = arith.constant 0 : index
    %c0_305 = arith.constant 0 : index
    %568 = vector.load %arg25[%c0_304, %c0_305] : memref<2x128xf32, #tpu.memory_space<vmem>>, vector<2x128xf32>
    tpu.vector_store %arg25[%c0_304, %c0_305], %567 {strides = array<i32>} : memref<2x128xf32, #tpu.memory_space<vmem>>, vector<2x128xf32>,
    return
  }
  func.func @transform_0(%arg0: i32, %arg1: memref<2xi32, #tpu.memory_space<smem>>) -> (i32, i32) {
    %c0_i32 = arith.constant 0 : i32
    %c0_i32_0 = arith.constant 0 : i32
    %c0_i32_1 = arith.constant 0 : i32
    return %c0_i32, %c0_i32_0 : i32, i32
  }
  func.func @transform_1(%arg0: i32, %arg1: memref<2xi32, #tpu.memory_space<smem>>) -> (i32, i32) {
    %c0_i32 = arith.constant 0 : i32
    %c0_i32_0 = arith.constant 0 : i32
    %c0_i32_1 = arith.constant 0 : i32
    return %c0_i32, %c0_i32_0 : i32, i32
  }
  func.func @transform_2(%arg0: i32, %arg1: memref<2xi32, #tpu.memory_space<smem>>) -> (i32, i32) {
    %c0_i32 = arith.constant 0 : i32
    %c0_i32_0 = arith.constant 0 : i32
    %c0_i32_1 = arith.constant 0 : i32
    return %c0_i32, %c0_i32_0 : i32, i32
  }
  func.func @transform_3(%arg0: i32, %arg1: memref<2xi32, #tpu.memory_space<smem>>) -> (i32, i32, i32, i32) {
    %c0_i32 = arith.constant 0 : i32
    %c0_i32_0 = arith.constant 0 : i32
    %c0_i32_1 = arith.constant 0 : i32
    %c0_i32_2 = arith.constant 0 : i32
    %c0_i32_3 = arith.constant 0 : i32
    return %c0_i32, %c0_i32_0, %c0_i32_1, %c0_i32_2 : i32, i32, i32, i32
  }
  func.func @transform_4(%arg0: i32, %arg1: memref<2xi32, #tpu.memory_space<smem>>) -> (i32, i32, i32, i32) {
    %c0_i32 = arith.constant 0 : i32
    %c0_i32_0 = arith.constant 0 : i32
    %c0_i32_1 = arith.constant 0 : i32
    %c0_i32_2 = arith.constant 0 : i32
    %c0_i32_3 = arith.constant 0 : i32
    return %c0_i32, %c0_i32_0, %c0_i32_1, %c0_i32_2 : i32, i32, i32, i32
  }
  func.func @transform_5(%arg0: i32, %arg1: memref<2xi32, #tpu.memory_space<smem>>) -> (i32, i32, i32, i32) {
    %c0_i32 = arith.constant 0 : i32
    %c0_i32_0 = arith.constant 0 : i32
    %c0_i32_1 = arith.constant 0 : i32
    %c0_i32_2 = arith.constant 0 : i32
    %c0_i32_3 = arith.constant 0 : i32
    return %c0_i32, %c0_i32_0, %c0_i32_1, %c0_i32_2 : i32, i32, i32, i32
  }
  func.func @transform_6(%arg0: i32, %arg1: memref<2xi32, #tpu.memory_space<smem>>) -> (i32, i32, i32, i32) {
    %c0_i32 = arith.constant 0 : i32
    %c0_i32_0 = arith.constant 0 : i32
    %c0_i32_1 = arith.constant 0 : i32
    %c0_i32_2 = arith.constant 0 : i32
    %c0_i32_3 = arith.constant 0 : i32
    return %c0_i32, %c0_i32_0, %c0_i32_1, %c0_i32_2 : i32, i32, i32, i32
  }
  func.func @transform_7(%arg0: i32, %arg1: memref<2xi32, #tpu.memory_space<smem>>) -> (i32, i32, i32, i32) {
    %c0_i32 = arith.constant 0 : i32
    %c0_i32_0 = arith.constant 0 : i32
    %c0_i32_1 = arith.constant 0 : i32
    %c0_i32_2 = arith.constant 0 : i32
    %c0_i32_3 = arith.constant 0 : i32
    return %c0_i32, %c0_i32_0, %c0_i32_1, %c0_i32_2 : i32, i32, i32, i32
  }
  func.func @transform_8(%arg0: i32, %arg1: memref<2xi32, #tpu.memory_space<smem>>) -> (i32, i32, i32, i32) {
    %c0_i32 = arith.constant 0 : i32
    %c0_i32_0 = arith.constant 0 : i32
    %c0_i32_1 = arith.constant 0 : i32
    %c0_i32_2 = arith.constant 0 : i32
    %c0_i32_3 = arith.constant 0 : i32
    return %c0_i32, %c0_i32_0, %c0_i32_1, %c0_i32_2 : i32, i32, i32, i32
  }
  func.func @transform_9(%arg0: i32, %arg1: memref<2xi32, #tpu.memory_space<smem>>) -> (i32, i32, i32, i32) {
    %c0_i32 = arith.constant 0 : i32
    %c0_i32_0 = arith.constant 0 : i32
    %c0_i32_1 = arith.constant 0 : i32
    %c0_i32_2 = arith.constant 0 : i32
    %c0_i32_3 = arith.constant 0 : i32
    return %c0_i32, %c0_i32_0, %c0_i32_1, %c0_i32_2 : i32, i32, i32, i32
  }
  func.func @transform_10(%arg0: i32, %arg1: memref<2xi32, #tpu.memory_space<smem>>) -> (i32, i32, i32) {
    %c0_i32 = arith.constant 0 : i32
    %c0_i32_0 = arith.constant 0 : i32
    %c0_i32_1 = arith.constant 0 : i32
    %c0_i32_2 = arith.constant 0 : i32
    return %c0_i32, %c0_i32_0, %c0_i32_1 : i32, i32, i32
  }
  func.func @transform_11(%arg0: i32, %arg1: memref<2xi32, #tpu.memory_space<smem>>) -> (i32, i32, i32) {
    %c0_i32 = arith.constant 0 : i32
    %c0_i32_0 = arith.constant 0 : i32
    %c0_i32_1 = arith.constant 0 : i32
    %c0_i32_2 = arith.constant 0 : i32
    return %c0_i32, %c0_i32_0, %c0_i32_1 : i32, i32, i32
  }
  func.func @transform_12(%arg0: i32, %arg1: memref<2xi32, #tpu.memory_space<smem>>) -> (i32, i32, i32) {
    %c0_i32 = arith.constant 0 : i32
    %c0_i32_0 = arith.constant 0 : i32
    %c0_i32_1 = arith.constant 0 : i32
    %c0_i32_2 = arith.constant 0 : i32
    return %c0_i32, %c0_i32_0, %c0_i32_1 : i32, i32, i32
  }
  func.func @transform_13(%arg0: i32, %arg1: memref<2xi32, #tpu.memory_space<smem>>) -> (i32, i32, i32) {
    %c0_i32 = arith.constant 0 : i32
    %c0_i32_0 = arith.constant 0 : i32
    %c0_i32_1 = arith.constant 0 : i32
    %c0_i32_2 = arith.constant 0 : i32
    return %c0_i32, %c0_i32_0, %c0_i32_1 : i32, i32, i32
  }
  func.func @transform_14(%arg0: i32, %arg1: memref<2xi32, #tpu.memory_space<smem>>) -> (i32, i32, i32) {
    %c0_i32 = arith.constant 0 : i32
    %c0_i32_0 = arith.constant 0 : i32
    %c0_i32_1 = arith.constant 0 : i32
    %c0_i32_2 = arith.constant 0 : i32
    return %c0_i32, %c0_i32_0, %c0_i32_1 : i32, i32, i32
  }
  func.func @transform_15(%arg0: i32, %arg1: memref<2xi32, #tpu.memory_space<smem>>) -> (i32, i32, i32) {
    %c0_i32 = arith.constant 0 : i32
    %c0_i32_0 = arith.constant 0 : i32
    %c0_i32_1 = arith.constant 0 : i32
    %c0_i32_2 = arith.constant 0 : i32
    return %c0_i32, %c0_i32_0, %c0_i32_1 : i32, i32, i32
  }
  func.func @transform_16(%arg0: i32, %arg1: memref<2xi32, #tpu.memory_space<smem>>) -> (i32, i32, i32) {
    %c0_i32 = arith.constant 0 : i32
    %c0_i32_0 = arith.constant 0 : i32
    %c0_i32_1 = arith.constant 0 : i32
    %c0_i32_2 = arith.constant 0 : i32
    return %c0_i32, %c0_i32_0, %c0_i32_1 : i32, i32, i32
  }
  func.func @transform_17(%arg0: i32, %arg1: memref<2xi32, #tpu.memory_space<smem>>) -> (i32, i32, i32) {
    %c0_i32 = arith.constant 0 : i32
    %c0_i32_0 = arith.constant 0 : i32
    %c0_i32_1 = arith.constant 0 : i32
    %c0_i32_2 = arith.constant 0 : i32
    return %c0_i32, %c0_i32_0, %c0_i32_1 : i32, i32, i32
  }
  func.func @transform_18(%arg0: i32, %arg1: memref<2xi32, #tpu.memory_space<smem>>) -> (i32, i32, i32) {
    %c0_i32 = arith.constant 0 : i32
    %c0_i32_0 = arith.constant 0 : i32
    %c0_i32_1 = arith.constant 0 : i32
    %c0_i32_2 = arith.constant 0 : i32
    return %c0_i32, %c0_i32_0, %c0_i32_1 : i32, i32, i32
  }
  func.func @transform_19(%arg0: i32, %arg1: memref<2xi32, #tpu.memory_space<smem>>) -> (i32, i32) {
    %c0_i32 = arith.constant 0 : i32
    %c0_i32_0 = arith.constant 0 : i32
    %c0_i32_1 = arith.constant 0 : i32
    return %c0_i32, %c0_i32_0 : i32, i32
  }
  func.func @transform_20(%arg0: i32, %arg1: memref<2xi32, #tpu.memory_space<smem>>) -> (i32, i32) {
    %c0_i32 = arith.constant 0 : i32
    %c0_i32_0 = arith.constant 0 : i32
    %c0_i32_1 = arith.constant 0 : i32
    return %c0_i32, %c0_i32_0 : i32, i32
  }
  func.func @transform_21(%arg0: i32, %arg1: memref<2xi32, #tpu.memory_space<smem>>) -> (i32, i32) {
    %c0_i32 = arith.constant 0 : i32
    %c0_i32_0 = arith.constant 0 : i32
    %c0_i32_1 = arith.constant 0 : i32
    return %c0_i32, %c0_i32_0 : i32, i32
  }
  func.func @transform_22(%arg0: i32, %arg1: memref<2xi32, #tpu.memory_space<smem>>) -> (i32, i32) {
    %c0_i32 = arith.constant 0 : i32
    %c0_i32_0 = arith.constant 0 : i32
    %c0_i32_1 = arith.constant 0 : i32
    return %c0_i32, %c0_i32_0 : i32, i32
  }
  func.func @transform_23(%arg0: i32, %arg1: memref<2xi32, #tpu.memory_space<smem>>) -> (i32, i32) {
    %c0_i32 = arith.constant 0 : i32
    %c0_i32_0 = arith.constant 0 : i32
    %c0_i32_1 = arith.constant 0 : i32
    return %c0_i32, %c0_i32_0 : i32, i32
  }
}

</mosaic_0001>

<bundles_post_ra>
// kernel: tpu_custom_call.1
= control target key start
LH: loop header
LB: loop body
LE: loop exit
PB: predicated region body
PF: predicated region fallthrough
CT: control target
= control target key end

     0   :  { %s4510_s28 = smov [#allocation3]   ;;  %s5766_s0 = inlined_call_operand.vmem [shape: s32[2], index: 0, kind: input, shape index: {}]   ;;  %s5767_s1 = inlined_call_operand.vmem [shape: f32[16,128], index: 1, kind: input, shape index: {}]   ;;  %s5768_s2 = inlined_call_operand.vmem [shape: f32[1,128], index: 2, kind: input, shape index: {}]   ;;  %s5769_s3 = inlined_call_operand.vmem [shape: f32[1,128], index: 3, kind: input, shape index: {}]   ;;  %s5770_s4 = inlined_call_operand.vmem [shape: bf16[2,2,128,64], index: 4, kind: input, shape index: {}]   ;;  %s5771_s5 = inlined_call_operand.vmem [shape: f32[2,2,1,64], index: 5, kind: input, shape index: {}]   ;;  %s5772_s6 = inlined_call_operand.vmem [shape: bf16[2,2,128,64], index: 6, kind: input, shape index: {}]   ;;  %s5773_s7 = inlined_call_operand.vmem [shape: f32[2,2,1,64], index: 7, kind: input, shape index: {}]   ;;  %s5774_s8 = inlined_call_operand.vmem [shape: bf16[2,2,128,64], index: 8, kind: input, shape index: {}]   ;;  %s5775_s9 = inlined_call_operand.vmem [shape: f32[2,2,1,64], index: 9, kind: input, shape index: {}]   ;;  %s5776_s10 = inlined_call_operand.vmem [shape: bf16[2,2,64,128], index: 10, kind: input, shape index: {}]   ;;  %s5777_s11 = inlined_call_operand.vmem [shape: f32[2,1,128], index: 11, kind: input, shape index: {}]   ;;  %s5778_s12 = inlined_call_operand.vmem [shape: f32[2,1,128], index: 12, kind: input, shape index: {}]   ;;  %s5779_s13 = inlined_call_operand.vmem [shape: f32[2,1,128], index: 13, kind: input, shape index: {}]   ;;  %s5780_s14 = inlined_call_operand.vmem [shape: bf16[2,128,256], index: 14, kind: input, shape index: {}]   ;;  %s5781_s15 = inlined_call_operand.vmem [shape: f32[2,1,256], index: 15, kind: input, shape index: {}]   ;;  %s5782_s16 = inlined_call_operand.vmem [shape: bf16[2,256,128], index: 16, kind: input, shape index: {}]   ;;  %s5783_s17 = inlined_call_operand.vmem [shape: f32[2,1,128], index: 17, kind: input, shape index: {}]   ;;  %s5784_s18 = inlined_call_operand.vmem [shape: f32[2,1,128], index: 18, kind: input, shape index: {}]   ;;  %s5785_s19 = inlined_call_operand.vmem [shape: f32[2,1,128], index: 19, kind: input, shape index: {}]   ;;  %s5786_s20 = inlined_call_operand.vmem [shape: bf16[128,128], index: 20, kind: input, shape index: {}]   ;;  %s5787_s21 = inlined_call_operand.vmem [shape: f32[1,128], index: 21, kind: input, shape index: {}]   ;;  %s5788_s22 = inlined_call_operand.vmem [shape: bf16[128,128], index: 22, kind: input, shape index: {}]   ;;  %s5789_s23 = inlined_call_operand.vmem [shape: f32[1,128], index: 23, kind: input, shape index: {}]   ;;  %s5790_s24 = inlined_call_operand.hbm [shape: f32[2,128], index: 24, kind: output, shape index: {}]  }
   0x1   :  { %5798 = sst [smem:[#allocation8_spill]] %s5766_s0 }
   0x2   :  { %5799 = sst [smem:[#allocation9_spill]] %s5767_s1 }
   0x3   :  { %5800 = sst [smem:[#allocation10_spill]] %s5768_s2 }
   0x4   :  { %5801 = sst [smem:[#allocation11_spill]] %s5769_s3 }
   0x5   :  { %5802 = sst [smem:[#allocation12_spill]] %s5770_s4 }
   0x6   :  { %5803 = sst [smem:[#allocation13_spill]] %s5771_s5 }
   0x7   :  { %5804 = sst [smem:[#allocation14_spill]] %s5772_s6 }
   0x8   :  { %5805 = sst [smem:[#allocation15_spill]] %s5773_s7 }
   0x9   :  { %5806 = sst [smem:[#allocation16_spill]] %s5774_s8 }
   0xa   :  { %5807 = sst [smem:[#allocation17_spill]] %s5784_s18 }
   0xb   :  { %s5808_s27 = sld [smem:[#allocation8_spill]] }
  0x11   :  { %s30_s18 = sshll.u32 %s5808_s27, 4  ;;  %s31_s18 = int_to_ptr.vmem [resolvable:$true] %s30_s18 }
  0x12   :  { %33 = dma.vmem_to_smem %s31_s18, 16, %s4510_s28, [#allocation2] }
  0x13   :  { %4506 = dma.done.wait [#allocation2], 16 }
  0x14   :  { %4507 = vsyncadd [#allocation2], 4294967280 }
  0x15   :  { %36 = sfence }
  0x16   :  { %s5809_s29 = sld [smem:[#allocation9_spill]] }
  0x1c   :  { %v85_v0 = vld [vmem:[%s5809_s29] sm:$0xff]  ;;  %v86_v1 = vld [vmem:[%s5809_s29 + $0x8] sm:$0xff] }
  0x1d   :  { %89 = vadd.xlane.f32.xlu0 %v85_v0 }
  0x25   :  { %91 = vadd.xlane.f32.xlu0 %v86_v1 }
  0x26   :  { %37 = vsyncpa [#allocation5], 0  ;;  %v4511_v2 = vmov 128.0   ;;  %s5810_s3 = sld [smem:[#allocation12_spill]]  ;;  %vm407_vm7 = vcmask 523264   ;;  %vm445_vm8 = vcmask 1043456  }
  0x27   :  { %4382 = vrcp.f32 %v4511_v2  ;;  %s5811_s4 = sld [smem:[#allocation14_spill]]  ;;  %vm429_vm10 = vcmask 64512   ;;  %s4514_s6 = smov [#allocation4]  }
  0x28   :  { %s5812_s26 = sld [smem:[#allocation16_spill]] }
  0x29   :  { %s5813_s0 = sld [smem:[#allocation10_spill]] }
  0x2a   :  { %s5814_s30 = sld [smem:[#allocation11_spill]] }
  0x2b   :  { %s5815_s1 = sld [smem:[#allocation15_spill]] }
  0x2c   :  { %v4164_v17 = vld [vmem:[%s5810_s3 + $0x38] sm:$0xff]  ;;  %v4163_v20 = vld [vmem:[%s5810_s3 + $0x30] sm:$0xff]  ;;  %v4162_v23 = vld [vmem:[%s5810_s3 + $0x28] sm:$0xff]  ;;  %s5816_s28 = sld [smem:[#allocation13_spill]] }
  0x2d   :  { %v4383_v3 = vpop.eup %4382  ;;  %v4172_v18 = vld [vmem:[%s5811_s4 + $0x38] sm:$0xff]  ;;  %225 = vmatpush.bf16.msra.mxu0 %v4164_v17  ;;  %v4171_v21 = vld [vmem:[%s5811_s4 + $0x30] sm:$0xff]  ;;  %v4170_v24 = vld [vmem:[%s5811_s4 + $0x28] sm:$0xff]  ;;  %s148_s25 = sld [smem:[#allocation3]] }
  0x2e   :  { %v94_v4 = vmul.f32 128.0, %v4383_v3  ;;  %vm98_vm0 = vweird.f32 %v4383_v3  ;;  %v4180_v19 = vld [vmem:[%s5812_s26 + $0x38] sm:$0xff]  ;;  %307 = vmatpush.bf16.msra.mxu1 %v4172_v18  ;;  %v4179_v22 = vld [vmem:[%s5812_s26 + $0x30] sm:$0xff]  ;;  %v4178_v25 = vld [vmem:[%s5812_s26 + $0x28] sm:$0xff]  ;;  %s3136_s7 = sld [smem:[#allocation3 + $0x1]] }
  0x2f   :  { %389 = vmatpush.bf16.msra.mxu2 %v4180_v19  ;;  %v4161_v26 = vld [vmem:[%s5810_s3 + $0x20] sm:$0xff]  ;;  %v4160_v29 = vld [vmem:[%s5810_s3 + $0x18] sm:$0xff]  ;;  %v4159_v32 = vld [vmem:[%s5810_s3 + $0x10] sm:$0xff] }
  0x30   :  { %v95_v5 = vsub.f32 1.0, %v94_v4  ;;  %v4169_v27 = vld [vmem:[%s5811_s4 + $0x20] sm:$0xff]  ;;  %v4168_v30 = vld [vmem:[%s5811_s4 + $0x18] sm:$0xff]  ;;  %v4167_v33 = vld [vmem:[%s5811_s4 + $0x10] sm:$0xff] }
  0x31   :  { %226 = vmatpush.bf16.msra.mxu0 %v4163_v20  ;;  %v4177_v28 = vld [vmem:[%s5812_s26 + $0x20] sm:$0xff]  ;;  %v4176_v31 = vld [vmem:[%s5812_s26 + $0x18] sm:$0xff]  ;;  %v4175_v34 = vld [vmem:[%s5812_s26 + $0x10] sm:$0xff] }
  0x32   :  { %v96_v6 = vmul.f32 %v4383_v3, %v95_v5  ;;  %308 = vmatpush.bf16.msra.mxu1 %v4171_v21  ;;  %v4158_v35 = vld [vmem:[%s5810_s3 + $0x8] sm:$0xff]  ;;  %v4157_v40 = vld [vmem:[%s5810_s3] sm:$0xff]  ;;  %v4199_v18 = vld [vmem:[%s5811_s4 + $0x70] sm:$0xff] }
  0x33   :  { %390 = vmatpush.bf16.msra.mxu2 %v4179_v22  ;;  %v4166_v36 = vld [vmem:[%s5811_s4 + $0x8] sm:$0xff]  ;;  %v4165_v41 = vld [vmem:[%s5811_s4] sm:$0xff] }
  0x34   :  { %v97_v7 = vadd.f32 %v4383_v3, %v96_v6  ;;  %v4174_v37 = vld [vmem:[%s5812_s26 + $0x8] sm:$0xff]  ;;  %v4173_v42 = vld [vmem:[%s5812_s26] sm:$0xff] }
  0x35   :  { %227 = vmatpush.bf16.msra.mxu0 %v4162_v23  ;;  %v4354_v59 = vld [vmem:[%s5813_s0] ss:$0 sm:$0xff] }
  0x36   :  { %v4649_v8 = vsel %vm98_vm0, %v4383_v3, %v97_v7  ;;  %309 = vmatpush.bf16.msra.mxu1 %v4170_v24  ;;  %v4355_v63 = vld [vmem:[%s5814_s30] ss:$0 sm:$0xff] }
  0x37   :  { %391 = vmatpush.bf16.msra.mxu2 %v4178_v25  ;;  %v4357_v6 = vld [vmem:[%s5815_s1] ss:$0 sm:$0xff]  ;;  %v4198_v25 = vld [vmem:[%s5811_s4 + $0x68] sm:$0xff] }
  0x39   :  { %228 = vmatpush.bf16.msra.mxu0 %v4161_v26 }
  0x3a   :  { %310 = vmatpush.bf16.msra.mxu1 %v4169_v27 }
  0x3b   :  { %392 = vmatpush.bf16.msra.mxu2 %v4177_v28 }
  0x3d   :  { %229 = vmatpush.bf16.msra.mxu0 %v4160_v29  ;;  %v4197_v29 = vld [vmem:[%s5811_s4 + $0x60] sm:$0xff] }
  0x3e   :  { %311 = vmatpush.bf16.msra.mxu1 %v4168_v30 }
  0x3f   :  { %393 = vmatpush.bf16.msra.mxu2 %v4176_v31 }
  0x41   :  { %230 = vmatpush.bf16.msra.mxu0 %v4159_v32  ;;  %v4196_v32 = vld [vmem:[%s5811_s4 + $0x58] sm:$0xff] }
  0x42   :  { %312 = vmatpush.bf16.msra.mxu1 %v4167_v33 }
  0x43   :  { %394 = vmatpush.bf16.msra.mxu2 %v4175_v34  ;;  %v4195_v34 = vld [vmem:[%s5811_s4 + $0x50] sm:$0xff] }
  0x45   :  { %231 = vmatpush.bf16.msra.mxu0 %v4158_v35  ;;  %v4194_v35 = vld [vmem:[%s5811_s4 + $0x48] sm:$0xff] }
  0x46   :  { %313 = vmatpush.bf16.msra.mxu1 %v4166_v36  ;;  %v4193_v36 = vld [vmem:[%s5811_s4 + $0x40] sm:$0xff] }
  0x47   :  { %395 = vmatpush.bf16.msra.mxu2 %v4174_v37  ;;  %v146_v37 = vlaneseq }
  0x49   :  { %232 = vmatpush.bf16.msra.mxu0 %v4157_v40 }
  0x4a   :  { %314 = vmatpush.bf16.msra.mxu1 %v4165_v41  ;;  %v4512_v41 = vmov -1e+09  }
  0x4b   :  { %396 = vmatpush.bf16.msra.mxu2 %v4173_v42 }
  0x90   :  { %v90_v9 = vpop.xlane.xlu0 %89 }
  0x91   :  { %v100_v10 = vmul.f32 %v4649_v8, %v90_v9 }
  0x93   :  { %v4652_v11 = vsub.f32 %v85_v0, %v100_v10  ;;  %v4760_v10 = vld [vmem:[%s5816_s28] ss:$0 sm:$0xff] }
  0x95   :  { %v104_v12 = vmul.f32 %v4652_v11, %v4652_v11 }
  0x97   :  { %106 = vadd.xlane.f32.xlu1 %v104_v12  ;;  %v4200_v12 = vld [vmem:[%s5811_s4 + $0x78] sm:$0xff] }
  0x98   :  { %v92_v13 = vpop.xlane.xlu0 %91 }
  0x99   :  { %v101_v14 = vmul.f32 %v4649_v8, %v92_v13 }
  0x9b   :  { %v4657_v15 = vsub.f32 %v86_v1, %v101_v14  ;;  %v4358_v14 = vld [vmem:[%s5775_s9] ss:$0 sm:$0xff] }
  0x9d   :  { %v105_v16 = vmul.f32 %v4657_v15, %v4657_v15 }
  0x9f   :  { %108 = vadd.xlane.f32.xlu1 %v105_v16 }
 0x10a   :  { %v107_v38 = vpop.xlane.xlu1 %106 }
 0x10b   :  { %v110_v39 = vmul.f32 %v107_v38, %v4649_v8  ;;  %v147_v38 = vand.u32 127, %v146_v37 }
 0x10d   :  { %v112_v43 = vadd.f32 1e-12, %v110_v39  ;;  %v149_v39 = vstv %s148_s25 }
 0x10e   :  { %vm150_vm9 = vcmp.lt.s32.totalorder %v147_v38, %v149_v39 }
 0x10f   :  { %4384 = vrsqrt.f32 %v112_v43  ;;  %vm120_vm2 = vweird.f32 %v112_v43  ;;  %v4796_v42 = vsel %vm150_vm9, 0.0, %v4512_v41 }
 0x112   :  { %v109_v44 = vpop.xlane.xlu1 %108 }
 0x113   :  { %v111_v45 = vmul.f32 %v109_v44, %v4649_v8 }
 0x115   :  { %v4385_v46 = vpop.eup %4384  ;;  %v113_v47 = vadd.f32 1e-12, %v111_v45 }
 0x116   :  { %v115_v48 = vmul.f32 %v4385_v46, %v112_v43  ;;  %vm121_vm1 = vweird.f32 %v4385_v46 }
 0x117   :  { %4386 = vrsqrt.f32 %v113_v47  ;;  %vm122_vm3 = vmor %vm120_vm2, %vm121_vm1  ;;  %vm130_vm5 = vweird.f32 %v113_v47 }
 0x118   :  { %v116_v49 = vmul.f32 %v4385_v46, %v115_v48 }
 0x11a   :  { %v117_v50 = vmul.f32 0.5, %v116_v49 }
 0x11c   :  { %v118_v51 = vsub.f32 1.5, %v117_v50 }
 0x11d   :  { %v4387_v52 = vpop.eup %4386 }
 0x11e   :  { %v119_v53 = vmul.f32 %v4385_v46, %v118_v51  ;;  %v125_v54 = vmul.f32 %v4387_v52, %v113_v47  ;;  %vm131_vm4 = vweird.f32 %v4387_v52  ;;  %v4803_v47 = vld [vmem:[%s5815_s1 + $0x1] ss:$0 sm:$0xff] }
 0x11f   :  { %vm132_vm6 = vmor %vm130_vm5, %vm131_vm4 }
 0x120   :  { %v126_v55 = vmul.f32 %v4387_v52, %v125_v54  ;;  %v123_v56 = vsel %vm122_vm3, %v4385_v46, %v119_v53 }
 0x121   :  { %v134_v60 = vmul.f32 %v123_v56, %v4652_v11 }
 0x122   :  { %v127_v57 = vmul.f32 0.5, %v126_v55 }
 0x123   :  { %v139_v0 = vmul.f32 %v4354_v59, %v134_v60  ;;  %v4208_v60 = vld [vmem:[%s5812_s26 + $0x78] sm:$0xff] }
 0x124   :  { %v128_v58 = vsub.f32 1.5, %v127_v57 }
 0x125   :  { %v4743_v3 = vadd.f32 %v4355_v63, %v139_v0 }
 0x126   :  { %v129_v61 = vmul.f32 %v4387_v52, %v128_v58 }
 0x128   :  { %v133_v62 = vsel %vm132_vm6, %v4387_v52, %v129_v61 }
 0x129   :  { %v135_v1 = vmul.f32 %v133_v62, %v4657_v15  ;;  %v4207_v62 = vld [vmem:[%s5812_s26 + $0x70] sm:$0xff] }
 0x12b   :  { %v140_v2 = vmul.f32 %v4354_v59, %v135_v1  ;;  %v4205_v1 = vld [vmem:[%s5812_s26 + $0x60] sm:$0xff] }
 0x12d   :  { %v4745_v4 = vadd.f32 %v4355_v63, %v140_v2  ;;  %v4206_v63 = vld [vmem:[%s5812_s26 + $0x68] sm:$0xff] }
 0x12f   :  { %v4749_v5 = vpack.c.bf16 %v4745_v4, %v4743_v3 }
 0x131   :  { %233 = vmatmul.bf16.vlgmr.msra.gmra.mxu0 %v4749_v5  ;;  %315 = vmatmul.bf16.vlgmr.msra.gmra.mxu1 %v4749_v5 }
 0x132   :  { %397 = vmatmul.bf16.vlgmr.msra.gmra.mxu2 %v4749_v5 }
 0x1ae   :  { %v316_v7 = vpop.f32.mrf.mxu1  ;;  %v234_v13 = vpop.f32.mrf.mxu0 }
 0x1af   :  { %v317_v9 = vadd.f32 %v4357_v6, %v316_v7  ;;  %v235_v16 = vadd.f32 %v4760_v10, %v234_v13 }
 0x1b1   :  { %v406_v11 = vpack.c.bf16 %v317_v9, %v317_v9  ;;  %v405_v23 = vpack.c.bf16 %v235_v16, %v235_v16  ;;  %v4203_v9 = vld [vmem:[%s5812_s26 + $0x50] sm:$0xff] }
 0x1b3   :  { %v412_v15 = vsel %vm407_vm7, %v406_v11, 0  ;;  %v4202_v11 = vld [vmem:[%s5812_s26 + $0x48] sm:$0xff] }
 0x1b4   :  { %421 = vmatpush.bf16.xpose.msrb.mxu2 %v412_v15 }
 0x1b5   :  { %v398_v17 = vpop.f32.mrf.mxu2 }
 0x1b6   :  { %v399_v19 = vadd.f32 %v4358_v14, %v398_v17  ;;  %v318_v20 = vpop.f32.mrf.mxu1  ;;  %v236_v0 = vpop.f32.mrf.mxu0 }
 0x1b7   :  { %v319_v21 = vadd.f32 %v4357_v6, %v318_v20  ;;  %v237_v2 = vadd.f32 %v4760_v10, %v236_v0  ;;  %v4204_v6 = vld [vmem:[%s5812_s26 + $0x58] sm:$0xff]  ;;  %v4201_v10 = vld [vmem:[%s5812_s26 + $0x40] sm:$0xff] }
 0x1b8   :  { %v403_v22 = vpack.c.bf16 %v399_v19, %v399_v19 }
 0x1b9   :  { %v463_v24 = vpack.c.bf16 %v319_v21, %v319_v21  ;;  %v462_v7 = vpack.c.bf16 %v237_v2, %v237_v2  ;;  %v4360_v21 = vld [vmem:[%s5775_s9 + $0x1] ss:$0 sm:$0xff] }
 0x1ba   :  { %v447_v26 = vsel %vm445_vm8, %v403_v22, 0 }
 0x1bb   :  { %456 = vmatpush.bf16.msra.mxu3 %v447_v26  ;;  %3233 = vmatmul.msk.bf16.vlgmr.msrb.gmra.mxu2 %vm407_vm7, %v405_v23  ;;  %v468_v27 = vsel %vm407_vm7, %v463_v24, 0 }
 0x1bc   :  { %679 = vmatpush.bf16.msra.mxu2 %v4200_v12 }
 0x1bd   :  { %v400_v28 = vpop.f32.mrf.mxu2 }
 0x1be   :  { %v401_v30 = vadd.f32 %v4358_v14, %v400_v28  ;;  %v153_v14 = vstv %s3136_s7  ;;  %s5817_s7 = sld [smem:[#allocation17_spill]] }
 0x1bf   :  { %477 = vmatpush.bf16.xpose.msrb.mxu3 %v468_v27  ;;  %vm154_vm11 = vcmp.lt.s32.totalorder %v147_v38, %v153_v14 }
 0x1c0   :  { %680 = vmatpush.bf16.msra.mxu2 %v4199_v18  ;;  %v404_v31 = vpack.c.bf16 %v401_v30, %v401_v30  ;;  %v4838_v16 = vsel %vm154_vm11, 0.0, %v4512_v41  ;;  %v4192_v30 = vld [vmem:[%s5810_s3 + $0x78] sm:$0xff]  ;;  %v4186_v41 = vld [vmem:[%s5810_s3 + $0x48] sm:$0xff] }
 0x1c2   :  { %v501_v33 = vsel %vm445_vm8, %v404_v31, 0  ;;  %v4191_v31 = vld [vmem:[%s5810_s3 + $0x70] sm:$0xff] }
 0x1c3   :  { %510 = vmatpush.bf16.msrb.mxu1 %v501_v33  ;;  %v4189_v33 = vld [vmem:[%s5810_s3 + $0x60] sm:$0xff] }
 0x1c4   :  { %681 = vmatpush.bf16.msra.mxu2 %v4198_v25 }
 0x1c7   :  { %595 = vmatpush.bf16.msra.mxu1 %v4192_v30 }
 0x1c8   :  { %682 = vmatpush.bf16.msra.mxu2 %v4197_v29 }
 0x1cb   :  { %596 = vmatpush.bf16.msra.mxu1 %v4191_v31 }
 0x1cc   :  { %683 = vmatpush.bf16.msra.mxu2 %v4196_v32  ;;  %v4190_v32 = vld [vmem:[%s5810_s3 + $0x68] sm:$0xff] }
 0x1cf   :  { %597 = vmatpush.bf16.msra.mxu1 %v4190_v32 }
 0x1d0   :  { %684 = vmatpush.bf16.msra.mxu2 %v4195_v34  ;;  %v4188_v34 = vld [vmem:[%s5810_s3 + $0x58] sm:$0xff] }
 0x1d3   :  { %598 = vmatpush.bf16.msra.mxu1 %v4189_v33 }
 0x1d4   :  { %685 = vmatpush.bf16.msra.mxu2 %v4194_v35 }
 0x1d7   :  { %599 = vmatpush.bf16.msra.mxu1 %v4188_v34 }
 0x1d8   :  { %686 = vmatpush.bf16.msra.mxu2 %v4193_v36 }
 0x1db   :  { %687 = vmatmul.bf16.vlgmr.msra.gmra.mxu2 %v4749_v5 }
 0x23e   :  { %v423_v40 = vpop.f32.mrf.mxu2 }
 0x23f   :  { %v427_v43 = vmul.f32 0.125, %v423_v40  ;;  %v4187_v40 = vld [vmem:[%s5810_s3 + $0x50] sm:$0xff] }
 0x240   :  { %600 = vmatpush.bf16.msra.mxu1 %v4187_v40 }
 0x241   :  { %v428_v44 = vadd.f32 %v427_v43, %v4796_v42  ;;  %v4185_v43 = vld [vmem:[%s5810_s3 + $0x40] sm:$0xff] }
 0x243   :  { %v430_v45 = vsel %vm429_vm10, %v428_v44, -inf }
 0x244   :  { %431 = vmax.xlane.f32.xlu2 %v430_v45  ;;  %601 = vmatpush.bf16.msra.mxu1 %v4186_v41 }
 0x246   :  { %v425_v46 = vpop.f32.mrf.mxu2 }
 0x248   :  { %602 = vmatpush.bf16.msra.mxu1 %v4185_v43 }
 0x25e   :  { %v688_v48 = vpop.f32.mrf.mxu2 }
 0x25f   :  { %v689_v49 = vadd.f32 %v4803_v47, %v688_v48 }
 0x261   :  { %v780_v50 = vpack.c.bf16 %v689_v49, %v689_v49 }
 0x263   :  { %v785_v51 = vsel %vm407_vm7, %v780_v50, 0 }
 0x264   :  { %794 = vmatpush.bf16.xpose.msrb.mxu0 %v785_v51 }
 0x266   :  { %v690_v45 = vpop.f32.mrf.mxu2 }
 0x267   :  { %v691_v46 = vadd.f32 %v4803_v47, %v690_v45  ;;  %v4362_v45 = vld [vmem:[%s5777_s11] ss:$0 sm:$0xff] }
 0x269   :  { %v834_v49 = vpack.c.bf16 %v691_v46, %v691_v46 }
 0x2b7   :  { %v432_v52 = vpop.xlane.xlu2 %431 }
 0x2b8   :  { %v433_v53 = vsub.f32 %v428_v44, %v432_v52  ;;  %v839_v52 = vsel %vm407_vm7, %v834_v49, 0 }
 0x2ba   :  { %v434_v54 = vmul.f32 1.442695, %v433_v53 }
 0x2bc   :  { %4388 = vpow2.f32 %v434_v54 }
 0x2c2   :  { %v4389_v55 = vpop.eup %4388 }
 0x2c3   :  { %v436_v56 = vsel %vm429_vm10, %v4389_v55, 0.0 }
 0x2c4   :  { %437 = vadd.xlane.f32.xlu2 %v436_v56 }
 0x337   :  { %v438_v57 = vpop.xlane.xlu2 %437 }
 0x338   :  { %4390 = vrcp.f32 %v438_v57 }
 0x33e   :  { %v4391_v58 = vpop.eup %4390 }
 0x33f   :  { %v440_v59 = vmul.f32 %v4391_v58, %v4389_v55  ;;  %v4361_v55 = vld [vmem:[%s5816_s28 + $0x1] ss:$0 sm:$0xff] }
 0x341   :  { %v441_v61 = vpack.c.bf16 %v440_v59, %v440_v59 }
 0x343   :  { %3234 = vmatmul.msk.bf16.vlgmr.msra.gmra.mxu3 %vm429_vm10, %v441_v61 }
 0x344   :  { %763 = vmatpush.bf16.msra.mxu3 %v4208_v60 }
 0x348   :  { %764 = vmatpush.bf16.msra.mxu3 %v4207_v62 }
 0x34c   :  { %765 = vmatpush.bf16.msra.mxu3 %v4206_v63 }
 0x350   :  { %766 = vmatpush.bf16.msra.mxu3 %v4205_v1 }
 0x353   :  { %3235 = vmatmul.msk.bf16.vlgmr.msrb.gmra.mxu3 %vm407_vm7, %v462_v7 }
 0x354   :  { %767 = vmatpush.bf16.msra.mxu3 %v4204_v6 }
 0x358   :  { %768 = vmatpush.bf16.msra.mxu3 %v4203_v9 }
 0x35c   :  { %769 = vmatpush.bf16.msra.mxu3 %v4202_v11 }
 0x360   :  { %770 = vmatpush.bf16.msra.mxu3 %v4201_v10 }
 0x363   :  { %771 = vmatmul.bf16.vlgmr.msra.gmra.mxu3 %v4749_v5 }
 0x3c6   :  { %v4836_v12 = vpop.f32.mrf.mxu3 }
 0x3ce   :  { %v460_v13 = vpop.f32.mrf.mxu3 }
 0x3d6   :  { %v479_v15 = vpop.f32.mrf.mxu3 }
 0x3d7   :  { %v483_v17 = vmul.f32 0.125, %v479_v15 }
 0x3d9   :  { %v484_v18 = vadd.f32 %v483_v17, %v4838_v16 }
 0x3db   :  { %v485_v19 = vsel %vm429_vm10, %v484_v18, -inf }
 0x3dc   :  { %486 = vmax.xlane.f32.xlu0 %v485_v19 }
 0x3de   :  { %v481_v20 = vpop.f32.mrf.mxu3 }
 0x3e6   :  { %v772_v22 = vpop.f32.mrf.mxu3 }
 0x3e7   :  { %v773_v23 = vadd.f32 %v4360_v21, %v772_v22  ;;  %v4184_v22 = vld [vmem:[%s5776_s10 + $0x18] sm:$0xff] }
 0x3e9   :  { %v777_v24 = vpack.c.bf16 %v773_v23, %v773_v23  ;;  %v4183_v23 = vld [vmem:[%s5776_s10 + $0x10] sm:$0xff] }
 0x3eb   :  { %v818_v25 = vsel %vm445_vm8, %v777_v24, 0  ;;  %v4182_v24 = vld [vmem:[%s5776_s10 + $0x8] sm:$0xff] }
 0x3ec   :  { %827 = vmatpush.bf16.msra.mxu0 %v818_v25  ;;  %v4181_v25 = vld [vmem:[%s5776_s10] sm:$0xff] }
 0x3ee   :  { %v774_v26 = vpop.f32.mrf.mxu3 }
 0x3ef   :  { %v775_v27 = vadd.f32 %v4360_v21, %v774_v26 }
 0x3f1   :  { %v778_v28 = vpack.c.bf16 %v775_v27, %v775_v27 }
 0x3f3   :  { %v872_v29 = vsel %vm445_vm8, %v778_v28, 0 }
 0x3f4   :  { %881 = vmatpush.bf16.msrb.mxu2 %v872_v29 }
 0x44f   :  { %v487_v35 = vpop.xlane.xlu0 %486 }
 0x450   :  { %v488_v36 = vsub.f32 %v484_v18, %v487_v35  ;;  %v4212_v35 = vld [vmem:[%s5776_s10 + $0x38] sm:$0xff] }
 0x451   :  { %928 = vmatpush.bf16.msrb.mxu3 %v4212_v35 }
 0x452   :  { %v489_v37 = vmul.f32 1.442695, %v488_v36  ;;  %v4211_v36 = vld [vmem:[%s5776_s10 + $0x30] sm:$0xff] }
 0x454   :  { %4392 = vpow2.f32 %v489_v37  ;;  %v4210_v37 = vld [vmem:[%s5776_s10 + $0x28] sm:$0xff] }
 0x455   :  { %929 = vmatpush.bf16.msrb.mxu3 %v4211_v36  ;;  %v3450_v36 = vld [vmem:[%s5780_s14 + $0x28] sm:$0xf0] }
 0x459   :  { %930 = vmatpush.bf16.msrb.mxu3 %v4210_v37 }
 0x45a   :  { %v4393_v38 = vpop.eup %4392 }
 0x45b   :  { %v491_v39 = vsel %vm429_vm10, %v4393_v38, 0.0 }
 0x45c   :  { %492 = vadd.xlane.f32.xlu1 %v491_v39 }
 0x4cf   :  { %v493_v44 = vpop.xlane.xlu1 %492 }
 0x4d0   :  { %4394 = vrcp.f32 %v493_v44 }
 0x4d6   :  { %v4395_v48 = vpop.eup %4394 }
 0x4d7   :  { %v495_v50 = vmul.f32 %v4395_v48, %v4393_v38 }
 0x4d9   :  { %v496_v51 = vpack.c.bf16 %v495_v50, %v495_v50 }
 0x4db   :  { %3236 = vmatmul.msk.bf16.vlgmr.msrb.gmra.mxu1 %vm429_vm10, %v496_v51 }
 0x4dc   :  { %848 = vmatpush.bf16.xpose.msrb.mxu1 %v839_v52 }
 0x4eb   :  { %603 = vmatmul.bf16.vlgmr.msra.gmra.mxu1 %v4749_v5 }
 0x558   :  { %v512_v53 = vpop.f32.mrf.mxu1 }
 0x559   :  { %v516_v34 = vpack.c.bf16 %v512_v53, %v4836_v12  ;;  %v4209_v12 = vld [vmem:[%s5776_s10 + $0x20] sm:$0xff] }
 0x55a   :  { %931 = vmatpush.bf16.msrb.mxu3 %v4209_v12  ;;  %v3440_v12 = vld [vmem:[%s5780_s14 + $0x10] sm:$0xf] }
 0x560   :  { %v514_v54 = vpop.f32.mrf.mxu1 }
 0x568   :  { %v604_v56 = vpop.f32.mrf.mxu1 }
 0x569   :  { %v605_v57 = vadd.f32 %v4361_v55, %v604_v56 }
 0x56b   :  { %v779_v47 = vpack.c.bf16 %v605_v57, %v605_v57 }
 0x56d   :  { %3384 = vmatmul.msk.bf16.vlgmr.msrb.gmra.mxu0 %vm407_vm7, %v779_v47 }
 0x56e   :  { %969 = vmatpush.bf16.msrb.mxu0 %v4184_v22  ;;  %v4221_v22 = vld [vmem:[%s5780_s14 + $0x44] sm:$0xf] }
 0x570   :  { %v606_v58 = vpop.f32.mrf.mxu1 }
 0x571   :  { %v607_v59 = vadd.f32 %v4361_v55, %v606_v58 }
 0x572   :  { %970 = vmatpush.bf16.msrb.mxu0 %v4183_v23 }
 0x573   :  { %v833_v60 = vpack.c.bf16 %v607_v59, %v607_v59 }
 0x575   :  { %3386 = vmatmul.msk.bf16.vlgmr.msrb.gmra.mxu1 %vm407_vm7, %v833_v60 }
 0x576   :  { %971 = vmatpush.bf16.msrb.mxu0 %v4182_v24  ;;  %v3466_v24 = vld [vmem:[%s5780_s14 + $0x48] sm:$0xf0] }
 0x57a   :  { %972 = vmatpush.bf16.msrb.mxu0 %v4181_v25  ;;  %v3469_v25 = vor.u32 %v4221_v22, %v3466_v24 }
 0x5ea   :  { %v796_v61 = vpop.f32.mrf.mxu0 }
 0x5eb   :  { %v800_v62 = vmul.f32 0.125, %v796_v61 }
 0x5ed   :  { %v801_v5 = vadd.f32 %v800_v62, %v4796_v42  ;;  %v4228_v62 = vld [vmem:[%s5780_s14 + $0x74] sm:$0xf0] }
 0x5ef   :  { %v802_v63 = vsel %vm429_vm10, %v801_v5, -inf }
 0x5f0   :  { %803 = vmax.xlane.f32.xlu0 %v802_v63 }
 0x5f2   :  { %v798_v0 = vpop.f32.mrf.mxu0  ;;  %v850_v1 = vpop.f32.mrf.mxu1 }
 0x5f3   :  { %v854_v2 = vmul.f32 0.125, %v850_v1  ;;  %v3490_v0 = vld [vmem:[%s5780_s14 + $0x78] sm:$0xf0] }
 0x5f5   :  { %v855_v6 = vadd.f32 %v854_v2, %v4838_v16  ;;  %v3480_v2 = vld [vmem:[%s5780_s14 + $0x60] sm:$0xf] }
 0x5f7   :  { %v856_v7 = vsel %vm429_vm10, %v855_v6, -inf }
 0x5f8   :  { %857 = vmax.xlane.f32.xlu2 %v856_v7  ;;  %v4225_v7 = vld [vmem:[%s5780_s14 + $0x64] sm:$0xf] }
 0x5fa   :  { %v852_v9 = vpop.f32.mrf.mxu1 }
 0x663   :  { %v804_v11 = vpop.xlane.xlu0 %803 }
 0x664   :  { %v805_v10 = vsub.f32 %v801_v5, %v804_v11  ;;  %v4227_v5 = vld [vmem:[%s5780_s14 + $0x74] sm:$0xf]  ;;  %v3482_v11 = vld [vmem:[%s5780_s14 + $0x68] sm:$0xf0] }
 0x665   :  { %v3493_v1 = vor.u32 %v4227_v5, %v3490_v0 }
 0x666   :  { %v806_v13 = vmul.f32 1.442695, %v805_v10  ;;  %v3485_v10 = vor.u32 %v4225_v7, %v3482_v11  ;;  %v4363_v7 = vld [vmem:[%s5778_s12] ss:$0 sm:$0xff] }
 0x667   :  { %1156 = vmatpush.bf16.msra.mxu2 %v3493_v1 }
 0x668   :  { %4396 = vpow2.f32 %v806_v13  ;;  %v3472_v13 = vld [vmem:[%s5780_s14 + $0x50] sm:$0xf] }
 0x66b   :  { %v858_v14 = vpop.xlane.xlu2 %857  ;;  %1157 = vmatpush.bf16.msra.mxu2 %v3485_v10 }
 0x66c   :  { %v859_v15 = vsub.f32 %v855_v6, %v858_v14  ;;  %v4226_v6 = vld [vmem:[%s5780_s14 + $0x64] sm:$0xf0]  ;;  %v4224_v14 = vld [vmem:[%s5780_s14 + $0x54] sm:$0xf0] }
 0x66d   :  { %v3481_v9 = vor.u32 %v4226_v6, %v3480_v2 }
 0x66e   :  { %v4397_v17 = vpop.eup %4396  ;;  %v860_v18 = vmul.f32 1.442695, %v859_v15  ;;  %v4223_v15 = vld [vmem:[%s5780_s14 + $0x54] sm:$0xf] }
 0x66f   :  { %v808_v19 = vsel %vm429_vm10, %v4397_v17, 0.0 }
 0x670   :  { %4398 = vpow2.f32 %v860_v18  ;;  %809 = vadd.xlane.f32.xlu2 %v808_v19  ;;  %v3474_v18 = vld [vmem:[%s5780_s14 + $0x58] sm:$0xf0] }
 0x671   :  { %v3477_v19 = vor.u32 %v4223_v15, %v3474_v18 }
 0x673   :  { %1158 = vmatpush.bf16.msra.mxu2 %v3477_v19  ;;  %v1056_v19 = vld [vmem:[%s5781_s15] sm:$0x3] }
 0x676   :  { %v4399_v20 = vpop.eup %4398 }
 0x677   :  { %v862_v21 = vsel %vm429_vm10, %v4399_v20, 0.0  ;;  %1159 = vmatpush.bf16.msra.mxu2 %v3469_v25  ;;  %v4236_v25 = vld [vmem:[%s5782_s16 + $0x38] sm:$0xff] }
 0x678   :  { %863 = vadd.xlane.f32.xlu1 %v862_v21  ;;  %v4222_v21 = vld [vmem:[%s5780_s14 + $0x44] sm:$0xf0]  ;;  %1464 = vmatpush.bf16.msra.mxu3 %v4236_v25 }
 0x6e3   :  { %v810_v26 = vpop.xlane.xlu2 %809 }
 0x6e4   :  { %4400 = vrcp.f32 %v810_v26  ;;  %v3456_v26 = vld [vmem:[%s5780_s14 + $0x30] sm:$0xf] }
 0x6ea   :  { %v4401_v27 = vpop.eup %4400 }
 0x6eb   :  { %v812_v28 = vmul.f32 %v4401_v27, %v4397_v17  ;;  %v864_v29 = vpop.xlane.xlu1 %863  ;;  %v3473_v17 = vor.u32 %v4224_v14, %v3472_v13  ;;  %v4220_v27 = vld [vmem:[%s5780_s14 + $0x34] sm:$0xf0]  ;;  %v4364_v14 = vld [vmem:[%s5779_s13] ss:$0 sm:$0xff] }
 0x6ec   :  { %4402 = vrcp.f32 %v864_v29  ;;  %v3457_v29 = vor.u32 %v4220_v27, %v3456_v26 }
 0x6ed   :  { %v813_v30 = vpack.c.bf16 %v812_v28, %v812_v28  ;;  %v4219_v28 = vld [vmem:[%s5780_s14 + $0x34] sm:$0xf] }
 0x6ef   :  { %3385 = vmatmul.msk.bf16.vlgmr.msra.gmra.mxu0 %vm429_vm10, %v813_v30  ;;  %v3458_v30 = vld [vmem:[%s5780_s14 + $0x38] sm:$0xf0] }
 0x6f2   :  { %v4403_v31 = vpop.eup %4402 }
 0x6f3   :  { %v866_v32 = vmul.f32 %v4403_v31, %v4399_v20  ;;  %v3464_v20 = vld [vmem:[%s5780_s14 + $0x40] sm:$0xf]  ;;  %v3461_v31 = vor.u32 %v4219_v28, %v3458_v30 }
 0x6f4   :  { %v3465_v23 = vor.u32 %v4222_v21, %v3464_v20 }
 0x6f5   :  { %v867_v33 = vpack.c.bf16 %v866_v32, %v866_v32  ;;  %1160 = vmatpush.bf16.msra.mxu2 %v3461_v31  ;;  %v3448_v32 = vld [vmem:[%s5780_s14 + $0x20] sm:$0xf] }
 0x6f7   :  { %3387 = vmatmul.msk.bf16.vlgmr.msrb.gmra.mxu2 %vm429_vm10, %v867_v33  ;;  %v4218_v33 = vld [vmem:[%s5780_s14 + $0x24] sm:$0xf0] }
 0x6f8   :  { %v3449_v35 = vor.u32 %v4218_v33, %v3448_v32  ;;  %v4235_v32 = vld [vmem:[%s5782_s16 + $0x30] sm:$0xff] }
 0x6f9   :  { %1465 = vmatpush.bf16.msra.mxu3 %v4235_v32 }
 0x6ff   :  { %3429 = vmatmul.msk.bf16.vlgmr.msrb.gmra.mxu0 %vm407_vm7, %v516_v34  ;;  %v4217_v34 = vld [vmem:[%s5780_s14 + $0x24] sm:$0xf] }
 0x700   :  { %v3453_v37 = vor.u32 %v4217_v34, %v3450_v36  ;;  %v4244_v34 = vld [vmem:[%s5782_s16 + $0x78] sm:$0xff] }
 0x701   :  { %1478 = vmatpush.bf16.msra.mxu0 %v4244_v34 }
 0x702   :  { %1161 = vmatpush.bf16.msra.mxu2 %v3453_v37  ;;  %v4234_v37 = vld [vmem:[%s5782_s16 + $0x28] sm:$0xff] }
 0x703   :  { %1466 = vmatpush.bf16.msra.mxu3 %v4234_v37 }
 0x76c   :  { %v829_v38 = vpop.f32.mrf.mxu0 }
 0x774   :  { %v831_v39 = vpop.f32.mrf.mxu0 }
 0x775   :  { %v4215_v39 = vld [vmem:[%s5780_s14 + $0x14] sm:$0xf] }
 0x77a   :  { %v883_v40 = vpop.f32.mrf.mxu2 }
 0x77b   :  { %v887_v41 = vpack.c.bf16 %v883_v40, %v829_v38  ;;  %v4216_v38 = vld [vmem:[%s5780_s14 + $0x14] sm:$0xf0] }
 0x77c   :  { %v974_v44 = vpop.f32.mrf.mxu0  ;;  %v3441_v40 = vor.u32 %v4216_v38, %v3440_v12 }
 0x77d   :  { %3412 = vmatmul.msk.bf16.vlgmr.msrb.gmra.mxu3 %vm407_vm7, %v887_v41  ;;  %v3442_v41 = vld [vmem:[%s5780_s14 + $0x18] sm:$0xf0] }
 0x782   :  { %v885_v43 = vpop.f32.mrf.mxu2 }
 0x783   :  { %v3432_v43 = vld [vmem:[%s5780_s14] sm:$0xf] }
 0x784   :  { %v976_v51 = vpop.f32.mrf.mxu0 }
 0x800   :  { %v933_v46 = vpop.f32.mrf.mxu3 }
 0x801   :  { %v975_v48 = vadd.f32 %v974_v44, %v933_v46  ;;  %v4214_v44 = vld [vmem:[%s5780_s14 + $0x4] sm:$0xf0]  ;;  %v3445_v46 = vor.u32 %v4215_v39, %v3442_v41  ;;  %v4243_v41 = vld [vmem:[%s5782_s16 + $0x70] sm:$0xff] }
 0x802   :  { %1479 = vmatpush.bf16.msra.mxu0 %v4243_v41 }
 0x803   :  { %v983_v49 = vadd.f32 %v4362_v45, %v975_v48  ;;  %v4213_v48 = vld [vmem:[%s5780_s14 + $0x4] sm:$0xf]  ;;  %1162 = vmatpush.bf16.msra.mxu2 %v3445_v46 }
 0x805   :  { %v985_v50 = vadd.f32 %v983_v49, %v4743_v3  ;;  %v3434_v49 = vld [vmem:[%s5780_s14 + $0x8] sm:$0xf0] }
 0x807   :  { %989 = vadd.xlane.f32.xlu0 %v985_v50 }
 0x808   :  { %v935_v52 = vpop.f32.mrf.mxu3 }
 0x809   :  { %v977_v53 = vadd.f32 %v976_v51, %v935_v52  ;;  %v3433_v51 = vor.u32 %v4214_v44, %v3432_v43  ;;  %v3437_v52 = vor.u32 %v4213_v48, %v3434_v49  ;;  %v4233_v49 = vld [vmem:[%s5782_s16 + $0x20] sm:$0xff] }
 0x80a   :  { %1467 = vmatpush.bf16.msra.mxu3 %v4233_v49 }
 0x80b   :  { %v984_v54 = vadd.f32 %v4362_v45, %v977_v53  ;;  %1163 = vmatpush.bf16.msra.mxu2 %v3437_v52 }
 0x80d   :  { %v986_v55 = vadd.f32 %v984_v54, %v4745_v4  ;;  %v3488_v4 = vld [vmem:[%s5780_s14 + $0x70] sm:$0xf] }
 0x80e   :  { %v3489_v63 = vor.u32 %v4228_v62, %v3488_v4 }
 0x80f   :  { %991 = vadd.xlane.f32.xlu1 %v986_v55 }
 0x810   :  { %1142 = vmatpush.bf16.msra.mxu1 %v3489_v63 }
 0x814   :  { %1143 = vmatpush.bf16.msra.mxu1 %v3481_v9 }
 0x818   :  { %1144 = vmatpush.bf16.msra.mxu1 %v3473_v17 }
 0x81c   :  { %1145 = vmatpush.bf16.msra.mxu1 %v3465_v23  ;;  %v1059_v23 = vperm.slane %v1056_v19, 1 }
 0x820   :  { %1146 = vmatpush.bf16.msra.mxu1 %v3457_v29 }
 0x824   :  { %1147 = vmatpush.bf16.msra.mxu1 %v3449_v35 }
 0x828   :  { %1148 = vmatpush.bf16.msra.mxu1 %v3441_v40 }
 0x82c   :  { %1149 = vmatpush.bf16.msra.mxu1 %v3433_v51 }
 0x87a   :  { %v990_v56 = vpop.xlane.xlu0 %989 }
 0x87b   :  { %v993_v57 = vmul.f32 %v990_v56, %v4649_v8 }
 0x87d   :  { %v4922_v47 = vsub.f32 %v985_v50, %v993_v57 }
 0x87f   :  { %v997_v58 = vmul.f32 %v4922_v47, %v4922_v47 }
 0x881   :  { %999 = vadd.xlane.f32.xlu2 %v997_v58 }
 0x882   :  { %v992_v59 = vpop.xlane.xlu1 %991 }
 0x883   :  { %v994_v3 = vmul.f32 %v992_v59, %v4649_v8 }
 0x885   :  { %v4927_v60 = vsub.f32 %v986_v55, %v994_v3 }
 0x887   :  { %v998_v61 = vmul.f32 %v4927_v60, %v4927_v60 }
 0x889   :  { %1001 = vadd.xlane.f32.xlu0 %v998_v61 }
 0x8f4   :  { %v1000_v45 = vpop.xlane.xlu2 %999 }
 0x8f5   :  { %v1003_v50 = vmul.f32 %v1000_v45, %v4649_v8 }
 0x8f7   :  { %v1005_v53 = vadd.f32 1e-12, %v1003_v50 }
 0x8f9   :  { %4404 = vrsqrt.f32 %v1005_v53  ;;  %vm1013_vm13 = vweird.f32 %v1005_v53 }
 0x8fc   :  { %v1002_v54 = vpop.xlane.xlu0 %1001 }
 0x8fd   :  { %v1004_v55 = vmul.f32 %v1002_v54, %v4649_v8 }
 0x8ff   :  { %v4405_v56 = vpop.eup %4404  ;;  %v1006_v57 = vadd.f32 1e-12, %v1004_v55  ;;  %v4232_v55 = vld [vmem:[%s5782_s16 + $0x18] sm:$0xff] }
 0x900   :  { %v1008_v58 = vmul.f32 %v4405_v56, %v1005_v53  ;;  %vm1014_vm12 = vweird.f32 %v4405_v56  ;;  %v4242_v53 = vld [vmem:[%s5782_s16 + $0x68] sm:$0xff]  ;;  %1468 = vmatpush.bf16.msra.mxu3 %v4232_v55 }
 0x901   :  { %4406 = vrsqrt.f32 %v1006_v57  ;;  %vm1015_vm14 = vmor %vm1013_vm13, %vm1014_vm12  ;;  %vm1023_vm0 = vweird.f32 %v1006_v57  ;;  %1480 = vmatpush.bf16.msra.mxu0 %v4242_v53  ;;  %v4238_v53 = vld [vmem:[%s5782_s16 + $0x48] sm:$0xff] }
 0x902   :  { %v1009_v59 = vmul.f32 %v4405_v56, %v1008_v58 }
 0x904   :  { %v1010_v3 = vmul.f32 0.5, %v1009_v59 }
 0x906   :  { %v1011_v61 = vsub.f32 1.5, %v1010_v3 }
 0x907   :  { %v4407_v4 = vpop.eup %4406 }
 0x908   :  { %v1012_v62 = vmul.f32 %v4405_v56, %v1011_v61  ;;  %v1018_v5 = vmul.f32 %v4407_v4, %v1006_v57  ;;  %vm1024_vm15 = vweird.f32 %v4407_v4 }
 0x909   :  { %vm1025_vm1 = vmor %vm1023_vm0, %vm1024_vm15 }
 0x90a   :  { %v1019_v63 = vmul.f32 %v4407_v4, %v1018_v5  ;;  %v1016_v0 = vsel %vm1015_vm14, %v4405_v56, %v1012_v62 }
 0x90b   :  { %v1027_v6 = vmul.f32 %v1016_v0, %v4922_v47  ;;  %v4231_v0 = vld [vmem:[%s5782_s16 + $0x10] sm:$0xff] }
 0x90c   :  { %v1020_v1 = vmul.f32 0.5, %v1019_v63  ;;  %1469 = vmatpush.bf16.msra.mxu3 %v4231_v0 }
 0x90d   :  { %v1032_v13 = vmul.f32 %v4363_v7, %v1027_v6 }
 0x90e   :  { %v1021_v2 = vsub.f32 1.5, %v1020_v1 }
 0x90f   :  { %v5037_v17 = vadd.f32 %v4364_v14, %v1032_v13 }
 0x910   :  { %v1022_v9 = vmul.f32 %v4407_v4, %v1021_v2 }
 0x912   :  { %v1026_v11 = vsel %vm1025_vm1, %v4407_v4, %v1022_v9  ;;  %v4241_v4 = vld [vmem:[%s5782_s16 + $0x60] sm:$0xff]  ;;  %v4240_v9 = vld [vmem:[%s5782_s16 + $0x58] sm:$0xff] }
 0x913   :  { %v1028_v10 = vmul.f32 %v1026_v11, %v4927_v60  ;;  %v1058_v60 = vperm.slane %v1056_v19, 0  ;;  %1481 = vmatpush.bf16.msra.mxu0 %v4241_v4  ;;  %v4230_v19 = vld [vmem:[%s5782_s16 + $0x8] sm:$0xff] }
 0x914   :  { %1470 = vmatpush.bf16.msra.mxu3 %v4230_v19 }
 0x915   :  { %v1033_v15 = vmul.f32 %v4363_v7, %v1028_v10 }
 0x917   :  { %v5039_v18 = vadd.f32 %v4364_v14, %v1033_v15  ;;  %1482 = vmatpush.bf16.msra.mxu0 %v4240_v9 }
 0x919   :  { %v1039_v47 = vpack.c.bf16 %v5039_v18, %v5037_v17 }
 0x91b   :  { %1150 = vmatmul.bf16.vlgmr.msra.gmra.mxu1 %v1039_v47  ;;  %1164 = vmatmul.bf16.vlgmr.msra.gmra.mxu2 %v1039_v47 }
 0x998   :  { %v1151_v20 = vpop.f32.mrf.mxu1 }
 0x999   :  { %v5046_v21 = vadd.f32 %v1151_v20, %v1058_v60 }
 0x99b   :  { %v5049_v22 = vmul.f32 0.70710677, %v5046_v21 }
 0x99d   :  { %v1186_v24 = vand.u32 2147483647, %v5049_v22 }
 0x99e   :  { %v1165_v26 = vpop.f32.mrf.mxu2 }
 0x99f   :  { %v1190_v27 = vmul.f32 0.3275911, %v1186_v24  ;;  %v5055_v28 = vadd.f32 %v1165_v26, %v1059_v23  ;;  %v1294_v58 = vsub.f32 0.0, %v1186_v24  ;;  %v4239_v26 = vld [vmem:[%s5782_s16 + $0x50] sm:$0xff] }
 0x9a0   :  { %v1153_v29 = vpop.f32.mrf.mxu1  ;;  %1483 = vmatpush.bf16.msra.mxu0 %v4239_v26 }
 0x9a1   :  { %v1194_v30 = vadd.f32 1.0, %v1190_v27  ;;  %v5058_v31 = vmul.f32 0.70710677, %v5055_v28  ;;  %v5063_v33 = vadd.f32 %v1153_v29, %v1058_v60  ;;  %v1298_v6 = vmul.f32 %v1294_v58, %v1186_v24 }
 0x9a3   :  { %4408 = vrcp.f32 %v1194_v30  ;;  %v5069_v35 = vand.u32 2147483647, %v5058_v31  ;;  %v5072_v36 = vmul.f32 0.70710677, %v5063_v33  ;;  %v1209_v54 = vand.u32 2147483648, %v1194_v30 }
 0x9a4   :  { %v1207_v57 = vand.u32 2147483647, %v1194_v30  ;;  %vm1203_vm3 = vweird.f32 %v1194_v30  ;;  %1484 = vmatpush.bf16.msra.mxu0 %v4238_v53 }
 0x9a5   :  { %v1191_v12 = vmul.f32 0.3275911, %v5069_v35  ;;  %v5079_v39 = vand.u32 2147483647, %v5072_v36  ;;  %v1210_v62 = vor.u32 1.1754944e-38, %v1209_v54  ;;  %v1295_v20 = vsub.f32 0.0, %v5069_v35 }
 0x9a6   :  { %v1167_v38 = vpop.f32.mrf.mxu2  ;;  %vm1208_vm5 = vcmp.eq.f32.partialorder %v1207_v57, 8.507059e+37 }
 0x9a7   :  { %v5081_v40 = vadd.f32 %v1167_v38, %v1059_v23  ;;  %v5086_v43 = vadd.f32 1.0, %v1191_v12  ;;  %v1192_v45 = vmul.f32 0.3275911, %v5079_v39  ;;  %v1302_v23 = vmul.f32 1.442695, %v1298_v6  ;;  %v4229_v38 = vld [vmem:[%s5782_s16] sm:$0xff] }
 0x9a8   :  { %1471 = vmatpush.bf16.msra.mxu3 %v4229_v38 }
 0x9a9   :  { %v4409_v44 = vpop.eup %4408  ;;  %v5090_v46 = vmul.f32 0.70710677, %v5081_v40  ;;  %4410 = vrcp.f32 %v5086_v43  ;;  %v5096_v50 = vadd.f32 1.0, %v1192_v45  ;;  %v1224_v13 = vand.u32 2147483648, %v5086_v43 }
 0x9aa   :  { %v1199_v48 = vmul.f32 %v4409_v44, %v1194_v30  ;;  %vm1204_vm2 = vweird.f32 %v4409_v44  ;;  %v1222_v15 = vand.u32 2147483647, %v5086_v43  ;;  %vm1218_vm9 = vweird.f32 %v5086_v43 }
 0x9ab   :  { %v5099_v52 = vand.u32 2147483647, %v5090_v46  ;;  %4412 = vrcp.f32 %v5096_v50  ;;  %vm1205_vm4 = vmor %vm1203_vm3, %vm1204_vm2  ;;  %v1225_v29 = vor.u32 1.1754944e-38, %v1224_v13  ;;  %v1237_v30 = vand.u32 2147483647, %v5096_v50 }
 0x9ac   :  { %v1200_v51 = vsub.f32 1.0, %v1199_v48  ;;  %v1239_v32 = vand.u32 2147483648, %v5096_v50  ;;  %vm1223_vm12 = vcmp.eq.f32.partialorder %v1222_v15, 8.507059e+37  ;;  %vm1233_vm14 = vweird.f32 %v5096_v50 }
 0x9ad   :  { %v1193_v59 = vmul.f32 0.3275911, %v5099_v52  ;;  %vm1238_vm0 = vcmp.eq.f32.partialorder %v1237_v30, 8.507059e+37 }
 0x9ae   :  { %v1201_v56 = vmul.f32 %v4409_v44, %v1200_v51  ;;  %v1296_v51 = vsub.f32 0.0, %v5079_v39  ;;  %v1240_v55 = vor.u32 1.1754944e-38, %v1239_v32 }
 0x9af   :  { %v4411_v3 = vpop.eup %4410  ;;  %v5113_v63 = vadd.f32 1.0, %v1193_v59 }
 0x9b0   :  { %v1202_v61 = vadd.f32 %v4409_v44, %v1201_v56  ;;  %v1214_v5 = vmul.f32 %v4411_v3, %v5086_v43  ;;  %vm1219_vm6 = vweird.f32 %v4411_v3  ;;  %v1300_v13 = vmul.f32 %v1296_v51, %v5079_v39 }
 0x9b1   :  { %4414 = vrcp.f32 %v5113_v63  ;;  %v4413_v11 = vpop.eup %4412  ;;  %vm1220_vm11 = vmor %vm1218_vm9, %vm1219_vm6  ;;  %v1252_v58 = vand.u32 2147483647, %v5113_v63  ;;  %v1254_v59 = vand.u32 2147483648, %v5113_v63  ;;  %vm1248_vm2 = vweird.f32 %v5113_v63 }
 0x9b2   :  { %v1206_v1 = vsel %vm1205_vm4, %v4409_v44, %v1202_v61  ;;  %v1215_v7 = vsub.f32 1.0, %v1214_v5  ;;  %v1229_v47 = vmul.f32 %v4413_v11, %v5096_v50  ;;  %vm1234_vm13 = vweird.f32 %v4413_v11  ;;  %v4237_v5 = vld [vmem:[%s5782_s16 + $0x40] sm:$0xff] }
 0x9b3   :  { %v5118_v2 = vsel %vm1208_vm5, %v1210_v62, %v1206_v1  ;;  %v1299_v44 = vmul.f32 %v1295_v20, %v5069_v35  ;;  %vm1235_vm15 = vmor %vm1233_vm14, %vm1234_vm13  ;;  %4416 = vpow2.f32 %v1302_v23  ;;  %vm1253_vm4 = vcmp.eq.f32.partialorder %v1252_v58, 8.507059e+37  ;;  %1485 = vmatpush.bf16.msra.mxu0 %v4237_v5 }
 0x9b4   :  { %v1258_v10 = vmul.f32 1.0614054, %v5118_v2  ;;  %v1216_v14 = vmul.f32 %v4411_v3, %v1215_v7  ;;  %v1230_v25 = vsub.f32 1.0, %v1229_v47  ;;  %vm1178_vm5 = vcmp.ge.f32.partialorder %v5049_v22, 0.0 }
 0x9b5   :  { %v1304_v1 = vmul.f32 1.442695, %v1299_v44  ;;  %vm1180_vm6 = vcmp.ge.f32.partialorder %v5072_v36, 0.0  ;;  %vm1179_vm9 = vcmp.ge.f32.partialorder %v5058_v31, 0.0  ;;  %v1170_v36 = vmul.f32 0.5, %v5046_v21 }
 0x9b6   :  { %v1262_v60 = vadd.f32 -1.4531521, %v1258_v10  ;;  %v1217_v24 = vadd.f32 %v4411_v3, %v1216_v14  ;;  %v1231_v12 = vmul.f32 %v4413_v11, %v1230_v25  ;;  %v1306_v25 = vmul.f32 1.442695, %v1300_v13 }
 0x9b7   :  { %v4415_v34 = vpop.eup %4414  ;;  %4418 = vpow2.f32 %v1304_v1 }
 0x9b8   :  { %v1266_v27 = vmul.f32 %v1262_v60, %v5118_v2  ;;  %v1221_v37 = vsel %vm1220_vm11, %v4411_v3, %v1217_v24  ;;  %v1244_v45 = vmul.f32 %v4415_v34, %v5113_v63  ;;  %v1232_v49 = vadd.f32 %v4413_v11, %v1231_v12 }
 0x9b9   :  { %v1226_v43 = vsel %vm1223_vm12, %v1225_v29, %v1221_v37  ;;  %vm1249_vm1 = vweird.f32 %v4415_v34  ;;  %v1297_v60 = vsub.f32 0.0, %v5099_v52  ;;  %4420 = vpow2.f32 %v1306_v25 }
 0x9ba   :  { %v1270_v41 = vadd.f32 1.4214138, %v1266_v27  ;;  %v1259_v48 = vmul.f32 1.0614054, %v1226_v43  ;;  %v1245_v56 = vsub.f32 1.0, %v1244_v45  ;;  %v1236_v57 = vsel %vm1235_vm15, %v4413_v11, %v1232_v49  ;;  %vm1250_vm3 = vmor %vm1248_vm2, %vm1249_vm1  ;;  %v4417_v27 = vpop.eup %4416 }
 0x9bb   :  { %v1241_v3 = vsel %vm1238_vm0, %v1240_v55, %v1236_v57  ;;  %v1255_v11 = vor.u32 1.1754944e-38, %v1254_v59  ;;  %v1301_v39 = vmul.f32 %v1297_v60, %v5099_v52  ;;  %vm1181_vm11 = vcmp.ge.f32.partialorder %v5090_v46, 0.0 }
 0x9bc   :  { %v1274_v54 = vmul.f32 %v1270_v41, %v5118_v2  ;;  %v1263_v35 = vadd.f32 -1.4531521, %v1259_v48  ;;  %v1246_v61 = vmul.f32 %v4415_v34, %v1245_v56  ;;  %v1260_v62 = vmul.f32 1.0614054, %v1241_v3 }
 0x9bd   :  { %v1308_v45 = vmul.f32 1.442695, %v1301_v39  ;;  %v4419_v48 = vpop.eup %4418  ;;  %v4513_v56 = vmov -1.0   ;;  %v1173_v60 = vmul.f32 0.5, %v5081_v40 }
 0x9be   :  { %v1278_v50 = vadd.f32 -0.28449672, %v1274_v54  ;;  %v1267_v4 = vmul.f32 %v1263_v35, %v1226_v43  ;;  %v1247_v6 = vadd.f32 %v4415_v34, %v1246_v61  ;;  %v1264_v9 = vadd.f32 -1.4531521, %v1260_v62 }
 0x9bf   :  { %4422 = vpow2.f32 %v1308_v45  ;;  %v4421_v52 = vpop.eup %4420  ;;  %v1182_v35 = vsel %vm1178_vm5, 1.0, %v4513_v56  ;;  %v1184_v61 = vsel %vm1180_vm6, 1.0, %v4513_v56  ;;  %v1183_v5 = vsel %vm1179_vm9, 1.0, %v4513_v56 }
 0x9c0   :  { %v1282_v0 = vmul.f32 %v1278_v50, %v5118_v2  ;;  %v1271_v7 = vadd.f32 1.4214138, %v1267_v4  ;;  %v1251_v14 = vsel %vm1250_vm3, %v4415_v34, %v1247_v6  ;;  %v1268_v47 = vmul.f32 %v1264_v9, %v1241_v3 }
 0x9c1   :  { %v1256_v19 = vsel %vm1253_vm4, %v1255_v11, %v1251_v14  ;;  %v1185_v13 = vsel %vm1181_vm11, 1.0, %v4513_v56 }
 0x9c2   :  { %v1286_v10 = vadd.f32 0.2548296, %v1282_v0  ;;  %v1275_v15 = vmul.f32 %v1271_v7, %v1226_v43  ;;  %v1261_v20 = vmul.f32 1.0614054, %v1256_v19  ;;  %v1272_v23 = vadd.f32 1.4214138, %v1268_v47 }
 0x9c3   :  { %v1172_v7 = vmul.f32 0.5, %v5063_v33  ;;  %v4365_v33 = vld [vmem:[%s5783_s17] ss:$0 sm:$0xff] }
 0x9c4   :  { %v1290_v24 = vmul.f32 %v1286_v10, %v5118_v2  ;;  %v1279_v63 = vadd.f32 -0.28449672, %v1275_v15  ;;  %v1265_v26 = vadd.f32 -1.4531521, %v1261_v20  ;;  %v1276_v30 = vmul.f32 %v1272_v23, %v1241_v3 }
 0x9c5   :  { %v4423_v62 = vpop.eup %4422 }
 0x9c6   :  { %v1283_v29 = vmul.f32 %v1279_v63, %v1226_v43  ;;  %v1269_v32 = vmul.f32 %v1265_v26, %v1256_v19  ;;  %v1310_v34 = vmul.f32 %v4417_v27, %v1290_v24  ;;  %v1280_v12 = vadd.f32 -0.28449672, %v1276_v30 }
 0x9c8   :  { %v1287_v37 = vadd.f32 0.2548296, %v1283_v29  ;;  %v1273_v38 = vadd.f32 1.4214138, %v1269_v32  ;;  %v1284_v44 = vmul.f32 %v1280_v12, %v1241_v3  ;;  %v1314_v49 = vsub.f32 1.0, %v1310_v34  ;;  %v4268_v32 = vld [vmem:[%s5812_s26 + $0xb8] sm:$0xff] }
 0x9c9   :  { %1785 = vmatpush.bf16.msrb.mxu3 %v4268_v32  ;;  %v4267_v34 = vld [vmem:[%s5812_s26 + $0xb0] sm:$0xff] }
 0x9ca   :  { %v1291_v41 = vmul.f32 %v1287_v37, %v1226_v43  ;;  %v1277_v2 = vmul.f32 %v1273_v38, %v1256_v19  ;;  %v1288_v51 = vadd.f32 0.2548296, %v1284_v44  ;;  %v1318_v58 = vmul.f32 %v1314_v49, %v1182_v35  ;;  %v4252_v49 = vld [vmem:[%s5810_s3 + $0xb8] sm:$0xff]  ;;  %v4250_v35 = vld [vmem:[%s5810_s3 + $0xa8] sm:$0xff] }
 0x9cb   :  { %1617 = vmatpush.bf16.msrb.mxu1 %v4252_v49 }
 0x9cc   :  { %v1311_v53 = vmul.f32 %v4419_v48, %v1291_v41  ;;  %v1281_v54 = vadd.f32 -0.28449672, %v1277_v2  ;;  %v1292_v55 = vmul.f32 %v1288_v51, %v1241_v3  ;;  %v1322_v3 = vadd.f32 1.0, %v1318_v58  ;;  %v4266_v2 = vld [vmem:[%s5812_s26 + $0xa8] sm:$0xff]  ;;  %v4265_v48 = vld [vmem:[%s5812_s26 + $0xa0] sm:$0xff]  ;;  %v4260_v51 = vld [vmem:[%s5811_s4 + $0xb8] sm:$0xff] }
 0x9cd   :  { %1786 = vmatpush.bf16.msrb.mxu3 %v4267_v34  ;;  %1701 = vmatpush.bf16.msrb.mxu2 %v4260_v51  ;;  %v4262_v58 = vld [vmem:[%s5812_s26 + $0x88] sm:$0xff] }
 0x9ce   :  { %v1285_v57 = vmul.f32 %v1281_v54, %v1256_v19  ;;  %v1312_v43 = vmul.f32 %v4421_v52, %v1292_v55  ;;  %v1315_v59 = vsub.f32 1.0, %v1311_v53  ;;  %v1326_v11 = vmul.f32 %v1322_v3, %v1170_v36  ;;  %v4264_v53 = vld [vmem:[%s5812_s26 + $0x98] sm:$0xff]  ;;  %v4251_v54 = vld [vmem:[%s5810_s3 + $0xb0] sm:$0xff] }
 0x9cf   :  { %v4259_v55 = vld [vmem:[%s5811_s4 + $0xb0] sm:$0xff]  ;;  %1618 = vmatpush.bf16.msrb.mxu1 %v4251_v54 }
 0x9d0   :  { %v1289_v50 = vadd.f32 0.2548296, %v1285_v57  ;;  %v1316_v22 = vsub.f32 1.0, %v1312_v43  ;;  %v1319_v1 = vmul.f32 %v1315_v59, %v1183_v5  ;;  %v4263_v52 = vld [vmem:[%s5812_s26 + $0x90] sm:$0xff]  ;;  %v4258_v57 = vld [vmem:[%s5811_s4 + $0xa8] sm:$0xff]  ;;  %v4249_v43 = vld [vmem:[%s5810_s3 + $0xa0] sm:$0xff] }
 0x9d1   :  { %1787 = vmatpush.bf16.msrb.mxu3 %v4266_v2  ;;  %1702 = vmatpush.bf16.msrb.mxu2 %v4259_v55  ;;  %v4257_v59 = vld [vmem:[%s5811_s4 + $0xa0] sm:$0xff]  ;;  %v4255_v3 = vld [vmem:[%s5811_s4 + $0x90] sm:$0xff] }
 0x9d2   :  { %v1293_v4 = vmul.f32 %v1289_v50, %v1256_v19  ;;  %v1320_v0 = vmul.f32 %v1316_v22, %v1184_v61  ;;  %v1323_v14 = vadd.f32 1.0, %v1319_v1  ;;  %v1171_v19 = vmul.f32 0.5, %v5055_v28  ;;  %v4261_v50 = vld [vmem:[%s5812_s26 + $0x80] sm:$0xff]  ;;  %v4248_v22 = vld [vmem:[%s5810_s3 + $0x98] sm:$0xff]  ;;  %v4279_v5 = vld [vmem:[%s5810_s3 + $0xf0] sm:$0xff] }
 0x9d3   :  { %1619 = vmatpush.bf16.msrb.mxu1 %v4250_v35  ;;  %v4256_v61 = vld [vmem:[%s5811_s4 + $0x98] sm:$0xff]  ;;  %v4254_v1 = vld [vmem:[%s5811_s4 + $0x88] sm:$0xff]  ;;  %v4368_v55 = vld [vmem:[%s5816_s28 + $0x2] ss:$0 sm:$0xff] }
 0x9d4   :  { %v1313_v6 = vmul.f32 %v4423_v62, %v1293_v4  ;;  %v1324_v31 = vadd.f32 1.0, %v1320_v0  ;;  %v1327_v46 = vmul.f32 %v1323_v14, %v1171_v19  ;;  %v4280_v4 = vld [vmem:[%s5810_s3 + $0xf8] sm:$0xff]  ;;  %v4247_v62 = vld [vmem:[%s5810_s3 + $0x90] sm:$0xff]  ;;  %v4246_v0 = vld [vmem:[%s5810_s3 + $0x88] sm:$0xff] }
 0x9d5   :  { %1788 = vmatpush.bf16.msrb.mxu3 %v4265_v48  ;;  %1703 = vmatpush.bf16.msrb.mxu2 %v4258_v57 }
 0x9d6   :  { %v1317_v9 = vsub.f32 1.0, %v1313_v6  ;;  %v1328_v10 = vmul.f32 %v1324_v31, %v1172_v7  ;;  %v4278_v6 = vld [vmem:[%s5810_s3 + $0xe8] sm:$0xff] }
 0x9d7   :  { %1620 = vmatpush.bf16.msrb.mxu1 %v4249_v43 }
 0x9d8   :  { %v1321_v15 = vmul.f32 %v1317_v9, %v1185_v13  ;;  %v1330_v47 = vpack.c.bf16 %v1328_v10, %v1326_v11  ;;  %v4245_v9 = vld [vmem:[%s5810_s3 + $0x80] sm:$0xff]  ;;  %v4276_v13 = vld [vmem:[%s5810_s3 + $0xd8] sm:$0xff] }
 0x9d9   :  { %1789 = vmatpush.bf16.msrb.mxu3 %v4264_v53  ;;  %1704 = vmatpush.bf16.msrb.mxu2 %v4257_v59  ;;  %v4253_v11 = vld [vmem:[%s5811_s4 + $0x80] sm:$0xff] }
 0x9da   :  { %v1325_v20 = vadd.f32 1.0, %v1321_v15  ;;  %1472 = vmatmul.bf16.vlgmr.msra.gmra.mxu3 %v1330_v47  ;;  %v4277_v10 = vld [vmem:[%s5810_s3 + $0xe0] sm:$0xff]  ;;  %v4275_v47 = vld [vmem:[%s5810_s3 + $0xd0] sm:$0xff] }
 0x9db   :  { %1621 = vmatpush.bf16.msrb.mxu1 %v4248_v22 }
 0x9dc   :  { %v1329_v24 = vmul.f32 %v1325_v20, %v1173_v60 }
 0x9dd   :  { %1790 = vmatpush.bf16.msrb.mxu3 %v4263_v52  ;;  %1705 = vmatpush.bf16.msrb.mxu2 %v4256_v61 }
 0x9de   :  { %v1331_v21 = vpack.c.bf16 %v1329_v24, %v1327_v46  ;;  %v4274_v24 = vld [vmem:[%s5810_s3 + $0xc8] sm:$0xff] }
 0x9df   :  { %1622 = vmatpush.bf16.msrb.mxu1 %v4247_v62 }
 0x9e0   :  { %1486 = vmatmul.bf16.vlgmr.msra.gmra.mxu0 %v1331_v21 }
 0x9e1   :  { %1791 = vmatpush.bf16.msrb.mxu3 %v4262_v58  ;;  %1706 = vmatpush.bf16.msrb.mxu2 %v4255_v3  ;;  %v4296_v3 = vld [vmem:[%s5812_s26 + $0xf8] sm:$0xff] }
 0x9e3   :  { %1623 = vmatpush.bf16.msrb.mxu1 %v4246_v0 }
 0x9e5   :  { %1792 = vmatpush.bf16.msrb.mxu3 %v4261_v50  ;;  %1707 = vmatpush.bf16.msrb.mxu2 %v4254_v1 }
 0x9e7   :  { %1624 = vmatpush.bf16.msrb.mxu1 %v4245_v9  ;;  %v4294_v9 = vld [vmem:[%s5812_s26 + $0xe8] sm:$0xff] }
 0x9e9   :  { %1989 = vmatpush.bf16.msra.mxu3 %v4280_v4  ;;  %1708 = vmatpush.bf16.msrb.mxu2 %v4253_v11  ;;  %v4293_v11 = vld [vmem:[%s5812_s26 + $0xe0] sm:$0xff] }
 0x9ed   :  { %1990 = vmatpush.bf16.msra.mxu3 %v4279_v5 }
 0x9f1   :  { %1991 = vmatpush.bf16.msra.mxu3 %v4278_v6 }
 0x9f5   :  { %1992 = vmatpush.bf16.msra.mxu3 %v4277_v10  ;;  %v4292_v10 = vld [vmem:[%s5812_s26 + $0xd8] sm:$0xff] }
 0x9f9   :  { %1993 = vmatpush.bf16.msra.mxu3 %v4276_v13  ;;  %v4291_v13 = vld [vmem:[%s5812_s26 + $0xd0] sm:$0xff] }
 0x9fd   :  { %1994 = vmatpush.bf16.msra.mxu3 %v4275_v47 }
 0xa01   :  { %1995 = vmatpush.bf16.msra.mxu3 %v4274_v24 }
 0xa5d   :  { %v1473_v63 = vpop.f32.mrf.mxu3  ;;  %v1487_v23 = vpop.f32.mrf.mxu0 }
 0xa5e   :  { %v1474_v25 = vadd.f32 %v4365_v33, %v1473_v63  ;;  %v4273_v63 = vld [vmem:[%s5810_s3 + $0xc0] sm:$0xff] }
 0xa5f   :  { %1996 = vmatpush.bf16.msra.mxu3 %v4273_v63 }
 0xa60   :  { %v1488_v26 = vadd.f32 %v1487_v23, %v1474_v25 }
 0xa62   :  { %v1492_v27 = vadd.f32 %v1488_v26, %v5037_v17 }
 0xa64   :  { %1496 = vadd.xlane.f32.xlu1 %v1492_v27 }
 0xa65   :  { %v1475_v28 = vpop.f32.mrf.mxu3  ;;  %v1489_v40 = vpop.f32.mrf.mxu0 }
 0xa66   :  { %v1476_v29 = vadd.f32 %v4365_v33, %v1475_v28 }
 0xa68   :  { %v1490_v30 = vadd.f32 %v1489_v40, %v1476_v29 }
 0xa6a   :  { %v1493_v39 = vadd.f32 %v1490_v30, %v5039_v18  ;;  %v4366_v30 = vld [vmem:[%s5817_s7] ss:$0 sm:$0xff] }
 0xa6c   :  { %1498 = vadd.xlane.f32.xlu2 %v1493_v39 }
 0xad7   :  { %v1497_v37 = vpop.xlane.xlu1 %1496 }
 0xad8   :  { %v1500_v17 = vmul.f32 %v1497_v37, %v4649_v8  ;;  %v4367_v37 = vld [vmem:[%s5785_s19] ss:$0 sm:$0xff] }
 0xada   :  { %v5185_v12 = vsub.f32 %v1492_v27, %v1500_v17 }
 0xadc   :  { %v1504_v38 = vmul.f32 %v5185_v12, %v5185_v12 }
 0xade   :  { %1506 = vadd.xlane.f32.xlu0 %v1504_v38 }
 0xadf   :  { %v1499_v18 = vpop.xlane.xlu2 %1498 }
 0xae0   :  { %v1501_v41 = vmul.f32 %v1499_v18, %v4649_v8 }
 0xae2   :  { %v5190_v44 = vsub.f32 %v1493_v39, %v1501_v41 }
 0xae4   :  { %v1505_v45 = vmul.f32 %v5190_v44, %v5190_v44 }
 0xae6   :  { %1508 = vadd.xlane.f32.xlu1 %v1505_v45 }
 0xb51   :  { %v1507_v36 = vpop.xlane.xlu0 %1506 }
 0xb52   :  { %v1510_v7 = vmul.f32 %v1507_v36, %v4649_v8 }
 0xb54   :  { %v1512_v31 = vadd.f32 1e-12, %v1510_v7  ;;  %v4295_v7 = vld [vmem:[%s5812_s26 + $0xf0] sm:$0xff] }
 0xb56   :  { %4424 = vrsqrt.f32 %v1512_v31  ;;  %vm1520_vm13 = vweird.f32 %v1512_v31 }
 0xb59   :  { %v1509_v14 = vpop.xlane.xlu1 %1508 }
 0xb5a   :  { %v1511_v15 = vmul.f32 %v1509_v14, %v4649_v8  ;;  %v4290_v14 = vld [vmem:[%s5812_s26 + $0xc8] sm:$0xff] }
 0xb5c   :  { %v4425_v19 = vpop.eup %4424  ;;  %v1513_v60 = vadd.f32 1e-12, %v1511_v15  ;;  %v4289_v15 = vld [vmem:[%s5812_s26 + $0xc0] sm:$0xff] }
 0xb5d   :  { %v1515_v20 = vmul.f32 %v4425_v19, %v1512_v31  ;;  %vm1521_vm12 = vweird.f32 %v4425_v19 }
 0xb5e   :  { %4426 = vrsqrt.f32 %v1513_v60  ;;  %vm1522_vm14 = vmor %vm1520_vm13, %vm1521_vm12  ;;  %vm1530_vm0 = vweird.f32 %v1513_v60 }
 0xb5f   :  { %v1516_v46 = vmul.f32 %v4425_v19, %v1515_v20 }
 0xb61   :  { %v1517_v21 = vmul.f32 0.5, %v1516_v46 }
 0xb63   :  { %v1518_v33 = vsub.f32 1.5, %v1517_v21 }
 0xb64   :  { %v4427_v23 = vpop.eup %4426 }
 0xb65   :  { %v1519_v25 = vmul.f32 %v4425_v19, %v1518_v33  ;;  %v1525_v26 = vmul.f32 %v4427_v23, %v1513_v60  ;;  %vm1531_vm15 = vweird.f32 %v4427_v23 }
 0xb66   :  { %vm1532_vm1 = vmor %vm1530_vm0, %vm1531_vm15 }
 0xb67   :  { %v1526_v27 = vmul.f32 %v4427_v23, %v1525_v26  ;;  %v1523_v28 = vsel %vm1522_vm14, %v4425_v19, %v1519_v25  ;;  %v4372_v25 = vld [vmem:[%s5775_s9 + $0x3] ss:$0 sm:$0xff] }
 0xb68   :  { %v1534_v39 = vmul.f32 %v1523_v28, %v5185_v12  ;;  %v4369_v12 = vld [vmem:[%s5815_s1 + $0x2] ss:$0 sm:$0xff]  ;;  %v4288_v28 = vld [vmem:[%s5811_s4 + $0xf8] sm:$0xff] }
 0xb69   :  { %v1527_v29 = vmul.f32 0.5, %v1526_v27 }
 0xb6a   :  { %v1539_v17 = vmul.f32 %v4366_v30, %v1534_v39 }
 0xb6b   :  { %v1528_v40 = vsub.f32 1.5, %v1527_v29  ;;  %v4287_v29 = vld [vmem:[%s5811_s4 + $0xf0] sm:$0xff] }
 0xb6c   :  { %v5294_v41 = vadd.f32 %v4367_v37, %v1539_v17 }
 0xb6d   :  { %v1529_v32 = vmul.f32 %v4427_v23, %v1528_v40  ;;  %v4286_v40 = vld [vmem:[%s5811_s4 + $0xe8] sm:$0xff] }
 0xb6f   :  { %v1533_v34 = vsel %vm1532_vm1, %v4427_v23, %v1529_v32 }
 0xb70   :  { %v1535_v38 = vmul.f32 %v1533_v34, %v5190_v44  ;;  %v4370_v44 = vld [vmem:[%s5775_s9 + $0x2] ss:$0 sm:$0xff] }
 0xb72   :  { %v1540_v18 = vmul.f32 %v4366_v30, %v1535_v38  ;;  %v4285_v30 = vld [vmem:[%s5811_s4 + $0xe0] sm:$0xff] }
 0xb74   :  { %v5296_v45 = vadd.f32 %v4367_v37, %v1540_v18  ;;  %v4284_v37 = vld [vmem:[%s5811_s4 + $0xd8] sm:$0xff] }
 0xb76   :  { %v5300_v2 = vpack.c.bf16 %v5296_v45, %v5294_v41 }
 0xb78   :  { %1625 = vmatmul.bf16.vlgmr.msrb.gmra.mxu1 %v5300_v2  ;;  %1709 = vmatmul.bf16.vlgmr.msrb.gmra.mxu2 %v5300_v2 }
 0xb79   :  { %1793 = vmatmul.bf16.vlgmr.msrb.gmra.mxu3 %v5300_v2 }
 0xb89   :  { %1997 = vmatmul.bf16.vlgmr.msra.gmra.mxu3 %v5300_v2 }
 0xbf5   :  { %v1626_v53 = vpop.f32.mrf.mxu1 }
 0xbf6   :  { %v1627_v43 = vadd.f32 %v4368_v55, %v1626_v53  ;;  %v4282_v53 = vld [vmem:[%s5811_s4 + $0xc8] sm:$0xff] }
 0xbf8   :  { %v1801_v4 = vpack.c.bf16 %v1627_v43, %v1627_v43 }
 0xbfb   :  { %v1710_v48 = vpop.f32.mrf.mxu2 }
 0xbfc   :  { %v1711_v49 = vadd.f32 %v4369_v12, %v1710_v48  ;;  %v1794_v51 = vpop.f32.mrf.mxu3 }
 0xbfd   :  { %v1795_v54 = vadd.f32 %v4370_v44, %v1794_v51  ;;  %v1628_v5 = vpop.f32.mrf.mxu1  ;;  %v4283_v51 = vld [vmem:[%s5811_s4 + $0xd0] sm:$0xff] }
 0xbfe   :  { %v1802_v52 = vpack.c.bf16 %v1711_v49, %v1711_v49  ;;  %v1629_v36 = vadd.f32 %v4368_v55, %v1628_v5 }
 0xbff   :  { %v1799_v35 = vpack.c.bf16 %v1795_v54, %v1795_v54  ;;  %v4281_v54 = vld [vmem:[%s5811_s4 + $0xc0] sm:$0xff] }
 0xc00   :  { %v1807_v57 = vsel %vm407_vm7, %v1802_v52, 0  ;;  %v1855_v31 = vpack.c.bf16 %v1629_v36, %v1629_v36 }
 0xc01   :  { %v1840_v58 = vsel %vm445_vm8, %v1799_v35, 0  ;;  %1816 = vmatpush.bf16.xpose.msrb.mxu0 %v1807_v57 }
 0xc03   :  { %v1712_v59 = vpop.f32.mrf.mxu2 }
 0xc04   :  { %v1713_v50 = vadd.f32 %v4369_v12, %v1712_v59  ;;  %v1796_v22 = vpop.f32.mrf.mxu3 }
 0xc05   :  { %v1797_v61 = vadd.f32 %v4370_v44, %v1796_v22 }
 0xc06   :  { %v1856_v62 = vpack.c.bf16 %v1713_v50, %v1713_v50 }
 0xc07   :  { %v1800_v0 = vpack.c.bf16 %v1797_v61, %v1797_v61 }
 0xc08   :  { %v1861_v1 = vsel %vm407_vm7, %v1856_v62, 0  ;;  %3705 = vmatmul.msk.bf16.vlgmr.msrb.gmra.mxu0 %vm407_vm7, %v1801_v4 }
 0xc09   :  { %1849 = vmatpush.bf16.msra.mxu0 %v1840_v58  ;;  %v1894_v6 = vsel %vm445_vm8, %v1800_v0, 0  ;;  %1870 = vmatpush.bf16.xpose.msra.mxu1 %v1861_v1  ;;  %v4373_v0 = vld [vmem:[%s5815_s1 + $0x3] ss:$0 sm:$0xff]  ;;  %s3127_s1 = sshll.u32 %s5790_s24, 4  ;;  %s3128_s1 = int_to_ptr.hbm [resolvable:$true] %s3127_s1 }
 0xc0a   :  { %1903 = vmatpush.bf16.msra.mxu2 %v1894_v6 }
 0xc0d   :  { %2073 = vmatpush.bf16.msrb.mxu0 %v4288_v28 }
 0xc10   :  { %3707 = vmatmul.msk.bf16.vlgmr.msra.gmra.mxu1 %vm407_vm7, %v1855_v31  ;;  %v1998_v31 = vpop.f32.mrf.mxu3 }
 0xc11   :  { %2157 = vmatpush.bf16.msrb.mxu1 %v4296_v3  ;;  %2074 = vmatpush.bf16.msrb.mxu0 %v4287_v29 }
 0xc15   :  { %2158 = vmatpush.bf16.msrb.mxu1 %v4295_v7  ;;  %2075 = vmatpush.bf16.msrb.mxu0 %v4286_v40 }
 0xc19   :  { %2159 = vmatpush.bf16.msrb.mxu1 %v4294_v9  ;;  %2076 = vmatpush.bf16.msrb.mxu0 %v4285_v30 }
 0xc1d   :  { %2160 = vmatpush.bf16.msrb.mxu1 %v4293_v11  ;;  %2077 = vmatpush.bf16.msrb.mxu0 %v4284_v37 }
 0xc21   :  { %2161 = vmatpush.bf16.msrb.mxu1 %v4292_v10  ;;  %2078 = vmatpush.bf16.msrb.mxu0 %v4283_v51  ;;  %v4270_v51 = vld [vmem:[%s5776_s10 + $0x48] sm:$0xff] }
 0xc25   :  { %2162 = vmatpush.bf16.msrb.mxu1 %v4291_v13  ;;  %2079 = vmatpush.bf16.msrb.mxu0 %v4282_v53  ;;  %v4269_v53 = vld [vmem:[%s5776_s10 + $0x40] sm:$0xff] }
 0xc29   :  { %2163 = vmatpush.bf16.msrb.mxu1 %v4290_v14  ;;  %2080 = vmatpush.bf16.msrb.mxu0 %v4281_v54  ;;  %v4300_v54 = vld [vmem:[%s5776_s10 + $0x78] sm:$0xff] }
 0xc2d   :  { %2164 = vmatpush.bf16.msrb.mxu1 %v4289_v15 }
 0xc30   :  { %2165 = vmatmul.bf16.vlgmr.msrb.gmra.mxu1 %v5300_v2 }
 0xc31   :  { %2322 = vmatpush.bf16.msra.mxu1 %v4300_v54  ;;  %v4307_v54 = vld [vmem:[%s5780_s14 + $0xb4] sm:$0xf] }
 0xc85   :  { %v1818_v47 = vpop.f32.mrf.mxu0 }
 0xc86   :  { %v1822_v19 = vmul.f32 0.125, %v1818_v47 }
 0xc88   :  { %v1823_v60 = vadd.f32 %v1822_v19, %v4796_v42 }
 0xc8a   :  { %v1824_v20 = vsel %vm429_vm10, %v1823_v60, -inf }
 0xc8b   :  { %1825 = vmax.xlane.f32.xlu2 %v1824_v20 }
 0xc8d   :  { %v1820_v46 = vpop.f32.mrf.mxu0  ;;  %v1872_v24 = vpop.f32.mrf.mxu1 }
 0xc8e   :  { %v1876_v21 = vmul.f32 0.125, %v1872_v24  ;;  %v2000_v46 = vpop.f32.mrf.mxu3 }
 0xc90   :  { %v1877_v33 = vadd.f32 %v1876_v21, %v4838_v16 }
 0xc92   :  { %v1878_v63 = vsel %vm429_vm10, %v1877_v33, -inf }
 0xc93   :  { %1879 = vmax.xlane.f32.xlu1 %v1878_v63 }
 0xc95   :  { %v1874_v23 = vpop.f32.mrf.mxu1 }
 0xcad   :  { %v2166_v26 = vpop.f32.mrf.mxu1 }
 0xcae   :  { %v2167_v27 = vadd.f32 %v4372_v25, %v2166_v26 }
 0xcb0   :  { %v2171_v9 = vpack.c.bf16 %v2167_v27, %v2167_v27 }
 0xcb2   :  { %v2212_v13 = vsel %vm445_vm8, %v2171_v9, 0  ;;  %v4374_v9 = vld [vmem:[%s5777_s11 + $0x1] ss:$0 sm:$0xff] }
 0xcb5   :  { %v2168_v52 = vpop.f32.mrf.mxu1 }
 0xcb6   :  { %v2169_v35 = vadd.f32 %v4372_v25, %v2168_v52 }
 0xcb8   :  { %v2172_v58 = vpack.c.bf16 %v2169_v35, %v2169_v35  ;;  %v4298_v35 = vld [vmem:[%s5776_s10 + $0x68] sm:$0xff] }
 0xcba   :  { %v2266_v22 = vsel %vm445_vm8, %v2172_v58, 0 }
 0xcfe   :  { %v1826_v39 = vpop.xlane.xlu2 %1825 }
 0xcff   :  { %v1827_v32 = vsub.f32 %v1823_v60, %v1826_v39 }
 0xd01   :  { %v1828_v34 = vmul.f32 1.442695, %v1827_v32 }
 0xd03   :  { %4428 = vpow2.f32 %v1828_v34 }
 0xd06   :  { %v1880_v17 = vpop.xlane.xlu1 %1879 }
 0xd07   :  { %v1881_v38 = vsub.f32 %v1877_v33, %v1880_v17 }
 0xd09   :  { %v4429_v18 = vpop.eup %4428  ;;  %v1882_v12 = vmul.f32 1.442695, %v1881_v38 }
 0xd0a   :  { %v1830_v44 = vsel %vm429_vm10, %v4429_v18, 0.0 }
 0xd0b   :  { %4430 = vpow2.f32 %v1882_v12  ;;  %1831 = vadd.xlane.f32.xlu0 %v1830_v44 }
 0xd11   :  { %v4431_v48 = vpop.eup %4430 }
 0xd12   :  { %v1884_v49 = vsel %vm429_vm10, %v4431_v48, 0.0 }
 0xd13   :  { %1885 = vadd.xlane.f32.xlu2 %v1884_v49  ;;  %v4271_v49 = vld [vmem:[%s5776_s10 + $0x50] sm:$0xff] }
 0xd7e   :  { %v1832_v55 = vpop.xlane.xlu0 %1831 }
 0xd7f   :  { %4432 = vrcp.f32 %v1832_v55  ;;  %v4299_v55 = vld [vmem:[%s5776_s10 + $0x70] sm:$0xff] }
 0xd80   :  { %2323 = vmatpush.bf16.msra.mxu1 %v4299_v55 }
 0xd84   :  { %2324 = vmatpush.bf16.msra.mxu1 %v4298_v35 }
 0xd85   :  { %v4433_v57 = vpop.eup %4432 }
 0xd86   :  { %v1834_v43 = vmul.f32 %v4433_v57, %v4429_v18  ;;  %v1886_v59 = vpop.xlane.xlu2 %1885 }
 0xd87   :  { %4434 = vrcp.f32 %v1886_v59 }
 0xd88   :  { %v1835_v50 = vpack.c.bf16 %v1834_v43, %v1834_v43 }
 0xd8a   :  { %3706 = vmatmul.msk.bf16.vlgmr.msra.gmra.mxu0 %vm429_vm10, %v1835_v50 }
 0xd8b   :  { %2275 = vmatpush.bf16.msra.mxu0 %v2266_v22 }
 0xd8d   :  { %v4435_v61 = vpop.eup %4434 }
 0xd8e   :  { %v1888_v4 = vmul.f32 %v4435_v61, %v4431_v48 }
 0xd90   :  { %v1889_v62 = vpack.c.bf16 %v1888_v4, %v1888_v4  ;;  %v4297_v4 = vld [vmem:[%s5776_s10 + $0x60] sm:$0xff] }
 0xd91   :  { %2325 = vmatpush.bf16.msra.mxu1 %v4297_v4  ;;  %v4304_v4 = vld [vmem:[%s5780_s14 + $0x94] sm:$0xf0] }
 0xd92   :  { %3708 = vmatmul.msk.bf16.vlgmr.msra.gmra.mxu2 %vm429_vm10, %v1889_v62 }
 0xd9a   :  { %2081 = vmatmul.bf16.vlgmr.msrb.gmra.mxu0 %v5300_v2  ;;  %v4371_v2 = vld [vmem:[%s5816_s28 + $0x3] ss:$0 sm:$0xff] }
 0xd9b   :  { %v1999_v15 = vadd.f32 %v4371_v2, %v1998_v31  ;;  %v2001_v21 = vadd.f32 %v4371_v2, %v2000_v46 }
 0xd9d   :  { %v2173_v60 = vpack.c.bf16 %v1999_v15, %v1999_v15  ;;  %v2227_v33 = vpack.c.bf16 %v2001_v21, %v2001_v21 }
 0xe07   :  { %v5383_v3 = vpop.f32.mrf.mxu0 }
 0xe0f   :  { %v1853_v5 = vpop.f32.mrf.mxu0 }
 0xe15   :  { %v5388_v1 = vpop.f32.mrf.mxu2 }
 0xe16   :  { %v1909_v6 = vpack.c.bf16 %v5388_v1, %v5383_v3 }
 0xe17   :  { %v2082_v36 = vpop.f32.mrf.mxu0 }
 0xe18   :  { %v2083_v7 = vadd.f32 %v4373_v0, %v2082_v36 }
 0xe1a   :  { %v2174_v11 = vpack.c.bf16 %v2083_v7, %v2083_v7 }
 0xe1c   :  { %v2179_v10 = vsel %vm407_vm7, %v2174_v11, 0 }
 0xe1d   :  { %v1907_v14 = vpop.f32.mrf.mxu2  ;;  %2188 = vmatpush.bf16.xpose.msrb.mxu2 %v2179_v10 }
 0xe1f   :  { %v2084_v47 = vpop.f32.mrf.mxu0 }
 0xe20   :  { %v2085_v19 = vadd.f32 %v4373_v0, %v2084_v47 }
 0xe22   :  { %v2228_v20 = vpack.c.bf16 %v2085_v19, %v2085_v19 }
 0xe24   :  { %v2233_v24 = vsel %vm407_vm7, %v2228_v20, 0  ;;  %3864 = vmatmul.msk.bf16.vlgmr.msrb.gmra.mxu2 %vm407_vm7, %v2173_v60 }
 0xe25   :  { %2221 = vmatpush.bf16.msra.mxu2 %v2212_v13  ;;  %2242 = vmatpush.bf16.xpose.msrb.mxu3 %v2233_v24 }
 0xe2c   :  { %3866 = vmatmul.msk.bf16.vlgmr.msrb.gmra.mxu3 %vm407_vm7, %v2227_v33  ;;  %v4316_v33 = vld [vmem:[%s5780_s14 + $0xf4] sm:$0xf0] }
 0xea7   :  { %v2190_v63 = vpop.f32.mrf.mxu2 }
 0xea8   :  { %v2194_v23 = vmul.f32 0.125, %v2190_v63  ;;  %v4315_v63 = vld [vmem:[%s5780_s14 + $0xf4] sm:$0xf] }
 0xeaa   :  { %v2195_v25 = vadd.f32 %v2194_v23, %v4796_v42 }
 0xeac   :  { %v2196_v26 = vsel %vm429_vm10, %v2195_v25, -inf }
 0xead   :  { %2197 = vmax.xlane.f32.xlu0 %v2196_v26 }
 0xeaf   :  { %v2192_v27 = vpop.f32.mrf.mxu2  ;;  %v2244_v28 = vpop.f32.mrf.mxu3 }
 0xeb0   :  { %v2248_v29 = vmul.f32 0.125, %v2244_v28  ;;  %v3980_v27 = vld [vmem:[%s5780_s14 + $0xe0] sm:$0xf]  ;;  %v4314_v28 = vld [vmem:[%s5780_s14 + $0xe4] sm:$0xf0] }
 0xeb2   :  { %v2249_v40 = vadd.f32 %v2248_v29, %v4838_v16  ;;  %v4272_v16 = vld [vmem:[%s5776_s10 + $0x58] sm:$0xff]  ;;  %v4313_v29 = vld [vmem:[%s5780_s14 + $0xe4] sm:$0xf] }
 0xeb3   :  { %2363 = vmatpush.bf16.msrb.mxu2 %v4272_v16  ;;  %v3966_v16 = vld [vmem:[%s5780_s14 + $0xc8] sm:$0xf0] }
 0xeb4   :  { %v2250_v30 = vsel %vm429_vm10, %v2249_v40, -inf }
 0xeb5   :  { %2251 = vmax.xlane.f32.xlu1 %v2250_v30  ;;  %v3982_v30 = vld [vmem:[%s5780_s14 + $0xe8] sm:$0xf0] }
 0xeb7   :  { %v2246_v39 = vpop.f32.mrf.mxu3  ;;  %2364 = vmatpush.bf16.msrb.mxu2 %v4271_v49 }
 0xeb8   :  { %v3985_v39 = vor.u32 %v4313_v29, %v3982_v30 }
 0xebb   :  { %2365 = vmatpush.bf16.msrb.mxu2 %v4270_v51  ;;  %v3956_v51 = vld [vmem:[%s5780_s14 + $0xb0] sm:$0xf] }
 0xebf   :  { %2366 = vmatpush.bf16.msrb.mxu2 %v4269_v53  ;;  %v4308_v53 = vld [vmem:[%s5780_s14 + $0xb4] sm:$0xf0] }
 0xec0   :  { %v3957_v55 = vor.u32 %v4308_v53, %v3956_v51 }
 0xf20   :  { %v2198_v32 = vpop.xlane.xlu0 %2197 }
 0xf21   :  { %v2199_v34 = vsub.f32 %v2195_v25, %v2198_v32  ;;  %v3990_v25 = vld [vmem:[%s5780_s14 + $0xf8] sm:$0xf0]  ;;  %v3972_v32 = vld [vmem:[%s5780_s14 + $0xd0] sm:$0xf] }
 0xf22   :  { %v3993_v26 = vor.u32 %v4315_v63, %v3990_v25 }
 0xf23   :  { %v2200_v37 = vmul.f32 1.442695, %v2199_v34  ;;  %v4312_v34 = vld [vmem:[%s5780_s14 + $0xd4] sm:$0xf0] }
 0xf24   :  { %2555 = vmatpush.bf16.msrb.mxu0 %v3993_v26 }
 0xf25   :  { %4436 = vpow2.f32 %v2200_v37  ;;  %v4311_v37 = vld [vmem:[%s5780_s14 + $0xd4] sm:$0xf] }
 0xf28   :  { %v2252_v17 = vpop.xlane.xlu1 %2251  ;;  %2556 = vmatpush.bf16.msrb.mxu0 %v3985_v39 }
 0xf29   :  { %v2253_v38 = vsub.f32 %v2249_v40, %v2252_v17  ;;  %v3981_v40 = vor.u32 %v4314_v28, %v3980_v27  ;;  %v3973_v17 = vor.u32 %v4312_v34, %v3972_v32  ;;  %v4375_v28 = vld [vmem:[%s5778_s12 + $0x1] ss:$0 sm:$0xff] }
 0xf2a   :  { %v4376_v32 = vld [vmem:[%s5779_s13 + $0x1] ss:$0 sm:$0xff] }
 0xf2b   :  { %v4437_v18 = vpop.eup %4436  ;;  %v2254_v42 = vmul.f32 1.442695, %v2253_v38  ;;  %v3974_v38 = vld [vmem:[%s5780_s14 + $0xd8] sm:$0xf0] }
 0xf2c   :  { %v2202_v12 = vsel %vm429_vm10, %v4437_v18, 0.0 }
 0xf2d   :  { %4438 = vpow2.f32 %v2254_v42  ;;  %2203 = vadd.xlane.f32.xlu2 %v2202_v12  ;;  %v3964_v42 = vld [vmem:[%s5780_s14 + $0xc0] sm:$0xf]  ;;  %v4310_v12 = vld [vmem:[%s5780_s14 + $0xc4] sm:$0xf0] }
 0xf33   :  { %v4439_v44 = vpop.eup %4438 }
 0xf34   :  { %v2256_v48 = vsel %vm429_vm10, %v4439_v44, 0.0 }
 0xf35   :  { %2257 = vadd.xlane.f32.xlu0 %v2256_v48  ;;  %v3965_v48 = vor.u32 %v4310_v12, %v3964_v42 }
 0xfa0   :  { %v2204_v52 = vpop.xlane.xlu2 %2203 }
 0xfa1   :  { %4440 = vrcp.f32 %v2204_v52  ;;  %v3958_v52 = vld [vmem:[%s5780_s14 + $0xb8] sm:$0xf0] }
 0xfa2   :  { %v3961_v35 = vor.u32 %v4307_v54, %v3958_v52 }
 0xfa7   :  { %v4441_v57 = vpop.eup %4440 }
 0xfa8   :  { %v2206_v58 = vmul.f32 %v4441_v57, %v4437_v18  ;;  %v2258_v43 = vpop.xlane.xlu0 %2257  ;;  %v3977_v18 = vor.u32 %v4311_v37, %v3974_v38  ;;  %v3948_v57 = vld [vmem:[%s5780_s14 + $0xa0] sm:$0xf] }
 0xfa9   :  { %4442 = vrcp.f32 %v2258_v43  ;;  %v4305_v43 = vld [vmem:[%s5780_s14 + $0xa4] sm:$0xf]  ;;  %v3929_v38 = vld [vmem:[%s5781_s15 + $0x2] sm:$0x3]  ;;  %s3125_s15 = sshll.u32 %s4514_s6, 4  ;;  %s3126_s15 = int_to_ptr.vmem [resolvable:$true] %s3125_s15 }
 0xfaa   :  { %v2207_v59 = vpack.c.bf16 %v2206_v58, %v2206_v58  ;;  %2557 = vmatpush.bf16.msrb.mxu0 %v3977_v18  ;;  %v4306_v58 = vld [vmem:[%s5780_s14 + $0xa4] sm:$0xf0] }
 0xfac   :  { %3865 = vmatmul.msk.bf16.vlgmr.msra.gmra.mxu2 %vm429_vm10, %v2207_v59  ;;  %v3949_v59 = vor.u32 %v4306_v58, %v3948_v57  ;;  %v4324_v58 = vld [vmem:[%s5782_s16 + $0xb8] sm:$0xff] }
 0xfad   :  { %2865 = vmatpush.bf16.msrb.mxu1 %v4324_v58 }
 0xfaf   :  { %v4443_v50 = vpop.eup %4442 }
 0xfb0   :  { %v2260_v22 = vmul.f32 %v4443_v50, %v4439_v44  ;;  %v4309_v44 = vld [vmem:[%s5780_s14 + $0xc4] sm:$0xf]  ;;  %v3950_v50 = vld [vmem:[%s5780_s14 + $0xa8] sm:$0xf0] }
 0xfb1   :  { %v3969_v49 = vor.u32 %v4309_v44, %v3966_v16  ;;  %v2457_v44 = vperm.slane %v3929_v38, 0  ;;  %v4332_v16 = vld [vmem:[%s5782_s16 + $0xf8] sm:$0xff] }
 0xfb2   :  { %v2261_v61 = vpack.c.bf16 %v2260_v22, %v2260_v22  ;;  %v3953_v22 = vor.u32 %v4305_v43, %v3950_v50  ;;  %2879 = vmatpush.bf16.msra.mxu2 %v4332_v16  ;;  %v4330_v50 = vld [vmem:[%s5782_s16 + $0xe8] sm:$0xff]  ;;  %v4319_v16 = vld [vmem:[%s5782_s16 + $0x90] sm:$0xff] }
 0xfb3   :  { %2558 = vmatpush.bf16.msrb.mxu0 %v3969_v49 }
 0xfb4   :  { %3867 = vmatmul.msk.bf16.vlgmr.msra.gmra.mxu0 %vm429_vm10, %v2261_v61  ;;  %v3940_v61 = vld [vmem:[%s5780_s14 + $0x90] sm:$0xf] }
 0xfb7   :  { %2559 = vmatpush.bf16.msrb.mxu0 %v3961_v35  ;;  %v4331_v35 = vld [vmem:[%s5782_s16 + $0xf0] sm:$0xff] }
 0xfb8   :  { %2880 = vmatpush.bf16.msra.mxu2 %v4331_v35 }
 0xfbb   :  { %2560 = vmatpush.bf16.msrb.mxu0 %v3953_v22 }
 0xfbc   :  { %3909 = vmatmul.msk.bf16.vlgmr.msrb.gmra.mxu2 %vm407_vm7, %v1909_v6 }
 0xfbd   :  { %2881 = vmatpush.bf16.msra.mxu2 %v4330_v50 }
0x102f   :  { %v2223_v62 = vpop.f32.mrf.mxu2 }
0x1031   :  { %v2277_v5 = vpop.f32.mrf.mxu0 }
0x1032   :  { %v2281_v0 = vpack.c.bf16 %v2277_v5, %v2223_v62  ;;  %v4303_v62 = vld [vmem:[%s5780_s14 + $0x94] sm:$0xf]  ;;  %v3941_v5 = vor.u32 %v4304_v4, %v3940_v61 }
0x1034   :  { %3892 = vmatmul.msk.bf16.vlgmr.msra.gmra.mxu1 %vm407_vm7, %v2281_v0  ;;  %v3942_v0 = vld [vmem:[%s5780_s14 + $0x98] sm:$0xf0] }
0x1037   :  { %v2225_v36 = vpop.f32.mrf.mxu2 }
0x1038   :  { %v3932_v36 = vld [vmem:[%s5780_s14 + $0x80] sm:$0xf] }
0x1039   :  { %v2279_v7 = vpop.f32.mrf.mxu0 }
0x103a   :  { %v4302_v7 = vld [vmem:[%s5780_s14 + $0x84] sm:$0xf0] }
0x103f   :  { %v2368_v31 = vpop.f32.mrf.mxu2 }
0x1047   :  { %v2370_v11 = vpop.f32.mrf.mxu2 }
0x10b1   :  { %v2327_v3 = vpop.f32.mrf.mxu1 }
0x10b2   :  { %v2369_v1 = vadd.f32 %v2368_v31, %v2327_v3  ;;  %v4301_v3 = vld [vmem:[%s5780_s14 + $0x84] sm:$0xf] }
0x10b4   :  { %v2378_v6 = vadd.f32 %v4374_v9, %v2369_v1  ;;  %v3934_v1 = vld [vmem:[%s5780_s14 + $0x88] sm:$0xf0] }
0x10b6   :  { %v2380_v2 = vadd.f32 %v2378_v6, %v5294_v41 }
0x10b8   :  { %2386 = vadd.xlane.f32.xlu1 %v2380_v2 }
0x10b9   :  { %v2329_v10 = vpop.f32.mrf.mxu1 }
0x10ba   :  { %v2371_v13 = vadd.f32 %v2370_v11, %v2329_v10  ;;  %v3937_v11 = vor.u32 %v4301_v3, %v3934_v1  ;;  %v4329_v3 = vld [vmem:[%s5782_s16 + $0xe0] sm:$0xff] }
0x10bb   :  { %2882 = vmatpush.bf16.msra.mxu2 %v4329_v3 }
0x10bc   :  { %v2379_v14 = vadd.f32 %v4374_v9, %v2371_v13  ;;  %v3945_v9 = vor.u32 %v4303_v62, %v3942_v0 }
0x10be   :  { %v2381_v15 = vadd.f32 %v2379_v14, %v5296_v45  ;;  %v3988_v45 = vld [vmem:[%s5780_s14 + $0xf0] sm:$0xf]  ;;  %2561 = vmatpush.bf16.msrb.mxu0 %v3945_v9 }
0x10bf   :  { %v3989_v23 = vor.u32 %v4316_v33, %v3988_v45 }
0x10c0   :  { %2388 = vadd.xlane.f32.xlu2 %v2381_v15 }
0x10c1   :  { %2541 = vmatpush.bf16.msra.mxu3 %v3989_v23 }
0x10c2   :  { %2562 = vmatpush.bf16.msrb.mxu0 %v3937_v11  ;;  %v4322_v11 = vld [vmem:[%s5782_s16 + $0xa8] sm:$0xff] }
0x10c5   :  { %2542 = vmatpush.bf16.msra.mxu3 %v3981_v40 }
0x10c9   :  { %2543 = vmatpush.bf16.msra.mxu3 %v3973_v17 }
0x10cd   :  { %2544 = vmatpush.bf16.msra.mxu3 %v3965_v48 }
0x10d1   :  { %2545 = vmatpush.bf16.msra.mxu3 %v3957_v55 }
0x10d5   :  { %2546 = vmatpush.bf16.msra.mxu3 %v3949_v59 }
0x10d9   :  { %2547 = vmatpush.bf16.msra.mxu3 %v3941_v5  ;;  %v4323_v5 = vld [vmem:[%s5782_s16 + $0xb0] sm:$0xff] }
0x10da   :  { %2866 = vmatpush.bf16.msrb.mxu1 %v4323_v5 }
0x10de   :  { %2867 = vmatpush.bf16.msrb.mxu1 %v4322_v11 }
0x112b   :  { %v2387_v47 = vpop.xlane.xlu1 %2386 }
0x112c   :  { %v2390_v19 = vmul.f32 %v2387_v47, %v4649_v8 }
0x112e   :  { %v5443_v60 = vsub.f32 %v2380_v2, %v2390_v19  ;;  %v3933_v2 = vor.u32 %v4302_v7, %v3932_v36 }
0x1130   :  { %v2394_v20 = vmul.f32 %v5443_v60, %v5443_v60  ;;  %2548 = vmatpush.bf16.msra.mxu3 %v3933_v2 }
0x1132   :  { %2396 = vadd.xlane.f32.xlu0 %v2394_v20 }
0x1133   :  { %v2389_v46 = vpop.xlane.xlu2 %2388 }
0x1134   :  { %v2391_v41 = vmul.f32 %v2389_v46, %v4649_v8 }
0x1136   :  { %v5448_v24 = vsub.f32 %v2381_v15, %v2391_v41 }
0x1138   :  { %v2395_v21 = vmul.f32 %v5448_v24, %v5448_v24 }
0x113a   :  { %2398 = vadd.xlane.f32.xlu1 %v2395_v21 }
0x11a5   :  { %v2397_v31 = vpop.xlane.xlu0 %2396 }
0x11a6   :  { %v2400_v6 = vmul.f32 %v2397_v31, %v4649_v8 }
0x11a8   :  { %v2402_v10 = vadd.f32 1e-12, %v2400_v6 }
0x11aa   :  { %4444 = vrsqrt.f32 %v2402_v10  ;;  %vm2410_vm8 = vweird.f32 %v2402_v10 }
0x11ad   :  { %v2399_v13 = vpop.xlane.xlu1 %2398 }
0x11ae   :  { %v2401_v14 = vmul.f32 %v2399_v13, %v4649_v8  ;;  %v4328_v13 = vld [vmem:[%s5782_s16 + $0xd8] sm:$0xff] }
0x11af   :  { %2883 = vmatpush.bf16.msra.mxu2 %v4328_v13 }
0x11b0   :  { %v4445_v15 = vpop.eup %4444  ;;  %v2403_v47 = vadd.f32 1e-12, %v2401_v14 }
0x11b1   :  { %v2405_v19 = vmul.f32 %v4445_v15, %v2402_v10  ;;  %vm2411_vm7 = vweird.f32 %v4445_v15 }
0x11b2   :  { %4446 = vrsqrt.f32 %v2403_v47  ;;  %vm2412_vm10 = vmor %vm2410_vm8, %vm2411_vm7  ;;  %vm2420_vm3 = vweird.f32 %v2403_v47 }
0x11b3   :  { %v2406_v20 = vmul.f32 %v4445_v15, %v2405_v19 }
0x11b5   :  { %v2407_v46 = vmul.f32 0.5, %v2406_v20 }
0x11b7   :  { %v2408_v41 = vsub.f32 1.5, %v2407_v46 }
0x11b8   :  { %v4447_v21 = vpop.eup %4446 }
0x11b9   :  { %v2409_v45 = vmul.f32 %v4445_v15, %v2408_v41  ;;  %v2415_v33 = vmul.f32 %v4447_v21, %v2403_v47  ;;  %vm2421_vm2 = vweird.f32 %v4447_v21  ;;  %v4321_v41 = vld [vmem:[%s5782_s16 + $0xa0] sm:$0xff] }
0x11ba   :  { %vm2422_vm4 = vmor %vm2420_vm3, %vm2421_vm2  ;;  %2868 = vmatpush.bf16.msrb.mxu1 %v4321_v41 }
0x11bb   :  { %v2416_v63 = vmul.f32 %v4447_v21, %v2415_v33  ;;  %v2413_v23 = vsel %vm2412_vm10, %v4445_v15, %v2409_v45 }
0x11bc   :  { %v2424_v27 = vmul.f32 %v2413_v23, %v5443_v60 }
0x11bd   :  { %v2417_v25 = vmul.f32 0.5, %v2416_v63  ;;  %v4327_v63 = vld [vmem:[%s5782_s16 + $0xd0] sm:$0xff] }
0x11be   :  { %v2429_v39 = vmul.f32 %v4375_v28, %v2424_v27  ;;  %2884 = vmatpush.bf16.msra.mxu2 %v4327_v63 }
0x11bf   :  { %v2418_v26 = vsub.f32 1.5, %v2417_v25 }
0x11c0   :  { %v5558_v37 = vadd.f32 %v4376_v32, %v2429_v39 }
0x11c1   :  { %v2419_v29 = vmul.f32 %v4447_v21, %v2418_v26 }
0x11c3   :  { %v2423_v40 = vsel %vm2422_vm4, %v4447_v21, %v2419_v29 }
0x11c4   :  { %v2425_v30 = vmul.f32 %v2423_v40, %v5448_v24  ;;  %v2458_v24 = vperm.slane %v3929_v38, 1 }
0x11c6   :  { %v2430_v34 = vmul.f32 %v4375_v28, %v2425_v30  ;;  %v4320_v28 = vld [vmem:[%s5782_s16 + $0x98] sm:$0xff] }
0x11c7   :  { %2869 = vmatpush.bf16.msrb.mxu1 %v4320_v28 }
0x11c8   :  { %v5560_v17 = vadd.f32 %v4376_v32, %v2430_v34 }
0x11ca   :  { %v2436_v60 = vpack.c.bf16 %v5560_v17, %v5558_v37 }
0x11cb   :  { %2870 = vmatpush.bf16.msrb.mxu1 %v4319_v16 }
0x11cc   :  { %2549 = vmatmul.bf16.vlgmr.msra.gmra.mxu3 %v2436_v60  ;;  %2563 = vmatmul.bf16.vlgmr.msrb.gmra.mxu0 %v2436_v60  ;;  %v4326_v60 = vld [vmem:[%s5782_s16 + $0xc8] sm:$0xff] }
0x11cd   :  { %2885 = vmatpush.bf16.msra.mxu2 %v4326_v60 }
0x1249   :  { %v2564_v18 = vpop.f32.mrf.mxu0 }
0x124a   :  { %v5567_v42 = vadd.f32 %v2564_v18, %v2458_v24 }
0x124c   :  { %v5570_v12 = vmul.f32 0.70710677, %v5567_v42 }
0x124e   :  { %v2586_v48 = vand.u32 2147483647, %v5570_v12 }
0x124f   :  { %v2550_v49 = vpop.f32.mrf.mxu3 }
0x1250   :  { %v2590_v51 = vmul.f32 0.3275911, %v2586_v48  ;;  %v5576_v53 = vadd.f32 %v2550_v49, %v2457_v44  ;;  %v2694_v47 = vsub.f32 0.0, %v2586_v48 }
0x1251   :  { %v2566_v54 = vpop.f32.mrf.mxu0 }
0x1252   :  { %v2594_v55 = vadd.f32 1.0, %v2590_v51  ;;  %v5579_v52 = vmul.f32 0.70710677, %v5576_v53  ;;  %v5584_v57 = vadd.f32 %v2566_v54, %v2458_v24  ;;  %v2698_v26 = vmul.f32 %v2694_v47, %v2586_v48 }
0x1254   :  { %4448 = vrcp.f32 %v2594_v55  ;;  %v5590_v43 = vand.u32 2147483647, %v5579_v52  ;;  %v5593_v59 = vmul.f32 0.70710677, %v5584_v57  ;;  %v2623_v10 = vand.u32 2147483648, %v2594_v55 }
0x1255   :  { %v2621_v15 = vand.u32 2147483647, %v2594_v55  ;;  %vm2617_vm6 = vweird.f32 %v2594_v55  ;;  %v2703_v18 = vmul.f32 1.442695, %v2698_v26 }
0x1256   :  { %v2589_v22 = vmul.f32 0.3275911, %v5590_v43  ;;  %v5600_v4 = vand.u32 2147483647, %v5593_v59  ;;  %v2624_v21 = vor.u32 1.1754944e-38, %v2623_v10  ;;  %v2693_v24 = vsub.f32 0.0, %v5590_v43 }
0x1257   :  { %v2552_v61 = vpop.f32.mrf.mxu3  ;;  %vm2622_vm11 = vcmp.eq.f32.partialorder %v2621_v15, 8.507059e+37 }
0x1258   :  { %v5602_v62 = vadd.f32 %v2552_v61, %v2457_v44  ;;  %v5607_v0 = vadd.f32 1.0, %v2589_v22  ;;  %v2592_v7 = vmul.f32 0.3275911, %v5600_v4  ;;  %v4325_v22 = vld [vmem:[%s5782_s16 + $0xc0] sm:$0xff]  ;;  %v2696_v3 = vsub.f32 0.0, %v5600_v4 }
0x1259   :  { %2886 = vmatpush.bf16.msra.mxu2 %v4325_v22 }
0x125a   :  { %v4449_v36 = vpop.eup %4448  ;;  %v5611_v31 = vmul.f32 0.70710677, %v5602_v62  ;;  %4450 = vrcp.f32 %v5607_v0  ;;  %v5617_v1 = vadd.f32 1.0, %v2592_v7  ;;  %v2608_v30 = vand.u32 2147483648, %v5607_v0 }
0x125b   :  { %v2613_v9 = vmul.f32 %v4449_v36, %v2594_v55  ;;  %vm2618_vm5 = vweird.f32 %v4449_v36  ;;  %v2606_v32 = vand.u32 2147483647, %v5607_v0  ;;  %vm2602_vm13 = vweird.f32 %v5607_v0 }
0x125c   :  { %v5620_v2 = vand.u32 2147483647, %v5611_v31  ;;  %4452 = vrcp.f32 %v5617_v1  ;;  %vm2619_vm9 = vmor %vm2617_vm6, %vm2618_vm5  ;;  %v2609_v51 = vor.u32 1.1754944e-38, %v2608_v30  ;;  %v2651_v54 = vand.u32 2147483647, %v5617_v1 }
0x125d   :  { %v2614_v6 = vsub.f32 1.0, %v2613_v9  ;;  %v2653_v55 = vand.u32 2147483648, %v5617_v1  ;;  %vm2607_vm15 = vcmp.eq.f32.partialorder %v2606_v32, 8.507059e+37  ;;  %vm2647_vm1 = vweird.f32 %v5617_v1 }
0x125e   :  { %v2591_v19 = vmul.f32 0.3275911, %v5620_v2  ;;  %vm2652_vm8 = vcmp.eq.f32.partialorder %v2651_v54, 8.507059e+37  ;;  %v2695_v60 = vsub.f32 0.0, %v5620_v2  ;;  %vm2578_vm5 = vcmp.ge.f32.partialorder %v5570_v12, 0.0 }
0x125f   :  { %v2615_v14 = vmul.f32 %v4449_v36, %v2614_v6  ;;  %v4318_v6 = vld [vmem:[%s5782_s16 + $0x88] sm:$0xff]  ;;  %v2654_v10 = vor.u32 1.1754944e-38, %v2653_v55  ;;  %vm2580_vm6 = vcmp.ge.f32.partialorder %v5593_v59, 0.0  ;;  %v2570_v59 = vmul.f32 0.5, %v5567_v42 }
0x1260   :  { %v4451_v20 = vpop.eup %4450  ;;  %v5634_v33 = vadd.f32 1.0, %v2591_v19  ;;  %2871 = vmatpush.bf16.msrb.mxu1 %v4318_v6  ;;  %v2584_v12 = vsel %vm2580_vm6, 1.0, %v4513_v56 }
0x1261   :  { %v2616_v46 = vadd.f32 %v4449_v36, %v2615_v14  ;;  %v2598_v45 = vmul.f32 %v4451_v20, %v5607_v0  ;;  %vm2603_vm12 = vweird.f32 %v4451_v20  ;;  %v2697_v0 = vmul.f32 %v2693_v24, %v5590_v43 }
0x1262   :  { %4454 = vrcp.f32 %v5634_v33  ;;  %v4453_v29 = vpop.eup %4452  ;;  %vm2604_vm14 = vmor %vm2602_vm13, %vm2603_vm12  ;;  %v2636_v15 = vand.u32 2147483647, %v5634_v33  ;;  %v2638_v47 = vand.u32 2147483648, %v5634_v33  ;;  %vm2632_vm2 = vweird.f32 %v5634_v33 }
0x1263   :  { %v2620_v23 = vsel %vm2619_vm9, %v4449_v36, %v2616_v46  ;;  %v2599_v27 = vsub.f32 1.0, %v2598_v45  ;;  %v2643_v34 = vmul.f32 %v4453_v29, %v5617_v1  ;;  %vm2648_vm0 = vweird.f32 %v4453_v29 }
0x1264   :  { %v5639_v25 = vsel %vm2622_vm11, %v2624_v21, %v2620_v23  ;;  %vm2649_vm7 = vmor %vm2647_vm1, %vm2648_vm0  ;;  %v4317_v21 = vld [vmem:[%s5782_s16 + $0x80] sm:$0xff]  ;;  %v2701_v63 = vmul.f32 1.442695, %v2697_v0  ;;  %4456 = vpow2.f32 %v2703_v18  ;;  %v2639_v28 = vor.u32 1.1754944e-38, %v2638_v47 }
0x1265   :  { %v2658_v40 = vmul.f32 1.0614054, %v5639_v25  ;;  %v2600_v39 = vmul.f32 %v4451_v20, %v2599_v27  ;;  %v2644_v48 = vsub.f32 1.0, %v2643_v34  ;;  %vm2637_vm4 = vcmp.eq.f32.partialorder %v2636_v15, 8.507059e+37  ;;  %2872 = vmatpush.bf16.msrb.mxu1 %v4317_v21 }
0x1266   :  { %4458 = vpow2.f32 %v2701_v63  ;;  %vm2577_vm9 = vcmp.ge.f32.partialorder %v5579_v52, 0.0  ;;  %vm2579_vm11 = vcmp.ge.f32.partialorder %v5611_v31, 0.0  ;;  %v2572_v63 = vmul.f32 0.5, %v5584_v57  ;;  %v4377_v57 = vld [vmem:[%s5783_s17 + $0x1] ss:$0 sm:$0xff] }
0x1267   :  { %v2662_v38 = vadd.f32 -1.4531521, %v2658_v40  ;;  %v2601_v44 = vadd.f32 %v4451_v20, %v2600_v39  ;;  %v2645_v50 = vmul.f32 %v4453_v29, %v2644_v48  ;;  %v2700_v40 = vmul.f32 %v2696_v3, %v5600_v4 }
0x1268   :  { %v4455_v35 = vpop.eup %4454  ;;  %v2699_v4 = vmul.f32 %v2695_v60, %v5620_v2 }
0x1269   :  { %v2666_v49 = vmul.f32 %v2662_v38, %v5639_v25  ;;  %v2605_v58 = vsel %vm2604_vm14, %v4451_v20, %v2601_v44  ;;  %v2628_v36 = vmul.f32 %v4455_v35, %v5634_v33  ;;  %v2646_v9 = vadd.f32 %v4453_v29, %v2645_v50 }
0x126a   :  { %v2610_v5 = vsel %vm2607_vm15, %v2609_v51, %v2605_v58  ;;  %vm2633_vm10 = vweird.f32 %v4455_v35  ;;  %v2707_v44 = vmul.f32 1.442695, %v2700_v40  ;;  %v4457_v16 = vpop.eup %4456  ;;  %v2705_v0 = vmul.f32 1.442695, %v2699_v4 }
0x126b   :  { %v2670_v61 = vadd.f32 1.4214138, %v2666_v49  ;;  %v2657_v7 = vmul.f32 1.0614054, %v2610_v5  ;;  %v2629_v13 = vsub.f32 1.0, %v2628_v36  ;;  %v2650_v14 = vsel %vm2649_vm7, %v4453_v29, %v2646_v9  ;;  %vm2634_vm3 = vmor %vm2632_vm2, %vm2633_vm10 }
0x126c   :  { %v2655_v19 = vsel %vm2652_vm8, %v2654_v10, %v2650_v14  ;;  %4460 = vpow2.f32 %v2707_v44  ;;  %v4459_v36 = vpop.eup %4458  ;;  %v2582_v10 = vsel %vm2578_vm5, 1.0, %v4513_v56  ;;  %vm2952_vm7 = vcmask 1040384  }
0x126d   :  { %v2674_v11 = vmul.f32 %v2670_v61, %v5639_v25  ;;  %v2661_v43 = vadd.f32 -1.4531521, %v2657_v7  ;;  %v2630_v20 = vmul.f32 %v4455_v35, %v2629_v13  ;;  %v2660_v41 = vmul.f32 1.0614054, %v2655_v19 }
0x126e   :  { %4462 = vpow2.f32 %v2705_v0  ;;  %v4336_v0 = vld [vmem:[%s5786_s20 + $0x18] sm:$0xff] }
0x126f   :  { %v2678_v1 = vadd.f32 -0.28449672, %v2674_v11  ;;  %v2665_v46 = vmul.f32 %v2661_v43, %v2610_v5  ;;  %v2631_v23 = vadd.f32 %v4455_v35, %v2630_v20  ;;  %v2664_v27 = vadd.f32 -1.4531521, %v2660_v41 }
0x1271   :  { %v2682_v45 = vmul.f32 %v2678_v1, %v5639_v25  ;;  %v2669_v26 = vadd.f32 1.4214138, %v2665_v46  ;;  %v2635_v30 = vsel %vm2634_vm3, %v4455_v35, %v2631_v23  ;;  %v2668_v32 = vmul.f32 %v2664_v27, %v2655_v19 }
0x1272   :  { %v2640_v34 = vsel %vm2637_vm4, %v2639_v28, %v2635_v30  ;;  %v4461_v2 = vpop.eup %4460  ;;  %v2583_v28 = vsel %vm2579_vm11, 1.0, %v4513_v56 }
0x1273   :  { %v2686_v29 = vadd.f32 0.2548296, %v2682_v45  ;;  %v2673_v39 = vmul.f32 %v2669_v26, %v2610_v5  ;;  %v2659_v38 = vmul.f32 1.0614054, %v2640_v34  ;;  %v2672_v18 = vadd.f32 1.4214138, %v2668_v32 }
0x1274   :  { %v4463_v20 = vpop.eup %4462  ;;  %v2571_v32 = vmul.f32 0.5, %v5602_v62 }
0x1275   :  { %v2690_v24 = vmul.f32 %v2686_v29, %v5639_v25  ;;  %v2677_v33 = vadd.f32 -0.28449672, %v2673_v39  ;;  %v2663_v48 = vadd.f32 -1.4531521, %v2659_v38  ;;  %v2676_v51 = vmul.f32 %v2672_v18, %v2655_v19 }
0x1276   :  { %v2569_v39 = vmul.f32 0.5, %v5576_v53 }
0x1277   :  { %v2681_v49 = vmul.f32 %v2677_v33, %v2610_v5  ;;  %v2667_v54 = vmul.f32 %v2663_v48, %v2640_v34  ;;  %v2710_v55 = vmul.f32 %v4457_v16, %v2690_v24  ;;  %v2680_v58 = vadd.f32 -0.28449672, %v2676_v51 }
0x1279   :  { %v2685_v35 = vadd.f32 0.2548296, %v2681_v49  ;;  %v2671_v50 = vadd.f32 1.4214138, %v2667_v54  ;;  %v2684_v61 = vmul.f32 %v2680_v58, %v2655_v19  ;;  %v2714_v7 = vsub.f32 1.0, %v2710_v55 }
0x127b   :  { %v2689_v22 = vmul.f32 %v2685_v35, %v2610_v5  ;;  %v2675_v25 = vmul.f32 %v2671_v50, %v2640_v34  ;;  %v2688_v9 = vadd.f32 0.2548296, %v2684_v61  ;;  %v2718_v43 = vmul.f32 %v2714_v7, %v2582_v10  ;;  %v4337_v61 = vld [vmem:[%s5786_s20 + $0x20] sm:$0xff]  ;;  %v4348_v10 = vld [vmem:[%s5788_s22 + $0x38] sm:$0xff] }
0x127c   :  { %3106 = vmatpush.bf16.msra.mxu0 %v4348_v10 }
0x127d   :  { %v2709_v3 = vmul.f32 %v4459_v36, %v2689_v22  ;;  %v2679_v6 = vadd.f32 -0.28449672, %v2675_v25  ;;  %v2692_v11 = vmul.f32 %v2688_v9, %v2655_v19  ;;  %v2722_v46 = vadd.f32 1.0, %v2718_v43  ;;  %v4338_v22 = vld [vmem:[%s5786_s20 + $0x28] sm:$0xff]  ;;  %v4335_v25 = vld [vmem:[%s5786_s20 + $0x10] sm:$0xff] }
0x127e   :  { %v2581_v19 = vsel %vm2577_vm9, 1.0, %v4513_v56  ;;  %v4334_v9 = vld [vmem:[%s5786_s20 + $0x8] sm:$0xff] }
0x127f   :  { %v2683_v13 = vmul.f32 %v2679_v6, %v2640_v34  ;;  %v2712_v5 = vmul.f32 %v4461_v2, %v2692_v11  ;;  %v2713_v14 = vsub.f32 1.0, %v2709_v3  ;;  %v2726_v26 = vmul.f32 %v2722_v46, %v2570_v59  ;;  %v4333_v6 = vld [vmem:[%s5786_s20] sm:$0xff] }
0x1280   :  { %v4345_v46 = vld [vmem:[%s5788_s22 + $0x20] sm:$0xff] }
0x1281   :  { %v2687_v15 = vadd.f32 0.2548296, %v2683_v13  ;;  %v2716_v47 = vsub.f32 1.0, %v2712_v5  ;;  %v2717_v21 = vmul.f32 %v2713_v14, %v2581_v19  ;;  %v4347_v14 = vld [vmem:[%s5788_s22 + $0x30] sm:$0xff] }
0x1282   :  { %3107 = vmatpush.bf16.msra.mxu0 %v4347_v14 }
0x1283   :  { %v2691_v1 = vmul.f32 %v2687_v15, %v2640_v34  ;;  %v2720_v41 = vmul.f32 %v2716_v47, %v2584_v12  ;;  %v2721_v29 = vadd.f32 1.0, %v2717_v21 }
0x1285   :  { %v2711_v45 = vmul.f32 %v4463_v20, %v2691_v1  ;;  %v2724_v52 = vadd.f32 1.0, %v2720_v41  ;;  %v2725_v31 = vmul.f32 %v2721_v29, %v2569_v39 }
0x1287   :  { %v2715_v23 = vsub.f32 1.0, %v2711_v45  ;;  %v2728_v27 = vmul.f32 %v2724_v52, %v2572_v63  ;;  %v4344_v45 = vld [vmem:[%s5788_s22 + $0x18] sm:$0xff] }
0x1289   :  { %v2719_v40 = vmul.f32 %v2715_v23, %v2583_v28  ;;  %v2730_v30 = vpack.c.bf16 %v2728_v27, %v2726_v26  ;;  %v4378_v23 = vld [vmem:[%s5817_s7 + $0x1] ss:$0 sm:$0xff] }
0x128b   :  { %v2723_v34 = vadd.f32 1.0, %v2719_v40  ;;  %2887 = vmatmul.bf16.vlgmr.msra.gmra.mxu2 %v2730_v30  ;;  %v4379_v30 = vld [vmem:[%s5785_s19 + $0x1] ss:$0 sm:$0xff] }
0x128d   :  { %v2727_v60 = vmul.f32 %v2723_v34, %v2571_v32 }
0x128f   :  { %v2729_v42 = vpack.c.bf16 %v2727_v60, %v2725_v31 }
0x1291   :  { %2873 = vmatmul.bf16.vlgmr.msrb.gmra.mxu1 %v2729_v42  ;;  %v4343_v42 = vld [vmem:[%s5788_s22 + $0x10] sm:$0xff] }
0x130e   :  { %v2874_v38 = vpop.f32.mrf.mxu1  ;;  %v2888_v56 = vpop.f32.mrf.mxu2 }
0x130f   :  { %v2875_v24 = vadd.f32 %v4377_v57, %v2874_v38  ;;  %v4341_v38 = vld [vmem:[%s5788_s22] sm:$0xff] }
0x1311   :  { %v2889_v33 = vadd.f32 %v2888_v56, %v2875_v24  ;;  %v4380_v24 = vld [vmem:[%s5787_s21] ss:$0 sm:$0xff] }
0x1313   :  { %v2893_v18 = vadd.f32 %v2889_v33, %v5558_v37  ;;  %v4340_v37 = vld [vmem:[%s5786_s20 + $0x38] sm:$0xff] }
0x1314   :  { %3023 = vmatpush.bf16.msrb.mxu3 %v4340_v37 }
0x1315   :  { %2899 = vadd.xlane.f32.xlu0 %v2893_v18 }
0x1316   :  { %v2876_v53 = vpop.f32.mrf.mxu1  ;;  %v2890_v62 = vpop.f32.mrf.mxu2 }
0x1317   :  { %v2877_v44 = vadd.f32 %v4377_v57, %v2876_v53  ;;  %v4342_v57 = vld [vmem:[%s5788_s22 + $0x8] sm:$0xff] }
0x1319   :  { %v2891_v48 = vadd.f32 %v2890_v62, %v2877_v44  ;;  %v4381_v62 = vld [vmem:[%s5789_s23] ss:$0 sm:$0xff] }
0x131b   :  { %v2894_v16 = vadd.f32 %v2891_v48, %v5560_v17  ;;  %v4339_v17 = vld [vmem:[%s5786_s20 + $0x30] sm:$0xff] }
0x131c   :  { %3024 = vmatpush.bf16.msrb.mxu3 %v4339_v17 }
0x131d   :  { %2901 = vadd.xlane.f32.xlu2 %v2894_v16 }
0x1320   :  { %3025 = vmatpush.bf16.msrb.mxu3 %v4338_v22 }
0x1324   :  { %3026 = vmatpush.bf16.msrb.mxu3 %v4337_v61 }
0x1328   :  { %3027 = vmatpush.bf16.msrb.mxu3 %v4336_v0 }
0x132c   :  { %3028 = vmatpush.bf16.msrb.mxu3 %v4335_v25 }
0x1330   :  { %3029 = vmatpush.bf16.msrb.mxu3 %v4334_v9 }
0x1334   :  { %3030 = vmatpush.bf16.msrb.mxu3 %v4333_v6 }
0x1388   :  { %v2900_v49 = vpop.xlane.xlu0 %2899 }
0x1389   :  { %v2903_v51 = vmul.f32 %v2900_v49, %v4649_v8 }
0x138b   :  { %v2905_v4 = vsub.f32 %v2893_v18, %v2903_v51 }
0x138d   :  { %v2907_v54 = vmul.f32 %v2905_v4, %v2905_v4 }
0x138f   :  { %2909 = vadd.xlane.f32.xlu2 %v2907_v54 }
0x1390   :  { %v2902_v55 = vpop.xlane.xlu2 %2901 }
0x1391   :  { %v2904_v35 = vmul.f32 %v2902_v55, %v4649_v8 }
0x1393   :  { %v2906_v58 = vsub.f32 %v2894_v16, %v2904_v35 }
0x1395   :  { %v2908_v50 = vmul.f32 %v2906_v58, %v2906_v58 }
0x1397   :  { %2911 = vadd.xlane.f32.xlu1 %v2908_v50 }
0x1402   :  { %v2910_v36 = vpop.xlane.xlu2 %2909 }
0x1403   :  { %v2913_v7 = vmul.f32 %v2910_v36, %v4649_v8 }
0x1405   :  { %v2915_v3 = vadd.f32 1e-12, %v2913_v7 }
0x1407   :  { %4464 = vrsqrt.f32 %v2915_v3  ;;  %vm2923_vm13 = vweird.f32 %v2915_v3 }
0x140a   :  { %v2912_v11 = vpop.xlane.xlu1 %2911 }
0x140b   :  { %v2914_v2 = vmul.f32 %v2912_v11, %v4649_v8  ;;  %v4346_v8 = vld [vmem:[%s5788_s22 + $0x28] sm:$0xff] }
0x140c   :  { %3108 = vmatpush.bf16.msra.mxu0 %v4346_v8 }
0x140d   :  { %v4465_v13 = vpop.eup %4464  ;;  %v2916_v43 = vadd.f32 1e-12, %v2914_v2 }
0x140e   :  { %v2918_v5 = vmul.f32 %v4465_v13, %v2915_v3  ;;  %vm2924_vm12 = vweird.f32 %v4465_v13 }
0x140f   :  { %4466 = vrsqrt.f32 %v2916_v43  ;;  %vm2925_vm14 = vmor %vm2923_vm13, %vm2924_vm12  ;;  %vm2933_vm0 = vweird.f32 %v2916_v43 }
0x1410   :  { %v2919_v15 = vmul.f32 %v4465_v13, %v2918_v5  ;;  %3109 = vmatpush.bf16.msra.mxu0 %v4345_v46 }
0x1412   :  { %v2920_v47 = vmul.f32 0.5, %v2919_v15 }
0x1414   :  { %v2921_v12 = vsub.f32 1.5, %v2920_v47  ;;  %3110 = vmatpush.bf16.msra.mxu0 %v4344_v45 }
0x1415   :  { %v4467_v1 = vpop.eup %4466 }
0x1416   :  { %v2928_v20 = vmul.f32 %v4467_v1, %v2916_v43  ;;  %v2922_v19 = vmul.f32 %v4465_v13, %v2921_v12  ;;  %vm2934_vm15 = vweird.f32 %v4467_v1 }
0x1417   :  { %vm2935_vm1 = vmor %vm2933_vm0, %vm2934_vm15 }
0x1418   :  { %v2929_v41 = vmul.f32 %v4467_v1, %v2928_v20  ;;  %v2926_v59 = vsel %vm2925_vm14, %v4465_v13, %v2922_v19  ;;  %3111 = vmatpush.bf16.msra.mxu0 %v4343_v42 }
0x1419   :  { %v2937_v26 = vmul.f32 %v2926_v59, %v2905_v4 }
0x141a   :  { %v2930_v21 = vmul.f32 0.5, %v2929_v41 }
0x141b   :  { %v2942_v29 = vmul.f32 %v4378_v23, %v2937_v26 }
0x141c   :  { %v2931_v63 = vsub.f32 1.5, %v2930_v21  ;;  %3112 = vmatpush.bf16.msra.mxu0 %v4342_v57 }
0x141d   :  { %v2947_v32 = vadd.f32 %v4379_v30, %v2942_v29 }
0x141e   :  { %v2932_v52 = vmul.f32 %v4467_v1, %v2931_v63 }
0x1420   :  { %v2936_v27 = vsel %vm2935_vm1, %v4467_v1, %v2932_v52  ;;  %3113 = vmatpush.bf16.msra.mxu0 %v4341_v38 }
0x1421   :  { %v2938_v28 = vmul.f32 %v2936_v27, %v2906_v58 }
0x1423   :  { %v2943_v40 = vmul.f32 %v4378_v23, %v2938_v28 }
0x1425   :  { %v2948_v39 = vadd.f32 %v4379_v30, %v2943_v40 }
0x1427   :  { %v2950_v34 = vrot.slane %v2948_v39, 7 }
0x1429   :  { %v2953_v31 = vsel %vm2952_vm7, %v2947_v32, %v2950_v34 }
0x142a   :  { %v2954_v60 = vpack.c.bf16 %v2953_v31, %v2953_v31 }
0x142c   :  { %3031 = vmatmul.bf16.vlgmr.msrb.gmra.mxu3 %v2954_v60 }
0x14af   :  { %v3032_v56 = vpop.f32.mrf.mxu3 }
0x14b0   :  { %v3033_v33 = vadd.f32 %v4380_v24, %v3032_v56 }
0x14b2   :  { %4468 = vtanh.f32 %v3033_v33 }
0x14b7   :  { %v3034_v18 = vpop.f32.mrf.mxu3 }
0x14b8   :  { %v4469_v53 = vpop.eup %4468 }
0x14b9   :  { %v3037_v44 = vpack.c.bf16 %v4469_v53, %v4469_v53 }
0x14bb   :  { %3114 = vmatmul.bf16.vlgmr.msra.gmra.mxu0 %v3037_v44 }
0x1538   :  { %v3115_v48 = vpop.f32.mrf.mxu0 }
0x1539   :  { %v3116_v16 = vadd.f32 %v4381_v62, %v3115_v48 }
0x153b   :  { %3119 = vst [vmem:[#allocation4] sm:$0x3] %v3116_v16 }
0x153c   :  { %3130 = dma.vmem_to_hbm [thread:$0]  %s3126_s15, 32, %s3128_s1, [#allocation5]  }
0x1540   :  { %v3117_v49 = vpop.f32.mrf.mxu0 }
0x1541   :  { %4508 = dma.done.wait [#allocation5], 32  }
0x1542   :  { %4509 = vsyncadd [#allocation5], 4294967264 }
0x1543   :  { %3135 = vsyncpa [#allocation5], 1 }

</bundles_post_ra>
